<compile_context>
chip_gen: v6e
topology: v6e:2x2x1
jax: 0.10.0
libtpu: 0.0.40
codegen_flags: <defaults>
</compile_context>

<pallas_src>
import functools
import numpy as np
import jax
import jax.numpy as jnp
from jax import lax
from jax.experimental import pallas as pl
from jax.experimental.pallas import tpu as pltpu

# ----- hyperparameters (small, consistent with the module's __init__) -----
Z_DIMS = 8
HIDDEN = 32
NUM_MIX = 5
NUM_LAYERS = 1
T_TEMP = 1.0                       # self.t
D_IN = 5 + Z_DIMS                  # LSTM input size (13)
P_OUT = 6 * NUM_MIX + 3            # y2params output size (33)
P_PAD = 128                        # lane-dense padded projection width
BATCH = 2
SEQ = 8                            # = seq_len + 1
BP = 8                             # batch padded to one sublane tile

# ----- packed weight-slab row layout (all section starts are multiples of 8) -----
_R_WX0, _R_WX1 = 0, 16             # rows 0:13 used: [W_ih | W_z2hc | 0], x width padded to 16
_R_WHH0, _R_WHH1 = 16, 48          # (32, 128) recurrent weights
_R_WY0, _R_WY1 = 48, 80            # (32, 128) y2params weights (cols >= 33 zero)
_R_B0 = 80                         # row 80: [bg (0:128) | bz (128:192) | 0]
_R_B1 = 81                         # row 81: [by (0:33)  | 0]
_W_ROWS, _W_COLS = 88, 256

HIGHEST = jax.lax.Precision.HIGHEST


# --------------------------- Pallas kernel --------------------------------
def decoder_kernel(x_ref, w_ref, out_ref, h_all_scr, *, seq):
    T = seq
    H = HIDDEN
    M = NUM_MIX
    f32 = jnp.float32
    sqrt_t = np.float32(np.sqrt(T_TEMP))
    inv_t = np.float32(1.0 / T_TEMP)

    # ----- static, tile-aligned views into the packed weight slab -----
    wx = w_ref[_R_WX0:_R_WX1, :]                 # (16, 256)
    whh = w_ref[_R_WHH0:_R_WHH1, 0:4 * H]        # (32, 128)
    wy = w_ref[_R_WY0:_R_WY1, 0:P_PAD]           # (32, 128), cols >= 33 are zero
    b_x = w_ref[_R_B0:_R_B0 + 1, :]              # (1, 256): [bg | bz | 0]
    by = w_ref[_R_B1:_R_B1 + 1, 0:P_PAD]         # (1, 128)

    # ----- ONE fused pre-loop matmul: gate-input projection + z2hc projection -----
    xw = jnp.dot(x_ref[...], wx, precision=HIGHEST,
                 preferred_element_type=f32) + b_x            # (T*BP, 256)
    sg = xw[:, 0:4 * H]                                       # gate pre-acts (+ bias), all t
    hc = jnp.tanh(xw[0:BP, 4 * H:6 * H])                      # z2hc (dropout == identity)
    h = hc[:, 0:H]                                            # (BP, H)
    c = hc[:, H:2 * H]                                        # (BP, H)

    # ----- hoisted per-lane constants for the single-tanh sigmoid rewrite -----
    lane = lax.broadcasted_iota(jnp.int32, (BP, 4 * H), 1)
    is_g = (lane >= 2 * H) & (lane < 3 * H)
    gate_mul = jnp.where(is_g, f32(1.0), f32(0.5))            # pre- and post-scale
    gate_add = jnp.where(is_g, f32(0.0), f32(0.5))

    # ----- fully-unrolled LSTM recurrence; h/c live in vregs -----
    for t in range(T):
        gates = (jnp.dot(h, whh, precision=HIGHEST, preferred_element_type=f32)
                 + sg[t * BP:(t + 1) * BP, :])                # (BP, 4H) order i,f,g,o
        th = jnp.tanh(gates * gate_mul)                       # one EUP push (was sigmoid+tanh)
        act = th * gate_mul + gate_add                        # [sig(i)|sig(f)|tanh(g)|sig(o)]
        i = act[:, 0 * H:1 * H]
        f = act[:, 1 * H:2 * H]
        g = act[:, 2 * H:3 * H]
        o = act[:, 3 * H:4 * H]
        c = f * c + i * g
        h = o * jnp.tanh(c)
        h_all_scr[t * BP:(t + 1) * BP, :] = h                 # off the critical path

    # ----- post-loop y2params + mixture head, one batched matmul, lane-dense output -----
    raw = (jnp.dot(h_all_scr[...], wy, precision=HIGHEST,
                   preferred_element_type=f32) + by)          # (T*BP, 128)

    col = lax.broadcasted_iota(jnp.int32, raw.shape, 1)
    mask_pi = col < M
    mask_q = (col >= 6 * M) & (col < 6 * M + 3)
    mask_sm = mask_pi | mask_q
    mask_sig = (col >= 3 * M) & (col < 5 * M)
    mask_rho = (col >= 5 * M) & (col < 6 * M)

    neg = f32(-1e30)
    scaled = raw * inv_t
    m_pi = jnp.max(jnp.where(mask_pi, scaled, neg), axis=-1, keepdims=True)
    m_q = jnp.max(jnp.where(mask_q, scaled, neg), axis=-1, keepdims=True)
    m_full = jnp.where(mask_pi, m_pi, jnp.where(mask_q, m_q, f32(0.0)))
    # single exp serves both the softmax numerator (pi/q lanes) and sigma = exp(raw) lanes
    e = jnp.exp(jnp.where(mask_sm, scaled - m_full,
                          jnp.where(mask_sig, raw, f32(0.0))))
    s_pi = jnp.sum(jnp.where(mask_pi, e, f32(0.0)), axis=-1, keepdims=True)
    s_q = jnp.sum(jnp.where(mask_q, e, f32(0.0)), axis=-1, keepdims=True)
    denom = jnp.where(mask_pi, s_pi, jnp.where(mask_q, s_q, f32(1.0)))

    out = jnp.where(mask_sm, e / denom,
          jnp.where(mask_sig, e * sqrt_t,
          jnp.where(mask_rho, jnp.tanh(raw), raw)))           # mu lanes + pads: raw

    out_ref[0:T * BP, :] = out                                # single contiguous params store
    out_ref[T * BP:T * BP + BP, :] = jnp.concatenate(         # appended [h | c | 0] tail rows
        [h, c, jnp.zeros((BP, P_PAD - 2 * H), f32)], axis=1)


# ------------------------------ wrapper ------------------------------------
@jax.jit
def decoder_forward(z, S, p):
    """z: (B, z_dims), S: (B, seq_len+1, 5).  Returns ((pi,mu_x,mu_y,sx,sy,rho,q),(h,c))."""
    B, T1, _ = S.shape
    assert B <= BP, "batch must fit in one 8-sublane tile"
    z = z.astype(jnp.float32)
    S = S.astype(jnp.float32)

    # --- activations: time-major, batch padded to 8 sublanes, width padded to 16 ---
    S_t = jnp.transpose(S, (1, 0, 2))                                   # (T1, B, 5)
    z_b = jnp.broadcast_to(z[None, :, :], (T1, B, Z_DIMS))
    x = jnp.concatenate([S_t, z_b], axis=2)                             # (T1, B, 13)
    x_flat = (jnp.zeros((T1, BP, 16), jnp.float32)
              .at[:, :B, :D_IN].set(x)
              .reshape(T1 * BP, 16))

    # --- pack ALL weights/biases into one lane-dense slab (single input DMA) ---
    W = jnp.zeros((_W_ROWS, _W_COLS), jnp.float32)
    W = W.at[0:D_IN, 0:4 * HIDDEN].set(p['wih'])                        # W_ih (13, 128)
    W = W.at[5:D_IN, 4 * HIDDEN:6 * HIDDEN].set(p['wz'])                # z2hc weight (8, 64)
    W = W.at[_R_WHH0:_R_WHH1, 0:4 * HIDDEN].set(p['whh'])               # W_hh (32, 128)
    W = W.at[_R_WY0:_R_WY1, 0:P_OUT].set(p['wy'])                       # y2params (32, 33)
    W = W.at[_R_B0:_R_B0 + 1, 0:4 * HIDDEN].set(p['bg'])                # gate bias
    W = W.at[_R_B0:_R_B0 + 1, 4 * HIDDEN:6 * HIDDEN].set(p['bz'])       # z2hc bias
    W = W.at[_R_B1:_R_B1 + 1, 0:P_OUT].set(p['by'])                     # y2params bias

    vmem = pl.BlockSpec(memory_space=pltpu.MemorySpace.VMEM)
    fn = pl.pallas_call(
        functools.partial(decoder_kernel, seq=T1),
        out_shape=jax.ShapeDtypeStruct((T1 * BP + BP, P_PAD), jnp.float32),
        in_specs=[vmem, vmem],
        out_specs=vmem,
        scratch_shapes=[pltpu.VMEM((T1 * BP, HIDDEN), jnp.float32)],
    )
    out = fn(x_flat, W)

    params = jnp.transpose(out[:T1 * BP].reshape(T1, BP, P_PAD)[:, :B, :], (1, 0, 2))
    M = NUM_MIX
    pi      = params[..., 0 * M:1 * M]
    mu_x    = params[..., 1 * M:2 * M]
    mu_y    = params[..., 2 * M:3 * M]
    sigma_x = params[..., 3 * M:4 * M]
    sigma_y = params[..., 4 * M:5 * M]
    rho_xy  = params[..., 5 * M:6 * M]
    q       = params[..., 6 * M:6 * M + 3]

    hc_tail = out[T1 * BP:T1 * BP + B]                                  # (B, 128)
    h = hc_tail[:, 0:HIDDEN][None]                                      # (num_layers=1, B, H)
    c = hc_tail[:, HIDDEN:2 * HIDDEN][None]
    return (pi, mu_x, mu_y, sigma_x, sigma_y, rho_xy, q), (h, c)


# ---------------------- deterministic parameter init -----------------------
def init_params(key):
    ks = jax.random.split(key, 8)

    def u(k, shape, fan_in):
        lim = 1.0 / np.sqrt(fan_in)
        return jax.random.uniform(k, shape, jnp.float32, -lim, lim)

    wz   = u(ks[0], (Z_DIMS, 2 * HIDDEN), Z_DIMS)       # z2hc.weight^T
    bz   = u(ks[1], (1, 2 * HIDDEN), Z_DIMS)            # z2hc.bias
    wih  = u(ks[2], (D_IN, 4 * HIDDEN), HIDDEN)         # lstm.weight_ih_l0^T
    whh  = u(ks[3], (HIDDEN, 4 * HIDDEN), HIDDEN)       # lstm.weight_hh_l0^T
    b_ih = u(ks[4], (1, 4 * HIDDEN), HIDDEN)
    b_hh = u(ks[5], (1, 4 * HIDDEN), HIDDEN)
    wy   = u(ks[6], (HIDDEN, P_OUT), HIDDEN)            # y2params.weight^T
    by   = u(ks[7], (1, P_OUT), HIDDEN)                 # y2params.bias
    return dict(wz=wz, bz=bz, wih=wih, whh=whh, bg=b_ih + b_hh, wy=wy, by=by)


# ------------------------- pure-JAX reference -------------------------------
def decoder_ref(z, S, p):
    H, M = HIDDEN, NUM_MIX
    dot = functools.partial(jnp.dot, precision=HIGHEST)
    hc = jnp.tanh(dot(z, p['wz']) + p['bz'])
    h0, c0 = hc[:, :H], hc[:, H:]
    B, T1, _ = S.shape
    x = jnp.concatenate([S, jnp.broadcast_to(z[:, None, :], (B, T1, Z_DIMS))], axis=2)

    def step(carry, xt):
        h, c = carry
        gates = dot(xt, p['wih']) + dot(h, p['whh']) + p['bg']
        i = jax.nn.sigmoid(gates[:, 0 * H:1 * H])
        f = jax.nn.sigmoid(gates[:, 1 * H:2 * H])
        g = jnp.tanh(gates[:, 2 * H:3 * H])
        o = jax.nn.sigmoid(gates[:, 3 * H:4 * H])
        c = f * c + i * g
        h = o * jnp.tanh(c)
        return (h, c), h

    (h, c), ys = jax.lax.scan(step, (h0, c0), jnp.transpose(x, (1, 0, 2)))
    ys = jnp.transpose(ys, (1, 0, 2))
    raw = dot(ys, p['wy']) + p['by']
    pi      = jax.nn.softmax(raw[..., 0 * M:1 * M] / T_TEMP, axis=-1)
    sigma_x = jnp.exp(raw[..., 3 * M:4 * M]) * np.sqrt(T_TEMP)
    sigma_y = jnp.exp(raw[..., 4 * M:5 * M]) * np.sqrt(T_TEMP)
    rho_xy  = jnp.tanh(raw[..., 5 * M:6 * M])
    q       = jax.nn.softmax(raw[..., 6 * M:] / T_TEMP, axis=-1)
    return (pi, raw[..., 1 * M:2 * M], raw[..., 2 * M:3 * M],
            sigma_x, sigma_y, rho_xy, q), (h[None], c[None])


# ----------------------------------- main -----------------------------------
if __name__ == "__main__":
    key = jax.random.PRNGKey(0)
    kp, kz, ks = jax.random.split(key, 3)
    params = init_params(kp)

    z = jax.random.normal(kz, (BATCH, Z_DIMS), jnp.float32)
    S = jax.random.normal(ks, (BATCH, SEQ, 5), jnp.float32)

    (pi, mu_x, mu_y, sx, sy, rho, q), (h, c) = decoder_forward(z, S, params)
    jax.block_until_ready((pi, mu_x, mu_y, sx, sy, rho, q, h, c))

    # sanity check vs. pure-JAX reference
    ref_out, (h_ref, c_ref) = decoder_ref(z, S, params)
    for got, want in zip((pi, mu_x, mu_y, sx, sy, rho, q), ref_out):
        np.testing.assert_allclose(np.asarray(got), np.asarray(want), atol=1e-4, rtol=1e-4)
    np.testing.assert_allclose(np.asarray(h), np.asarray(h_ref), atol=1e-4, rtol=1e-4)
    np.testing.assert_allclose(np.asarray(c), np.asarray(c_ref), atol=1e-4, rtol=1e-4)

    assert pi.shape == (BATCH, SEQ, NUM_MIX) and q.shape == (BATCH, SEQ, 3)
    assert h.shape == (NUM_LAYERS, BATCH, HIDDEN) and c.shape == (NUM_LAYERS, BATCH, HIDDEN)
    print("KERNEL_OK")
</pallas_src>

<mosaic_0001>
module attributes {stable_mosaic.version = 11 : i64} {
  func.func @decoder_kernel(%arg0: memref<64x16xf32, #tpu.memory_space<vmem>>, %arg1: memref<88x256xf32, #tpu.memory_space<vmem>>, %arg2: memref<72x128xf32, #tpu.memory_space<vmem>>, %arg3: memref<64x32xf32, #tpu.memory_space<vmem>>) attributes {dimension_semantics = [], scalar_prefetch = 0 : i64, scratch_operands = 1 : i64, tpu.core_type = #tpu.core_type<tc>} {
    %c0 = arith.constant 0 : index
    %c0_0 = arith.constant 0 : index
    %0 = vector.load %arg1[%c0, %c0_0] : memref<88x256xf32, #tpu.memory_space<vmem>>, vector<16x256xf32>
    %c16 = arith.constant 16 : index
    %c0_1 = arith.constant 0 : index
    %1 = vector.load %arg1[%c16, %c0_1] : memref<88x256xf32, #tpu.memory_space<vmem>>, vector<32x128xf32>
    %c48 = arith.constant 48 : index
    %c0_2 = arith.constant 0 : index
    %2 = vector.load %arg1[%c48, %c0_2] : memref<88x256xf32, #tpu.memory_space<vmem>>, vector<32x128xf32>
    %c80 = arith.constant 80 : index
    %c0_3 = arith.constant 0 : index
    %3 = vector.load %arg1[%c80, %c0_3] : memref<88x256xf32, #tpu.memory_space<vmem>>, vector<1x256xf32>
    %c81 = arith.constant 81 : index
    %c0_4 = arith.constant 0 : index
    %4 = vector.load %arg1[%c81, %c0_4] : memref<88x256xf32, #tpu.memory_space<vmem>>, vector<1x128xf32>
    %c0_5 = arith.constant 0 : index
    %c0_6 = arith.constant 0 : index
    %5 = vector.load %arg0[%c0_5, %c0_6] : memref<64x16xf32, #tpu.memory_space<vmem>>, vector<64x16xf32>
    %cst = arith.constant dense<0.000000e+00> : vector<64x256xf32>
    %6 = tpu.matmul %5, %0, %cst {dimension_numbers = #tpu.dot_dimension_numbers<[1], [0], [0], [1], [0, 0, 1, 1], [], []>, precision = #tpu.contract_precision<fp32>} : vector<64x16xf32>, vector<16x256xf32>, vector<64x256xf32> -> vector<64x256xf32>
    %7 = vector.broadcast %3 : vector<1x256xf32> to vector<64x256xf32>
    %8 = arith.addf %6, %7 : vector<64x256xf32>
    %9 = vector.extract_strided_slice %8 {offsets = [0, 0], sizes = [64, 128], strides = [1, 1]} : vector<64x256xf32> to vector<64x128xf32>
    %10 = vector.extract_strided_slice %8 {offsets = [0, 128], sizes = [8, 64], strides = [1, 1]} : vector<64x256xf32> to vector<8x64xf32>
    %11 = math.tanh %10 : vector<8x64xf32>
    %12 = vector.extract_strided_slice %11 {offsets = [0, 0], sizes = [8, 32], strides = [1, 1]} : vector<8x64xf32> to vector<8x32xf32>
    %13 = vector.extract_strided_slice %11 {offsets = [0, 32], sizes = [8, 32], strides = [1, 1]} : vector<8x64xf32> to vector<8x32xf32>
    %14 = tpu.iota {dimensions = array<i32: 1>} : vector<8x128xi32>
    %c64_i32 = arith.constant 64 : i32
    %15 = vector.broadcast %c64_i32 : i32 to vector<8x128xi32>
    %16 = arith.cmpi sge, %14, %15 : vector<8x128xi32>
    %c96_i32 = arith.constant 96 : i32
    %17 = vector.broadcast %c96_i32 : i32 to vector<8x128xi32>
    %18 = arith.cmpi slt, %14, %17 : vector<8x128xi32>
    %19 = arith.andi %16, %18 : vector<8x128xi1>
    %cst_7 = arith.constant 1.000000e+00 : f32
    %cst_8 = arith.constant 5.000000e-01 : f32
    %20 = vector.broadcast %cst_7 : f32 to vector<8x128xf32>
    %21 = vector.broadcast %cst_8 : f32 to vector<8x128xf32>
    %22 = arith.select %19, %20, %21 : vector<8x128xi1>, vector<8x128xf32>
    %cst_9 = arith.constant 0.000000e+00 : f32
    %cst_10 = arith.constant 5.000000e-01 : f32
    %23 = vector.broadcast %cst_9 : f32 to vector<8x128xf32>
    %24 = vector.broadcast %cst_10 : f32 to vector<8x128xf32>
    %25 = arith.select %19, %23, %24 : vector<8x128xi1>, vector<8x128xf32>
    %cst_11 = arith.constant dense<0.000000e+00> : vector<8x128xf32>
    %26 = tpu.matmul %12, %1, %cst_11 {dimension_numbers = #tpu.dot_dimension_numbers<[1], [0], [0], [1], [0, 0, 1, 1], [], []>, precision = #tpu.contract_precision<fp32>} : vector<8x32xf32>, vector<32x128xf32>, vector<8x128xf32> -> vector<8x128xf32>
    %27 = vector.extract_strided_slice %9 {offsets = [0, 0], sizes = [8, 128], strides = [1, 1]} : vector<64x128xf32> to vector<8x128xf32>
    %28 = arith.addf %26, %27 : vector<8x128xf32>
    %29 = arith.mulf %28, %22 : vector<8x128xf32>
    %30 = math.tanh %29 : vector<8x128xf32>
    %31 = arith.mulf %30, %22 : vector<8x128xf32>
    %32 = arith.addf %31, %25 : vector<8x128xf32>
    %33 = vector.extract_strided_slice %32 {offsets = [0, 0], sizes = [8, 32], strides = [1, 1]} : vector<8x128xf32> to vector<8x32xf32>
    %34 = vector.extract_strided_slice %32 {offsets = [0, 32], sizes = [8, 32], strides = [1, 1]} : vector<8x128xf32> to vector<8x32xf32>
    %35 = vector.extract_strided_slice %32 {offsets = [0, 64], sizes = [8, 32], strides = [1, 1]} : vector<8x128xf32> to vector<8x32xf32>
    %36 = vector.extract_strided_slice %32 {offsets = [0, 96], sizes = [8, 32], strides = [1, 1]} : vector<8x128xf32> to vector<8x32xf32>
    %37 = arith.mulf %34, %13 : vector<8x32xf32>
    %38 = arith.mulf %33, %35 : vector<8x32xf32>
    %39 = arith.addf %37, %38 : vector<8x32xf32>
    %40 = math.tanh %39 : vector<8x32xf32>
    %41 = arith.mulf %36, %40 : vector<8x32xf32>
    %c0_12 = arith.constant 0 : index
    %c0_13 = arith.constant 0 : index
    %42 = vector.load %arg3[%c0_12, %c0_13] : memref<64x32xf32, #tpu.memory_space<vmem>>, vector<8x32xf32>
    tpu.vector_store %arg3[%c0_12, %c0_13], %41 {strides = array<i32>} : memref<64x32xf32, #tpu.memory_space<vmem>>, vector<8x32xf32>,
    %cst_14 = arith.constant dense<0.000000e+00> : vector<8x128xf32>
    %43 = tpu.matmul %41, %1, %cst_14 {dimension_numbers = #tpu.dot_dimension_numbers<[1], [0], [0], [1], [0, 0, 1, 1], [], []>, precision = #tpu.contract_precision<fp32>} : vector<8x32xf32>, vector<32x128xf32>, vector<8x128xf32> -> vector<8x128xf32>
    %44 = vector.extract_strided_slice %9 {offsets = [8, 0], sizes = [8, 128], strides = [1, 1]} : vector<64x128xf32> to vector<8x128xf32>
    %45 = arith.addf %43, %44 : vector<8x128xf32>
    %46 = arith.mulf %45, %22 : vector<8x128xf32>
    %47 = math.tanh %46 : vector<8x128xf32>
    %48 = arith.mulf %47, %22 : vector<8x128xf32>
    %49 = arith.addf %48, %25 : vector<8x128xf32>
    %50 = vector.extract_strided_slice %49 {offsets = [0, 0], sizes = [8, 32], strides = [1, 1]} : vector<8x128xf32> to vector<8x32xf32>
    %51 = vector.extract_strided_slice %49 {offsets = [0, 32], sizes = [8, 32], strides = [1, 1]} : vector<8x128xf32> to vector<8x32xf32>
    %52 = vector.extract_strided_slice %49 {offsets = [0, 64], sizes = [8, 32], strides = [1, 1]} : vector<8x128xf32> to vector<8x32xf32>
    %53 = vector.extract_strided_slice %49 {offsets = [0, 96], sizes = [8, 32], strides = [1, 1]} : vector<8x128xf32> to vector<8x32xf32>
    %54 = arith.mulf %51, %39 : vector<8x32xf32>
    %55 = arith.mulf %50, %52 : vector<8x32xf32>
    %56 = arith.addf %54, %55 : vector<8x32xf32>
    %57 = math.tanh %56 : vector<8x32xf32>
    %58 = arith.mulf %53, %57 : vector<8x32xf32>
    %c8 = arith.constant 8 : index
    %c0_15 = arith.constant 0 : index
    %59 = vector.load %arg3[%c8, %c0_15] : memref<64x32xf32, #tpu.memory_space<vmem>>, vector<8x32xf32>
    tpu.vector_store %arg3[%c8, %c0_15], %58 {strides = array<i32>} : memref<64x32xf32, #tpu.memory_space<vmem>>, vector<8x32xf32>,
    %cst_16 = arith.constant dense<0.000000e+00> : vector<8x128xf32>
    %60 = tpu.matmul %58, %1, %cst_16 {dimension_numbers = #tpu.dot_dimension_numbers<[1], [0], [0], [1], [0, 0, 1, 1], [], []>, precision = #tpu.contract_precision<fp32>} : vector<8x32xf32>, vector<32x128xf32>, vector<8x128xf32> -> vector<8x128xf32>
    %61 = vector.extract_strided_slice %9 {offsets = [16, 0], sizes = [8, 128], strides = [1, 1]} : vector<64x128xf32> to vector<8x128xf32>
    %62 = arith.addf %60, %61 : vector<8x128xf32>
    %63 = arith.mulf %62, %22 : vector<8x128xf32>
    %64 = math.tanh %63 : vector<8x128xf32>
    %65 = arith.mulf %64, %22 : vector<8x128xf32>
    %66 = arith.addf %65, %25 : vector<8x128xf32>
    %67 = vector.extract_strided_slice %66 {offsets = [0, 0], sizes = [8, 32], strides = [1, 1]} : vector<8x128xf32> to vector<8x32xf32>
    %68 = vector.extract_strided_slice %66 {offsets = [0, 32], sizes = [8, 32], strides = [1, 1]} : vector<8x128xf32> to vector<8x32xf32>
    %69 = vector.extract_strided_slice %66 {offsets = [0, 64], sizes = [8, 32], strides = [1, 1]} : vector<8x128xf32> to vector<8x32xf32>
    %70 = vector.extract_strided_slice %66 {offsets = [0, 96], sizes = [8, 32], strides = [1, 1]} : vector<8x128xf32> to vector<8x32xf32>
    %71 = arith.mulf %68, %56 : vector<8x32xf32>
    %72 = arith.mulf %67, %69 : vector<8x32xf32>
    %73 = arith.addf %71, %72 : vector<8x32xf32>
    %74 = math.tanh %73 : vector<8x32xf32>
    %75 = arith.mulf %70, %74 : vector<8x32xf32>
    %c16_17 = arith.constant 16 : index
    %c0_18 = arith.constant 0 : index
    %76 = vector.load %arg3[%c16_17, %c0_18] : memref<64x32xf32, #tpu.memory_space<vmem>>, vector<8x32xf32>
    tpu.vector_store %arg3[%c16_17, %c0_18], %75 {strides = array<i32>} : memref<64x32xf32, #tpu.memory_space<vmem>>, vector<8x32xf32>,
    %cst_19 = arith.constant dense<0.000000e+00> : vector<8x128xf32>
    %77 = tpu.matmul %75, %1, %cst_19 {dimension_numbers = #tpu.dot_dimension_numbers<[1], [0], [0], [1], [0, 0, 1, 1], [], []>, precision = #tpu.contract_precision<fp32>} : vector<8x32xf32>, vector<32x128xf32>, vector<8x128xf32> -> vector<8x128xf32>
    %78 = vector.extract_strided_slice %9 {offsets = [24, 0], sizes = [8, 128], strides = [1, 1]} : vector<64x128xf32> to vector<8x128xf32>
    %79 = arith.addf %77, %78 : vector<8x128xf32>
    %80 = arith.mulf %79, %22 : vector<8x128xf32>
    %81 = math.tanh %80 : vector<8x128xf32>
    %82 = arith.mulf %81, %22 : vector<8x128xf32>
    %83 = arith.addf %82, %25 : vector<8x128xf32>
    %84 = vector.extract_strided_slice %83 {offsets = [0, 0], sizes = [8, 32], strides = [1, 1]} : vector<8x128xf32> to vector<8x32xf32>
    %85 = vector.extract_strided_slice %83 {offsets = [0, 32], sizes = [8, 32], strides = [1, 1]} : vector<8x128xf32> to vector<8x32xf32>
    %86 = vector.extract_strided_slice %83 {offsets = [0, 64], sizes = [8, 32], strides = [1, 1]} : vector<8x128xf32> to vector<8x32xf32>
    %87 = vector.extract_strided_slice %83 {offsets = [0, 96], sizes = [8, 32], strides = [1, 1]} : vector<8x128xf32> to vector<8x32xf32>
    %88 = arith.mulf %85, %73 : vector<8x32xf32>
    %89 = arith.mulf %84, %86 : vector<8x32xf32>
    %90 = arith.addf %88, %89 : vector<8x32xf32>
    %91 = math.tanh %90 : vector<8x32xf32>
    %92 = arith.mulf %87, %91 : vector<8x32xf32>
    %c24 = arith.constant 24 : index
    %c0_20 = arith.constant 0 : index
    %93 = vector.load %arg3[%c24, %c0_20] : memref<64x32xf32, #tpu.memory_space<vmem>>, vector<8x32xf32>
    tpu.vector_store %arg3[%c24, %c0_20], %92 {strides = array<i32>} : memref<64x32xf32, #tpu.memory_space<vmem>>, vector<8x32xf32>,
    %cst_21 = arith.constant dense<0.000000e+00> : vector<8x128xf32>
    %94 = tpu.matmul %92, %1, %cst_21 {dimension_numbers = #tpu.dot_dimension_numbers<[1], [0], [0], [1], [0, 0, 1, 1], [], []>, precision = #tpu.contract_precision<fp32>} : vector<8x32xf32>, vector<32x128xf32>, vector<8x128xf32> -> vector<8x128xf32>
    %95 = vector.extract_strided_slice %9 {offsets = [32, 0], sizes = [8, 128], strides = [1, 1]} : vector<64x128xf32> to vector<8x128xf32>
    %96 = arith.addf %94, %95 : vector<8x128xf32>
    %97 = arith.mulf %96, %22 : vector<8x128xf32>
    %98 = math.tanh %97 : vector<8x128xf32>
    %99 = arith.mulf %98, %22 : vector<8x128xf32>
    %100 = arith.addf %99, %25 : vector<8x128xf32>
    %101 = vector.extract_strided_slice %100 {offsets = [0, 0], sizes = [8, 32], strides = [1, 1]} : vector<8x128xf32> to vector<8x32xf32>
    %102 = vector.extract_strided_slice %100 {offsets = [0, 32], sizes = [8, 32], strides = [1, 1]} : vector<8x128xf32> to vector<8x32xf32>
    %103 = vector.extract_strided_slice %100 {offsets = [0, 64], sizes = [8, 32], strides = [1, 1]} : vector<8x128xf32> to vector<8x32xf32>
    %104 = vector.extract_strided_slice %100 {offsets = [0, 96], sizes = [8, 32], strides = [1, 1]} : vector<8x128xf32> to vector<8x32xf32>
    %105 = arith.mulf %102, %90 : vector<8x32xf32>
    %106 = arith.mulf %101, %103 : vector<8x32xf32>
    %107 = arith.addf %105, %106 : vector<8x32xf32>
    %108 = math.tanh %107 : vector<8x32xf32>
    %109 = arith.mulf %104, %108 : vector<8x32xf32>
    %c32 = arith.constant 32 : index
    %c0_22 = arith.constant 0 : index
    %110 = vector.load %arg3[%c32, %c0_22] : memref<64x32xf32, #tpu.memory_space<vmem>>, vector<8x32xf32>
    tpu.vector_store %arg3[%c32, %c0_22], %109 {strides = array<i32>} : memref<64x32xf32, #tpu.memory_space<vmem>>, vector<8x32xf32>,
    %cst_23 = arith.constant dense<0.000000e+00> : vector<8x128xf32>
    %111 = tpu.matmul %109, %1, %cst_23 {dimension_numbers = #tpu.dot_dimension_numbers<[1], [0], [0], [1], [0, 0, 1, 1], [], []>, precision = #tpu.contract_precision<fp32>} : vector<8x32xf32>, vector<32x128xf32>, vector<8x128xf32> -> vector<8x128xf32>
    %112 = vector.extract_strided_slice %9 {offsets = [40, 0], sizes = [8, 128], strides = [1, 1]} : vector<64x128xf32> to vector<8x128xf32>
    %113 = arith.addf %111, %112 : vector<8x128xf32>
    %114 = arith.mulf %113, %22 : vector<8x128xf32>
    %115 = math.tanh %114 : vector<8x128xf32>
    %116 = arith.mulf %115, %22 : vector<8x128xf32>
    %117 = arith.addf %116, %25 : vector<8x128xf32>
    %118 = vector.extract_strided_slice %117 {offsets = [0, 0], sizes = [8, 32], strides = [1, 1]} : vector<8x128xf32> to vector<8x32xf32>
    %119 = vector.extract_strided_slice %117 {offsets = [0, 32], sizes = [8, 32], strides = [1, 1]} : vector<8x128xf32> to vector<8x32xf32>
    %120 = vector.extract_strided_slice %117 {offsets = [0, 64], sizes = [8, 32], strides = [1, 1]} : vector<8x128xf32> to vector<8x32xf32>
    %121 = vector.extract_strided_slice %117 {offsets = [0, 96], sizes = [8, 32], strides = [1, 1]} : vector<8x128xf32> to vector<8x32xf32>
    %122 = arith.mulf %119, %107 : vector<8x32xf32>
    %123 = arith.mulf %118, %120 : vector<8x32xf32>
    %124 = arith.addf %122, %123 : vector<8x32xf32>
    %125 = math.tanh %124 : vector<8x32xf32>
    %126 = arith.mulf %121, %125 : vector<8x32xf32>
    %c40 = arith.constant 40 : index
    %c0_24 = arith.constant 0 : index
    %127 = vector.load %arg3[%c40, %c0_24] : memref<64x32xf32, #tpu.memory_space<vmem>>, vector<8x32xf32>
    tpu.vector_store %arg3[%c40, %c0_24], %126 {strides = array<i32>} : memref<64x32xf32, #tpu.memory_space<vmem>>, vector<8x32xf32>,
    %cst_25 = arith.constant dense<0.000000e+00> : vector<8x128xf32>
    %128 = tpu.matmul %126, %1, %cst_25 {dimension_numbers = #tpu.dot_dimension_numbers<[1], [0], [0], [1], [0, 0, 1, 1], [], []>, precision = #tpu.contract_precision<fp32>} : vector<8x32xf32>, vector<32x128xf32>, vector<8x128xf32> -> vector<8x128xf32>
    %129 = vector.extract_strided_slice %9 {offsets = [48, 0], sizes = [8, 128], strides = [1, 1]} : vector<64x128xf32> to vector<8x128xf32>
    %130 = arith.addf %128, %129 : vector<8x128xf32>
    %131 = arith.mulf %130, %22 : vector<8x128xf32>
    %132 = math.tanh %131 : vector<8x128xf32>
    %133 = arith.mulf %132, %22 : vector<8x128xf32>
    %134 = arith.addf %133, %25 : vector<8x128xf32>
    %135 = vector.extract_strided_slice %134 {offsets = [0, 0], sizes = [8, 32], strides = [1, 1]} : vector<8x128xf32> to vector<8x32xf32>
    %136 = vector.extract_strided_slice %134 {offsets = [0, 32], sizes = [8, 32], strides = [1, 1]} : vector<8x128xf32> to vector<8x32xf32>
    %137 = vector.extract_strided_slice %134 {offsets = [0, 64], sizes = [8, 32], strides = [1, 1]} : vector<8x128xf32> to vector<8x32xf32>
    %138 = vector.extract_strided_slice %134 {offsets = [0, 96], sizes = [8, 32], strides = [1, 1]} : vector<8x128xf32> to vector<8x32xf32>
    %139 = arith.mulf %136, %124 : vector<8x32xf32>
    %140 = arith.mulf %135, %137 : vector<8x32xf32>
    %141 = arith.addf %139, %140 : vector<8x32xf32>
    %142 = math.tanh %141 : vector<8x32xf32>
    %143 = arith.mulf %138, %142 : vector<8x32xf32>
    %c48_26 = arith.constant 48 : index
    %c0_27 = arith.constant 0 : index
    %144 = vector.load %arg3[%c48_26, %c0_27] : memref<64x32xf32, #tpu.memory_space<vmem>>, vector<8x32xf32>
    tpu.vector_store %arg3[%c48_26, %c0_27], %143 {strides = array<i32>} : memref<64x32xf32, #tpu.memory_space<vmem>>, vector<8x32xf32>,
    %cst_28 = arith.constant dense<0.000000e+00> : vector<8x128xf32>
    %145 = tpu.matmul %143, %1, %cst_28 {dimension_numbers = #tpu.dot_dimension_numbers<[1], [0], [0], [1], [0, 0, 1, 1], [], []>, precision = #tpu.contract_precision<fp32>} : vector<8x32xf32>, vector<32x128xf32>, vector<8x128xf32> -> vector<8x128xf32>
    %146 = vector.extract_strided_slice %9 {offsets = [56, 0], sizes = [8, 128], strides = [1, 1]} : vector<64x128xf32> to vector<8x128xf32>
    %147 = arith.addf %145, %146 : vector<8x128xf32>
    %148 = arith.mulf %147, %22 : vector<8x128xf32>
    %149 = math.tanh %148 : vector<8x128xf32>
    %150 = arith.mulf %149, %22 : vector<8x128xf32>
    %151 = arith.addf %150, %25 : vector<8x128xf32>
    %152 = vector.extract_strided_slice %151 {offsets = [0, 0], sizes = [8, 32], strides = [1, 1]} : vector<8x128xf32> to vector<8x32xf32>
    %153 = vector.extract_strided_slice %151 {offsets = [0, 32], sizes = [8, 32], strides = [1, 1]} : vector<8x128xf32> to vector<8x32xf32>
    %154 = vector.extract_strided_slice %151 {offsets = [0, 64], sizes = [8, 32], strides = [1, 1]} : vector<8x128xf32> to vector<8x32xf32>
    %155 = vector.extract_strided_slice %151 {offsets = [0, 96], sizes = [8, 32], strides = [1, 1]} : vector<8x128xf32> to vector<8x32xf32>
    %156 = arith.mulf %153, %141 : vector<8x32xf32>
    %157 = arith.mulf %152, %154 : vector<8x32xf32>
    %158 = arith.addf %156, %157 : vector<8x32xf32>
    %159 = math.tanh %158 : vector<8x32xf32>
    %160 = arith.mulf %155, %159 : vector<8x32xf32>
    %c56 = arith.constant 56 : index
    %c0_29 = arith.constant 0 : index
    %161 = vector.load %arg3[%c56, %c0_29] : memref<64x32xf32, #tpu.memory_space<vmem>>, vector<8x32xf32>
    tpu.vector_store %arg3[%c56, %c0_29], %160 {strides = array<i32>} : memref<64x32xf32, #tpu.memory_space<vmem>>, vector<8x32xf32>,
    %c0_30 = arith.constant 0 : index
    %c0_31 = arith.constant 0 : index
    %162 = vector.load %arg3[%c0_30, %c0_31] : memref<64x32xf32, #tpu.memory_space<vmem>>, vector<64x32xf32>
    %cst_32 = arith.constant dense<0.000000e+00> : vector<64x128xf32>
    %163 = tpu.matmul %162, %2, %cst_32 {dimension_numbers = #tpu.dot_dimension_numbers<[1], [0], [0], [1], [0, 0, 1, 1], [], []>, precision = #tpu.contract_precision<fp32>} : vector<64x32xf32>, vector<32x128xf32>, vector<64x128xf32> -> vector<64x128xf32>
    %164 = vector.broadcast %4 : vector<1x128xf32> to vector<64x128xf32>
    %165 = arith.addf %163, %164 : vector<64x128xf32>
    %166 = tpu.iota {dimensions = array<i32: 1>} : vector<64x128xi32>
    %c5_i32 = arith.constant 5 : i32
    %167 = vector.broadcast %c5_i32 : i32 to vector<64x128xi32>
    %168 = arith.cmpi slt, %166, %167 : vector<64x128xi32>
    %c30_i32 = arith.constant 30 : i32
    %169 = vector.broadcast %c30_i32 : i32 to vector<64x128xi32>
    %170 = arith.cmpi sge, %166, %169 : vector<64x128xi32>
    %c33_i32 = arith.constant 33 : i32
    %171 = vector.broadcast %c33_i32 : i32 to vector<64x128xi32>
    %172 = arith.cmpi slt, %166, %171 : vector<64x128xi32>
    %173 = arith.andi %170, %172 : vector<64x128xi1>
    %174 = arith.ori %168, %173 : vector<64x128xi1>
    %c15_i32 = arith.constant 15 : i32
    %175 = vector.broadcast %c15_i32 : i32 to vector<64x128xi32>
    %176 = arith.cmpi sge, %166, %175 : vector<64x128xi32>
    %c25_i32 = arith.constant 25 : i32
    %177 = vector.broadcast %c25_i32 : i32 to vector<64x128xi32>
    %178 = arith.cmpi slt, %166, %177 : vector<64x128xi32>
    %179 = arith.andi %176, %178 : vector<64x128xi1>
    %c25_i32_33 = arith.constant 25 : i32
    %180 = vector.broadcast %c25_i32_33 : i32 to vector<64x128xi32>
    %181 = arith.cmpi sge, %166, %180 : vector<64x128xi32>
    %c30_i32_34 = arith.constant 30 : i32
    %182 = vector.broadcast %c30_i32_34 : i32 to vector<64x128xi32>
    %183 = arith.cmpi slt, %166, %182 : vector<64x128xi32>
    %184 = arith.andi %181, %183 : vector<64x128xi1>
    %cst_35 = arith.constant 1.000000e+00 : f32
    %185 = vector.broadcast %cst_35 : f32 to vector<64x128xf32>
    %186 = arith.mulf %165, %185 : vector<64x128xf32>
    %cst_36 = arith.constant -1.000000e+30 : f32
    %187 = vector.broadcast %cst_36 : f32 to vector<64x128xf32>
    %188 = arith.select %168, %186, %187 : vector<64x128xi1>, vector<64x128xf32>
    %cst_37 = arith.constant dense<0xFF800000> : vector<64xf32>
    %189 = vector.multi_reduction <maximumf>, %188, %cst_37 [1] : vector<64x128xf32> to vector<64xf32>
    %190 = vector.shape_cast %189 : vector<64xf32> to vector<64x1xf32>
    %cst_38 = arith.constant -1.000000e+30 : f32
    %191 = vector.broadcast %cst_38 : f32 to vector<64x128xf32>
    %192 = arith.select %173, %186, %191 : vector<64x128xi1>, vector<64x128xf32>
    %cst_39 = arith.constant dense<0xFF800000> : vector<64xf32>
    %193 = vector.multi_reduction <maximumf>, %192, %cst_39 [1] : vector<64x128xf32> to vector<64xf32>
    %194 = vector.shape_cast %193 : vector<64xf32> to vector<64x1xf32>
    %cst_40 = arith.constant 0.000000e+00 : f32
    %195 = vector.shape_cast %194 : vector<64x1xf32> to vector<64x1xf32>
    %196 = vector.broadcast %195 : vector<64x1xf32> to vector<64x128xf32>
    %197 = vector.broadcast %cst_40 : f32 to vector<64x128xf32>
    %198 = arith.select %173, %196, %197 : vector<64x128xi1>, vector<64x128xf32>
    %199 = vector.shape_cast %190 : vector<64x1xf32> to vector<64x1xf32>
    %200 = vector.broadcast %199 : vector<64x1xf32> to vector<64x128xf32>
    %201 = arith.select %168, %200, %198 : vector<64x128xi1>, vector<64x128xf32>
    %202 = arith.subf %186, %201 : vector<64x128xf32>
    %cst_41 = arith.constant 0.000000e+00 : f32
    %203 = vector.broadcast %cst_41 : f32 to vector<64x128xf32>
    %204 = arith.select %179, %165, %203 : vector<64x128xi1>, vector<64x128xf32>
    %205 = arith.select %174, %202, %204 : vector<64x128xi1>, vector<64x128xf32>
    %206 = math.exp %205 : vector<64x128xf32>
    %cst_42 = arith.constant 0.000000e+00 : f32
    %207 = vector.broadcast %cst_42 : f32 to vector<64x128xf32>
    %208 = arith.select %168, %206, %207 : vector<64x128xi1>, vector<64x128xf32>
    %cst_43 = arith.constant dense<0.000000e+00> : vector<64xf32>
    %209 = vector.multi_reduction <add>, %208, %cst_43 [1] : vector<64x128xf32> to vector<64xf32>
    %210 = vector.shape_cast %209 : vector<64xf32> to vector<64x1xf32>
    %cst_44 = arith.constant 0.000000e+00 : f32
    %211 = vector.broadcast %cst_44 : f32 to vector<64x128xf32>
    %212 = arith.select %173, %206, %211 : vector<64x128xi1>, vector<64x128xf32>
    %cst_45 = arith.constant dense<0.000000e+00> : vector<64xf32>
    %213 = vector.multi_reduction <add>, %212, %cst_45 [1] : vector<64x128xf32> to vector<64xf32>
    %214 = vector.shape_cast %213 : vector<64xf32> to vector<64x1xf32>
    %cst_46 = arith.constant 1.000000e+00 : f32
    %215 = vector.shape_cast %214 : vector<64x1xf32> to vector<64x1xf32>
    %216 = vector.broadcast %215 : vector<64x1xf32> to vector<64x128xf32>
    %217 = vector.broadcast %cst_46 : f32 to vector<64x128xf32>
    %218 = arith.select %173, %216, %217 : vector<64x128xi1>, vector<64x128xf32>
    %219 = vector.shape_cast %210 : vector<64x1xf32> to vector<64x1xf32>
    %220 = vector.broadcast %219 : vector<64x1xf32> to vector<64x128xf32>
    %221 = arith.select %168, %220, %218 : vector<64x128xi1>, vector<64x128xf32>
    %222 = arith.divf %206, %221 : vector<64x128xf32>
    %cst_47 = arith.constant 1.000000e+00 : f32
    %223 = vector.broadcast %cst_47 : f32 to vector<64x128xf32>
    %224 = arith.mulf %206, %223 : vector<64x128xf32>
    %225 = math.tanh %165 : vector<64x128xf32>
    %226 = arith.select %184, %225, %165 : vector<64x128xi1>, vector<64x128xf32>
    %227 = arith.select %179, %224, %226 : vector<64x128xi1>, vector<64x128xf32>
    %228 = arith.select %174, %222, %227 : vector<64x128xi1>, vector<64x128xf32>
    %c0_48 = arith.constant 0 : index
    %c0_49 = arith.constant 0 : index
    %229 = vector.load %arg2[%c0_48, %c0_49] : memref<72x128xf32, #tpu.memory_space<vmem>>, vector<64x128xf32>
    tpu.vector_store %arg2[%c0_48, %c0_49], %228 {strides = array<i32>} : memref<72x128xf32, #tpu.memory_space<vmem>>, vector<64x128xf32>,
    %cst_50 = arith.constant 0.000000e+00 : f32
    %230 = vector.broadcast %cst_50 : f32 to vector<8x64xf32>
    %231 = tpu.concatenate %160, %158, %230 in 1 : vector<8x32xf32>, vector<8x32xf32>, vector<8x64xf32> -> vector<8x128xf32>
    %c64 = arith.constant 64 : index
    %c0_51 = arith.constant 0 : index
    %232 = vector.load %arg2[%c64, %c0_51] : memref<72x128xf32, #tpu.memory_space<vmem>>, vector<8x128xf32>
    tpu.vector_store %arg2[%c64, %c0_51], %231 {strides = array<i32>} : memref<72x128xf32, #tpu.memory_space<vmem>>, vector<8x128xf32>,
    return
  }
}

</mosaic_0001>

<bundles_post_ra>
// kernel: decoder_forward.1
= control target key start
LH: loop header
LB: loop body
LE: loop exit
PB: predicated region body
PF: predicated region fallthrough
CT: control target
= control target key end

     0   :  { %v7085_v1 = vmov 0.0   ;;  %vm45_vm0 = vcmask 130048   ;;  %v35_v10 = vlaneseq  ;;  %vm7086_vm1 = vmmov 0   ;;  %s7088_s14 = smov 64   ;;  %s7089_s15 = smov 32   ;;  %s8703_s1 = inlined_call_operand.vmem [shape: f32[88,256], index: 1, kind: input, shape index: {}]   ;;  %s8704_s0 = inlined_call_operand.vmem [shape: f32[64,16], index: 0, kind: input, shape index: {}]   ;;  %s8705_s2 = inlined_call_operand.vmem [shape: f32[72,128], index: 2, kind: output, shape index: {}]  }
   0x1   :  { %v14_v0 = vld [vmem:[%s8703_s1 + $0x18] sm:$0xff]  ;;  %138 = vmatprep.mubr.f32.mxu0 %v7085_v1  ;;  %304 = vmatprep.mubr.f32.mxu1 %v7085_v1  ;;  %v13_v3 = vld [vmem:[%s8703_s1 + $0x10] sm:$0xff]  ;;  %v12_v4 = vld [vmem:[%s8703_s1 + $0x8] sm:$0xff]  ;;  %vm870_vm2 = vcmask 261120   ;;  %vm6030_vm6 = vcmask 523264  }
   0x2   :  { %v7110_v2 = vand.u32 4294901760, %v14_v0  ;;  %v7118_v5 = vand.u32 4294901760, %v13_v3  ;;  %v7120_v6 = vand.u32 4294901760, %v12_v4  ;;  %v11_v7 = vld [vmem:[%s8703_s1] sm:$0xff]  ;;  %v27_v9 = vld [vmem:[%s8704_s0 + $0x8] sm:$0xff]  ;;  %v28_v15 = vld [vmem:[%s8704_s0 + $0x10] sm:$0xff] }
   0x3   :  { %v26_v8 = vld [vmem:[%s8704_s0] sm:$0xff]  ;;  %v7132_v11 = vand.u32 4294901760, %v11_v7  ;;  %v50_v14 = vsel %vm45_vm0, %v27_v9, 0  ;;  %v29_v16 = vld [vmem:[%s8704_s0 + $0x18] sm:$0xff]  ;;  %v53_v23 = vsel %vm45_vm0, %v28_v15, 0  ;;  %v31_v42 = vld [vmem:[%s8704_s0 + $0x28] sm:$0xff] }
   0x4   :  { %99 = vmatprep.subr.mxu0 %v7110_v2  ;;  %v7135_v12 = vsub.f32 %v14_v0, %v7110_v2  ;;  %v47_v13 = vsel %vm45_vm0, %v26_v8, 0  ;;  %v7149_v18 = vsub.f32 %v13_v3, %v7118_v5  ;;  %v7152_v19 = vsub.f32 %v12_v4, %v7120_v6  ;;  %v30_v37 = vld [vmem:[%s8704_s0 + $0x20] sm:$0xff]  ;;  %v32_v50 = vld [vmem:[%s8704_s0 + $0x30] sm:$0xff]  ;;  %v33_v62 = vld [vmem:[%s8704_s0 + $0x38] sm:$0xff] }
   0x5   :  { %101 = vmatpush1.msra.mxu0 %v7118_v5  ;;  %v7146_v17 = vand.u32 4294901760, %v47_v13  ;;  %v7154_v20 = vand.u32 4294901760, %v50_v14  ;;  %v7159_v22 = vsub.f32 %v11_v7, %v7132_v11  ;;  %v56_v24 = vsel %vm45_vm0, %v29_v16, 0  ;;  %v7236_v61 = vld [vmem:[%s8703_s1 + $0xa0] ss:$8 sm:$0x3] }
   0x6   :  { %103 = vmatprep.subr.mxu0 %v7120_v6  ;;  %v250_v21 = vand.u32 4294901760, %v7135_v12  ;;  %v256_v26 = vand.u32 4294901760, %v7149_v18  ;;  %v262_v27 = vand.u32 4294901760, %v7152_v19  ;;  %v7177_v31 = vand.u32 4294901760, %v53_v23 }
   0x7   :  { %105 = vmatpush1.msra.mxu0 %v7132_v11  ;;  %v7165_v25 = vsub.f32 %v47_v13, %v7146_v17  ;;  %v7170_v28 = vsub.f32 %v50_v14, %v7154_v20  ;;  %v268_v30 = vand.u32 4294901760, %v7159_v22  ;;  %v7179_v32 = vand.u32 4294901760, %v56_v24 }
   0x8   :  { %v251_v29 = vsub.f32 %v7135_v12, %v250_v21  ;;  %384 = vmatprep.subr.mxu0 %v7135_v12  ;;  %v257_v34 = vsub.f32 %v7149_v18, %v256_v26  ;;  %v263_v35 = vsub.f32 %v7152_v19, %v262_v27  ;;  %v7196_v40 = vsub.f32 %v53_v23, %v7177_v31 }
   0x9   :  { %v141_v33 = vand.u32 4294901760, %v7165_v25  ;;  %v152_v36 = vand.u32 4294901760, %v7170_v28  ;;  %v269_v39 = vsub.f32 %v7159_v22, %v268_v30  ;;  %v7199_v41 = vsub.f32 %v56_v24, %v7179_v32 }
   0xa   :  { %v252_v38 = vand.u32 4294901760, %v251_v29  ;;  %v258_v44 = vand.u32 4294901760, %v257_v34  ;;  %v264_v45 = vand.u32 4294901760, %v263_v35  ;;  %v162_v48 = vand.u32 4294901760, %v7196_v40 }
   0xb   :  { %v142_v43 = vsub.f32 %v7165_v25, %v141_v33  ;;  %v153_v46 = vsub.f32 %v7170_v28, %v152_v36  ;;  %v270_v47 = vand.u32 4294901760, %v269_v39  ;;  %v59_v49 = vsel %vm45_vm0, %v30_v37, 0 }
   0xc   :  { %253 = vmatprep.subr.mxu1 %v252_v38  ;;  %v7215_v52 = vand.u32 4294901760, %v59_v49  ;;  %v62_v53 = vsel %vm45_vm0, %v31_v42, 0  ;;  %v163_v55 = vsub.f32 %v7196_v40, %v162_v48  ;;  %v172_v56 = vand.u32 4294901760, %v7199_v41 }
   0xd   :  { %v143_v51 = vand.u32 4294901760, %v142_v43  ;;  %259 = vmatpush1.msra.mxu1 %v258_v44  ;;  %v154_v54 = vand.u32 4294901760, %v153_v46  ;;  %v7225_v58 = vand.u32 4294901760, %v62_v53  ;;  %v65_v59 = vsel %vm45_vm0, %v32_v50, 0 }
   0xe   :  { %265 = vmatprep.subr.mxu1 %v264_v45  ;;  %v7223_v57 = vsub.f32 %v59_v49, %v7215_v52  ;;  %v7229_v60 = vshrl.u32 %v35_v10, 7  ;;  %v173_v0 = vsub.f32 %v7199_v41, %v172_v56  ;;  %v7249_v3 = vand.u32 4294901760, %v65_v59 }
   0xf   :  { %144 = vmatmul.mubr.f32.vlgmr.msra.gmra.mxu0 %v143_v51  ;;  %271 = vmatpush1.msra.mxu1 %v270_v47  ;;  %v164_v4 = vand.u32 4294901760, %v163_v55  ;;  %v7254_v8 = vsub.f32 %v62_v53, %v7225_v58  ;;  %v68_v13 = vsel %vm45_vm0, %v33_v62, 0 }
  0x10   :  { %387 = vmatpush1.msra.mxu0 %v7149_v18  ;;  %149 = vmatprep.mubr.f32.mxu0 %v7085_v1  ;;  %v37_v63 = vsub.s32 0, %v7229_v60  ;;  %v182_v7 = vand.u32 4294901760, %v7223_v57  ;;  %v174_v14 = vand.u32 4294901760, %v173_v0  ;;  %v7271_v23 = vsub.f32 %v65_v59, %v7249_v3  ;;  %v16_v18 = vld [vmem:[%s8703_s1 + $0x30] sm:$0xff] }
  0x11   :  { %306 = vmatmul.mubr.f32.vlgmr.msra.gmra.mxu1 %v7146_v17  ;;  %513 = vmatprep.subr.mxu1 %v7110_v2  ;;  %v192_v16 = vand.u32 4294901760, %v7254_v8  ;;  %v7273_v24 = vand.u32 4294901760, %v68_v13 }
  0x12   :  { %515 = vmatpush1.msra.mxu1 %v7118_v5  ;;  %311 = vmatprep.mubr.f32.mxu1 %v7085_v1  ;;  %v7257_v9 = vrot.slane %v7236_v61, %v37_v63  ;;  %v183_v15 = vsub.f32 %v7223_v57, %v182_v7  ;;  %v202_v35 = vand.u32 4294901760, %v7271_v23 }
  0x13   :  { %155 = vmatmul.mubr.f32.gmra.mxu0 %v154_v54  ;;  %390 = vmatprep.subr.mxu0 %v7152_v19  ;;  %v193_v34 = vsub.f32 %v7254_v8, %v192_v16  ;;  %v7286_v37 = vsub.f32 %v68_v13, %v7273_v24 }
  0x14   :  { %159 = vmatprep.mubr.f32.mxu0 %v7085_v1  ;;  %393 = vmatpush1.msra.mxu0 %v7159_v22  ;;  %v184_v29 = vand.u32 4294901760, %v183_v15  ;;  %v203_v12 = vsub.f32 %v7271_v23, %v202_v35  ;;  %v7371_v22 = vand.u32 4294901760, %v16_v18 }
  0x15   :  { %313 = vmatmul.mubr.f32.gmra.mxu1 %v7154_v20  ;;  %517 = vmatprep.subr.mxu1 %v7120_v6 }
  0x16   :  { %317 = vmatprep.mubr.f32.mxu1 %v7085_v1  ;;  %519 = vmatpush1.msra.mxu1 %v7132_v11  ;;  %v204_v38 = vand.u32 4294901760, %v203_v12 }
  0x17   :  { %165 = vmatmul.mubr.f32.gmra.mxu0 %v164_v4  ;;  %649 = vmatprep.subr.mxu0 %v250_v21  ;;  %v212_v21 = vand.u32 4294901760, %v7286_v37 }
  0x18   :  { %169 = vmatprep.mubr.f32.mxu0 %v7085_v1  ;;  %773 = vmatprep.subr.mxu1 %v7110_v2  ;;  %v194_v2 = vand.u32 4294901760, %v193_v34 }
  0x19   :  { %319 = vmatmul.mubr.f32.gmra.mxu1 %v7177_v31  ;;  %v213_v39 = vsub.f32 %v7286_v37, %v212_v21 }
  0x1a   :  { %323 = vmatprep.mubr.f32.mxu1 %v7085_v1 }
  0x1b   :  { %175 = vmatmul.mubr.f32.gmra.mxu0 %v174_v14  ;;  %v214_v42 = vand.u32 4294901760, %v213_v39 }
  0x1c   :  { %179 = vmatprep.mubr.f32.mxu0 %v7085_v1 }
  0x1d   :  { %325 = vmatmul.mubr.f32.gmra.mxu1 %v7179_v32 }
  0x1e   :  { %329 = vmatprep.mubr.f32.mxu1 %v7085_v1 }
  0x1f   :  { %185 = vmatmul.mubr.f32.gmra.mxu0 %v184_v29 }
  0x20   :  { %189 = vmatprep.mubr.f32.mxu0 %v7085_v1 }
  0x21   :  { %331 = vmatmul.mubr.f32.gmra.mxu1 %v7215_v52 }
  0x22   :  { %335 = vmatprep.mubr.f32.mxu1 %v7085_v1 }
  0x23   :  { %195 = vmatmul.mubr.f32.gmra.mxu0 %v194_v2 }
  0x24   :  { %199 = vmatprep.mubr.f32.mxu0 %v7085_v1 }
  0x25   :  { %337 = vmatmul.mubr.f32.gmra.mxu1 %v7225_v58 }
  0x26   :  { %341 = vmatprep.mubr.f32.mxu1 %v7085_v1 }
  0x27   :  { %205 = vmatmul.mubr.f32.gmra.mxu0 %v204_v38 }
  0x28   :  { %209 = vmatprep.mubr.f32.mxu0 %v7085_v1 }
  0x29   :  { %343 = vmatmul.mubr.f32.gmra.mxu1 %v7249_v3 }
  0x2a   :  { %347 = vmatprep.mubr.f32.mxu1 %v7085_v1 }
  0x2b   :  { %215 = vmatmul.mubr.f32.gmra.mxu0 %v214_v42 }
  0x2c   :  { %426 = vmatprep.mubr.f32.mxu0 %v7085_v1 }
  0x2d   :  { %349 = vmatmul.mubr.f32.gmra.mxu1 %v7273_v24 }
  0x2e   :  { %552 = vmatprep.mubr.f32.mxu1 %v7085_v1 }
  0x2f   :  { %429 = vmatmul.mubr.f32.vlgmr.msra.gmra.mxu0 %v7165_v25 }
  0x30   :  { %653 = vmatpush1.msra.mxu0 %v256_v26  ;;  %434 = vmatprep.mubr.f32.mxu0 %v7085_v1 }
  0x31   :  { %556 = vmatmul.mubr.f32.vlgmr.msra.gmra.mxu1 %v141_v33  ;;  %657 = vmatprep.subr.mxu0 %v262_v27 }
  0x32   :  { %775 = vmatpush1.msra.mxu1 %v7118_v5  ;;  %561 = vmatprep.mubr.f32.mxu1 %v7085_v1  ;;  %v18_v5 = vld [vmem:[%s8703_s1 + $0x50] sm:$0xff] }
  0x33   :  { %437 = vmatmul.mubr.f32.gmra.mxu0 %v7170_v28  ;;  %777 = vmatprep.subr.mxu1 %v7120_v6  ;;  %v17_v6 = vld [vmem:[%s8703_s1 + $0x40] sm:$0xff] }
  0x34   :  { %441 = vmatprep.mubr.f32.mxu0 %v7085_v1  ;;  %661 = vmatpush1.msra.mxu0 %v268_v30  ;;  %v7365_v19 = vand.u32 4294901760, %v17_v6  ;;  %v15_v28 = vld [vmem:[%s8703_s1 + $0x20] sm:$0xff] }
  0x35   :  { %565 = vmatmul.mubr.f32.gmra.mxu1 %v152_v36  ;;  %6350 = vmatprep.subr.mxu0 %v7085_v1 }
  0x36   :  { %569 = vmatprep.mubr.f32.mxu1 %v7085_v1  ;;  %779 = vmatpush1.msra.mxu1 %v7132_v11  ;;  %v7358_v11 = vand.u32 4294901760, %v18_v5  ;;  %v7415_v27 = vsub.f32 %v17_v6, %v7365_v19 }
  0x37   :  { %444 = vmatmul.mubr.f32.gmra.mxu0 %v7196_v40  ;;  %6361 = vmatprep.subr.mxu1 %v7085_v1 }
  0x38   :  { %448 = vmatprep.mubr.f32.mxu0 %v7085_v1  ;;  %v7422_v30 = vand.u32 4294901760, %v7415_v27 }
  0x39   :  { %573 = vmatmul.mubr.f32.gmra.mxu1 %v162_v48 }
  0x3a   :  { %577 = vmatprep.mubr.f32.mxu1 %v7085_v1  ;;  %v988_v33 = vsub.f32 %v7415_v27, %v7422_v30 }
  0x3b   :  { %451 = vmatmul.mubr.f32.gmra.mxu0 %v7199_v41 }
  0x3c   :  { %455 = vmatprep.mubr.f32.mxu0 %v7085_v1  ;;  %v7440_v41 = vand.u32 4294901760, %v988_v33 }
  0x3d   :  { %581 = vmatmul.mubr.f32.gmra.mxu1 %v172_v56 }
  0x3e   :  { %585 = vmatprep.mubr.f32.mxu1 %v7085_v1 }
  0x3f   :  { %458 = vmatmul.mubr.f32.gmra.mxu0 %v7223_v57 }
  0x40   :  { %462 = vmatprep.mubr.f32.mxu0 %v7085_v1 }
  0x41   :  { %589 = vmatmul.mubr.f32.gmra.mxu1 %v182_v7 }
  0x42   :  { %593 = vmatprep.mubr.f32.mxu1 %v7085_v1 }
  0x43   :  { %465 = vmatmul.mubr.f32.gmra.mxu0 %v7254_v8 }
  0x44   :  { %469 = vmatprep.mubr.f32.mxu0 %v7085_v1 }
  0x45   :  { %597 = vmatmul.mubr.f32.gmra.mxu1 %v192_v16 }
  0x46   :  { %601 = vmatprep.mubr.f32.mxu1 %v7085_v1 }
  0x47   :  { %472 = vmatmul.mubr.f32.gmra.mxu0 %v7271_v23 }
  0x48   :  { %476 = vmatprep.mubr.f32.mxu0 %v7085_v1 }
  0x49   :  { %605 = vmatmul.mubr.f32.gmra.mxu1 %v202_v35 }
  0x4a   :  { %609 = vmatprep.mubr.f32.mxu1 %v7085_v1 }
  0x4b   :  { %479 = vmatmul.mubr.f32.gmra.mxu0 %v7286_v37 }
  0x4c   :  { %694 = vmatprep.mubr.f32.mxu0 %v7085_v1 }
  0x4d   :  { %613 = vmatmul.mubr.f32.gmra.mxu1 %v212_v21 }
  0x4e   :  { %812 = vmatprep.mubr.f32.mxu1 %v7085_v1 }
  0x4f   :  { %696 = vmatmul.mubr.f32.vlgmr.msra.gmra.mxu0 %v7146_v17 }
  0x50   :  { %701 = vmatprep.mubr.f32.mxu0 %v7085_v1  ;;  %6351 = vmatpush3.msra.mxu0 %v7358_v11 }
  0x51   :  { %814 = vmatmul.mubr.f32.vlgmr.msra.gmra.mxu1 %v7146_v17  ;;  %6352 = vmatprep.subr.mxu0 %v7085_v1  ;;  %v7405_v17 = vsub.f32 %v18_v5, %v7358_v11 }
  0x52   :  { %819 = vmatprep.mubr.f32.mxu1 %v7085_v1  ;;  %6353 = vmatpush3.msra.mxu0 %v7365_v19 }
  0x53   :  { %703 = vmatmul.mubr.f32.gmra.mxu0 %v7154_v20  ;;  %6354 = vmatprep.subr.mxu0 %v7085_v1 }
  0x54   :  { %707 = vmatprep.mubr.f32.mxu0 %v7085_v1  ;;  %6355 = vmatpush3.msra.mxu0 %v7371_v22 }
  0x55   :  { %821 = vmatmul.mubr.f32.gmra.mxu1 %v7154_v20  ;;  %6356 = vmatprep.subr.mxu0 %v7085_v1  ;;  %v7408_v20 = vand.u32 4294901760, %v7405_v17 }
  0x56   :  { %825 = vmatprep.mubr.f32.mxu1 %v7085_v1 }
  0x57   :  { %709 = vmatmul.mubr.f32.gmra.mxu0 %v7177_v31  ;;  %v981_v25 = vsub.f32 %v7405_v17, %v7408_v20 }
  0x58   :  { %713 = vmatprep.mubr.f32.mxu0 %v7085_v1 }
  0x59   :  { %827 = vmatmul.mubr.f32.gmra.mxu1 %v7177_v31  ;;  %v7412_v26 = vand.u32 4294901760, %v981_v25  ;;  %v7425_v31 = vsub.f32 %v16_v18, %v7371_v22 }
  0x5a   :  { %831 = vmatprep.mubr.f32.mxu1 %v7085_v1 }
  0x5b   :  { %715 = vmatmul.mubr.f32.gmra.mxu0 %v7179_v32  ;;  %6362 = vmatpush3.msra.mxu1 %v7412_v26  ;;  %v7433_v36 = vand.u32 4294901760, %v7425_v31 }
  0x5c   :  { %719 = vmatprep.mubr.f32.mxu0 %v7085_v1  ;;  %6363 = vmatprep.subr.mxu1 %v7085_v1 }
  0x5d   :  { %833 = vmatmul.mubr.f32.gmra.mxu1 %v7179_v32  ;;  %v7427_v32 = vand.u32 4294901760, %v15_v28  ;;  %v995_v43 = vsub.f32 %v7425_v31, %v7433_v36 }
  0x5e   :  { %837 = vmatprep.mubr.f32.mxu1 %v7085_v1  ;;  %6364 = vmatpush3.msra.mxu1 %v7440_v41 }
  0x5f   :  { %721 = vmatmul.mubr.f32.gmra.mxu0 %v7215_v52  ;;  %v7436_v40 = vsub.f32 %v15_v28, %v7427_v32  ;;  %v7448_v45 = vand.u32 4294901760, %v995_v43  ;;  %6365 = vmatprep.subr.mxu1 %v7085_v1 }
  0x60   :  { %725 = vmatprep.mubr.f32.mxu0 %v7085_v1  ;;  %6357 = vmatpush3.msra.mxu0 %v7427_v32 }
  0x61   :  { %839 = vmatmul.mubr.f32.gmra.mxu1 %v7215_v52  ;;  %6372 = vmatprep.subr.mxu0 %v7085_v1  ;;  %v7445_v44 = vand.u32 4294901760, %v7436_v40 }
  0x62   :  { %843 = vmatprep.mubr.f32.mxu1 %v7085_v1  ;;  %6366 = vmatpush3.msra.mxu1 %v7448_v45 }
  0x63   :  { %727 = vmatmul.mubr.f32.gmra.mxu0 %v7225_v58  ;;  %v1002_v46 = vsub.f32 %v7436_v40, %v7445_v44  ;;  %6367 = vmatprep.subr.mxu1 %v7085_v1 }
  0x64   :  { %731 = vmatprep.mubr.f32.mxu0 %v7085_v1 }
  0x65   :  { %845 = vmatmul.mubr.f32.gmra.mxu1 %v7225_v58  ;;  %v7454_v47 = vand.u32 4294901760, %v1002_v46 }
  0x66   :  { %849 = vmatprep.mubr.f32.mxu1 %v7085_v1 }
  0x67   :  { %733 = vmatmul.mubr.f32.gmra.mxu0 %v7249_v3  ;;  %6368 = vmatpush3.msra.mxu1 %v7454_v47 }
  0x68   :  { %737 = vmatprep.mubr.f32.mxu0 %v7085_v1  ;;  %6383 = vmatprep.subr.mxu1 %v7085_v1 }
  0x69   :  { %851 = vmatmul.mubr.f32.gmra.mxu1 %v7249_v3 }
  0x6a   :  { %855 = vmatprep.mubr.f32.mxu1 %v7085_v1 }
  0x6b   :  { %739 = vmatmul.mubr.f32.gmra.mxu0 %v7273_v24 }
  0x6c   :  { %6358 = vmatprep.mubr.msk.f32.mxu0 %vm7086_vm1, %v7085_v1 }
  0x6d   :  { %857 = vmatmul.mubr.f32.gmra.mxu1 %v7273_v24 }
  0x6e   :  { %6369 = vmatprep.mubr.msk.f32.mxu1 %vm7086_vm1, %v7085_v1 }
  0xcf   :  { %v145_v48 = vpop.f32.mrf.mxu0 }
  0xd0   :  { %v146_v49 = vadd.f32 %v145_v48, %v7257_v9 }
  0xd1   :  { %v7464_v50 = vpop.f32.mrf.mxu0  ;;  %v307_v51 = vpop.f32.mrf.mxu1 }
  0xd2   :  { %v308_v52 = vadd.f32 %v307_v51, %v146_v49 }
  0xd3   :  { %v156_v53 = vpop.f32.mrf.mxu0  ;;  %v7466_v54 = vpop.f32.mrf.mxu1 }
  0xd4   :  { %v157_v55 = vadd.f32 %v156_v53, %v7257_v9 }
  0xd5   :  { %v158_v56 = vpop.f32.mrf.mxu0  ;;  %v314_v57 = vpop.f32.mrf.mxu1 }
  0xd6   :  { %v315_v58 = vadd.f32 %v314_v57, %v157_v55 }
  0xd7   :  { %v166_v59 = vpop.f32.mrf.mxu0  ;;  %v316_v62 = vpop.f32.mrf.mxu1 }
  0xd8   :  { %v167_v63 = vadd.f32 %v166_v59, %v7257_v9 }
  0xd9   :  { %v168_v0 = vpop.f32.mrf.mxu0  ;;  %v320_v3 = vpop.f32.mrf.mxu1 }
  0xda   :  { %v321_v4 = vadd.f32 %v320_v3, %v167_v63 }
  0xdb   :  { %v176_v7 = vpop.f32.mrf.mxu0  ;;  %v322_v8 = vpop.f32.mrf.mxu1 }
  0xdc   :  { %v177_v13 = vadd.f32 %v176_v7, %v7257_v9 }
  0xdd   :  { %v178_v14 = vpop.f32.mrf.mxu0  ;;  %v326_v15 = vpop.f32.mrf.mxu1 }
  0xde   :  { %v327_v16 = vadd.f32 %v326_v15, %v177_v13 }
  0xdf   :  { %v186_v23 = vpop.f32.mrf.mxu0  ;;  %v328_v24 = vpop.f32.mrf.mxu1 }
  0xe0   :  { %v187_v29 = vadd.f32 %v186_v23, %v7257_v9 }
  0xe1   :  { %v188_v34 = vpop.f32.mrf.mxu0  ;;  %v332_v35 = vpop.f32.mrf.mxu1 }
  0xe2   :  { %v333_v37 = vadd.f32 %v332_v35, %v187_v29 }
  0xe3   :  { %v196_v2 = vpop.f32.mrf.mxu0  ;;  %v334_v12 = vpop.f32.mrf.mxu1 }
  0xe4   :  { %v197_v21 = vadd.f32 %v196_v2, %v7257_v9 }
  0xe5   :  { %v198_v38 = vpop.f32.mrf.mxu0  ;;  %v338_v39 = vpop.f32.mrf.mxu1 }
  0xe6   :  { %v339_v42 = vadd.f32 %v338_v39, %v197_v21  ;;  %v41_v38 = vsub.s32 1, %v7229_v60 }
  0xe7   :  { %v206_v5 = vpop.f32.mrf.mxu0  ;;  %v340_v6 = vpop.f32.mrf.mxu1 }
  0xe8   :  { %v207_v18 = vadd.f32 %v206_v5, %v7257_v9 }
  0xe9   :  { %v208_v25 = vpop.f32.mrf.mxu0  ;;  %v344_v28 = vpop.f32.mrf.mxu1 }
  0xea   :  { %v345_v33 = vadd.f32 %v344_v28, %v207_v18  ;;  %v42_v28 = vrot.slane %v7236_v61, %v41_v38 }
  0xeb   :  { %v216_v43 = vpop.f32.mrf.mxu0  ;;  %v346_v46 = vpop.f32.mrf.mxu1 }
  0xec   :  { %v217_v48 = vadd.f32 %v216_v43, %v7257_v9 }
  0xed   :  { %v218_v49 = vpop.f32.mrf.mxu0  ;;  %v350_v51 = vpop.f32.mrf.mxu1 }
  0xee   :  { %v351_v53 = vadd.f32 %v350_v51, %v217_v48 }
  0xef   :  { %v430_v55 = vpop.f32.mrf.mxu0  ;;  %v352_v56 = vpop.f32.mrf.mxu1 }
  0xf0   :  { %v431_v57 = vadd.f32 %v430_v55, %v308_v52 }
  0xf1   :  { %v432_v59 = vpop.f32.mrf.mxu0  ;;  %v557_v62 = vpop.f32.mrf.mxu1 }
  0xf2   :  { %v558_v63 = vadd.f32 %v557_v62, %v431_v57 }
  0xf3   :  { %v438_v0 = vpop.f32.mrf.mxu0  ;;  %v559_v3 = vpop.f32.mrf.mxu1 }
  0xf4   :  { %v439_v7 = vadd.f32 %v438_v0, %v315_v58 }
  0xf5   :  { %v440_v8 = vpop.f32.mrf.mxu0  ;;  %v566_v13 = vpop.f32.mrf.mxu1 }
  0xf6   :  { %v567_v14 = vadd.f32 %v566_v13, %v439_v7 }
  0xf7   :  { %v445_v15 = vpop.f32.mrf.mxu0  ;;  %v568_v23 = vpop.f32.mrf.mxu1 }
  0xf8   :  { %v446_v24 = vadd.f32 %v445_v15, %v321_v4 }
  0xf9   :  { %v447_v29 = vpop.f32.mrf.mxu0  ;;  %v574_v9 = vpop.f32.mrf.mxu1 }
  0xfa   :  { %v575_v34 = vadd.f32 %v574_v9, %v446_v24 }
  0xfb   :  { %v452_v35 = vpop.f32.mrf.mxu0  ;;  %v576_v2 = vpop.f32.mrf.mxu1 }
  0xfc   :  { %v453_v12 = vadd.f32 %v452_v35, %v327_v16  ;;  %v148_v16 = vadd.f32 %v7464_v50, %v42_v28 }
  0xfd   :  { %v454_v21 = vpop.f32.mrf.mxu0  ;;  %v582_v52 = vpop.f32.mrf.mxu1 }
  0xfe   :  { %v583_v39 = vadd.f32 %v582_v52, %v453_v12 }
  0xff   :  { %v459_v5 = vpop.f32.mrf.mxu0  ;;  %v584_v6 = vpop.f32.mrf.mxu1 }
 0x100   :  { %v460_v58 = vadd.f32 %v459_v5, %v333_v37  ;;  %v310_v37 = vadd.f32 %v7466_v54, %v148_v16 }
 0x101   :  { %v461_v18 = vpop.f32.mrf.mxu0  ;;  %v590_v25 = vpop.f32.mrf.mxu1 }
 0x102   :  { %v591_v43 = vadd.f32 %v590_v25, %v460_v58  ;;  %v433_v61 = vadd.f32 %v432_v59, %v310_v37 }
 0x103   :  { %v466_v4 = vpop.f32.mrf.mxu0  ;;  %v592_v46 = vpop.f32.mrf.mxu1 }
 0x104   :  { %v467_v48 = vadd.f32 %v466_v4, %v339_v42  ;;  %v560_v35 = vadd.f32 %v559_v3, %v433_v61 }
 0x105   :  { %v468_v49 = vpop.f32.mrf.mxu0  ;;  %v598_v51 = vpop.f32.mrf.mxu1 }
 0x106   :  { %v599_v55 = vadd.f32 %v598_v51, %v467_v48 }
 0x107   :  { %v473_v56 = vpop.f32.mrf.mxu0  ;;  %v600_v57 = vpop.f32.mrf.mxu1 }
 0x108   :  { %v474_v60 = vadd.f32 %v473_v56, %v345_v33 }
 0x109   :  { %v475_v62 = vpop.f32.mrf.mxu0  ;;  %v606_v0 = vpop.f32.mrf.mxu1 }
 0x10a   :  { %v607_v7 = vadd.f32 %v606_v0, %v474_v60 }
 0x10b   :  { %v480_v8 = vpop.f32.mrf.mxu0  ;;  %v608_v13 = vpop.f32.mrf.mxu1 }
 0x10c   :  { %v481_v15 = vadd.f32 %v480_v8, %v351_v53 }
 0x10d   :  { %v482_v23 = vpop.f32.mrf.mxu0  ;;  %v614_v24 = vpop.f32.mrf.mxu1 }
 0x10e   :  { %v615_v42 = vadd.f32 %v614_v24, %v481_v15 }
 0x10f   :  { %v697_v29 = vpop.f32.mrf.mxu0  ;;  %v616_v9 = vpop.f32.mrf.mxu1 }
 0x110   :  { %v698_v50 = vadd.f32 %v697_v29, %v558_v63 }
 0x111   :  { %v699_v2 = vpop.f32.mrf.mxu0  ;;  %v815_v12 = vpop.f32.mrf.mxu1 }
 0x112   :  { %v700_v21 = vadd.f32 %v699_v2, %v560_v35  ;;  %v7479_v33 = vadd.f32 %v815_v12, %v698_v50 }
 0x113   :  { %v704_v52 = vpop.f32.mrf.mxu0  ;;  %v817_v38 = vpop.f32.mrf.mxu1 }
 0x114   :  { %v705_v54 = vadd.f32 %v704_v52, %v567_v14  ;;  %v818_v5 = vadd.f32 %v817_v38, %v700_v21 }
 0x115   :  { %v706_v6 = vpop.f32.mrf.mxu0  ;;  %v822_v58 = vpop.f32.mrf.mxu1 }
 0x116   :  { %7003 = vtanh.f32 %v818_v5  ;;  %v7481_v53 = vadd.f32 %v822_v58, %v705_v54 }
 0x117   :  { %v710_v59 = vpop.f32.mrf.mxu0  ;;  %v824_v18 = vpop.f32.mrf.mxu1 }
 0x118   :  { %v711_v25 = vadd.f32 %v710_v59, %v575_v34 }
 0x119   :  { %v712_v28 = vpop.f32.mrf.mxu0  ;;  %v828_v3 = vpop.f32.mrf.mxu1 }
 0x11a   :  { %v7483_v63 = vadd.f32 %v828_v3, %v711_v25 }
 0x11b   :  { %v716_v4 = vpop.f32.mrf.mxu0  ;;  %v830_v46 = vpop.f32.mrf.mxu1 }
 0x11c   :  { %v717_v48 = vadd.f32 %v716_v4, %v583_v39 }
 0x11d   :  { %v718_v49 = vpop.f32.mrf.mxu0  ;;  %v834_v51 = vpop.f32.mrf.mxu1 }
 0x11e   :  { %v7485_v16 = vadd.f32 %v834_v51, %v717_v48  ;;  %v7567_v49 = vand.u32 127, %v35_v10 }
 0x11f   :  { %v722_v14 = vpop.f32.mrf.mxu0  ;;  %v836_v56 = vpop.f32.mrf.mxu1 }
 0x120   :  { %v723_v57 = vadd.f32 %v722_v14, %v591_v43  ;;  %vm865_vm3 = vcmp.ge.s32.totalorder %v7567_v49, 64  ;;  %vm866_vm4 = vcmp.lt.s32.totalorder %v7567_v49, 96  ;;  %vm5795_vm7 = vcmp.ge.s32.totalorder %v7567_v49, 30 }
 0x121   :  { %v724_v60 = vpop.f32.mrf.mxu0  ;;  %v840_v62 = vpop.f32.mrf.mxu1  ;;  %vm867_vm5 = vmand %vm865_vm3, %vm866_vm4  ;;  %vm5796_vm8 = vcmp.lt.s32.totalorder %v7567_v49, 33  ;;  %vm5794_vm10 = vcmp.lt.s32.totalorder %v7567_v49, 5  ;;  %vm5799_vm11 = vcmp.ge.s32.totalorder %v7567_v49, 15  ;;  %vm5800_vm12 = vcmp.lt.s32.totalorder %v7567_v49, 25 }
 0x122   :  { %v7487_v0 = vadd.f32 %v840_v62, %v723_v57  ;;  %vm8323_vm9 = vmand %vm5795_vm7, %vm5796_vm8  ;;  %vm5802_vm15 = vcmp.ge.s32.totalorder %v7567_v49, 25  ;;  %vm5803_vm0 = vcmp.lt.s32.totalorder %v7567_v49, 30 }
 0x123   :  { %v7489_v34 = vpop.eup %7003  ;;  %v728_v37 = vpop.f32.mrf.mxu0  ;;  %vm8405_vm13 = vmand %vm5799_vm11, %vm5800_vm12 }
 0x124   :  { %v842_v8 = vpop.f32.mrf.mxu1  ;;  %v729_v13 = vadd.f32 %v728_v37, %v599_v55  ;;  %v872_v39 = vsel %vm870_vm2, %v7489_v34, 0  ;;  %vm8415_vm14 = vmor %vm5794_vm10, %vm8323_vm9 }
 0x125   :  { %v730_v61 = vpop.f32.mrf.mxu0  ;;  %v7493_v23 = vand.u32 4294901760, %v872_v39 }
 0x126   :  { %v846_v15 = vpop.f32.mrf.mxu1 }
 0x127   :  { %v7495_v24 = vadd.f32 %v846_v15, %v729_v13  ;;  %v734_v43 = vpop.f32.mrf.mxu0  ;;  %6370 = vmatmul.mubr.f32.vlgmr.msra.gmra.mxu1 %v7493_v23  ;;  %v944_v9 = vsub.f32 %v872_v39, %v7493_v23  ;;  %v7087_v13 = vmov 0.5  }
 0x128   :  { %v848_v29 = vpop.f32.mrf.mxu1  ;;  %v735_v35 = vadd.f32 %v734_v43, %v607_v7  ;;  %6384 = vmatpush3.msra.mxu1 %v7358_v11  ;;  %6391 = vmatprep.mubr.msk.f32.mxu1 %vm7086_vm1, %v7085_v1  ;;  %v7571_v39 = vsel %vm867_vm5, 1.0, %v7087_v13 }
 0x129   :  { %v736_v55 = vpop.f32.mrf.mxu0  ;;  %6385 = vmatprep.subr.mxu1 %v7085_v1  ;;  %v945_v2 = vand.u32 4294901760, %v944_v9 }
 0x12a   :  { %v852_v50 = vpop.f32.mrf.mxu1  ;;  %6386 = vmatpush3.msra.mxu1 %v7365_v19 }
 0x12b   :  { %v7503_v12 = vadd.f32 %v852_v50, %v735_v35  ;;  %v740_v21 = vpop.f32.mrf.mxu0  ;;  %6387 = vmatprep.subr.mxu1 %v7085_v1  ;;  %v946_v38 = vsub.f32 %v944_v9, %v945_v2 }
 0x12c   :  { %v854_v52 = vpop.f32.mrf.mxu1  ;;  %v741_v7 = vadd.f32 %v740_v21, %v615_v42  ;;  %6388 = vmatpush3.msra.mxu1 %v7371_v22 }
 0x12d   :  { %6389 = vmatprep.subr.mxu1 %v7085_v1  ;;  %v947_v5 = vand.u32 4294901760, %v946_v38  ;;  %v742_v6 = vpop.f32.mrf.mxu0 }
 0x12e   :  { %v858_v54 = vpop.f32.mrf.mxu1  ;;  %6390 = vmatpush3.msra.mxu1 %v7427_v32 }
 0x12f   :  { %v7509_v58 = vadd.f32 %v858_v54, %v741_v7  ;;  %6392 = vmatmul.mubr.f32.vlgmr.msra.gmra.mxu1 %v945_v2  ;;  %6405 = vmatprep.subr.mxu1 %v7085_v1 }
 0x130   :  { %v860_v59 = vpop.f32.mrf.mxu1  ;;  %6359 = vmatmul.mubr.f32.vlgmr.msra.gmra.mxu0 %v947_v5  ;;  %6406 = vmatpush3.msra.mxu1 %v7358_v11 }
 0x131   :  { %6373 = vmatpush3.msra.mxu0 %v7405_v17  ;;  %6407 = vmatprep.subr.mxu1 %v7085_v1 }
 0x132   :  { %6374 = vmatprep.subr.mxu0 %v7085_v1  ;;  %6408 = vmatpush3.msra.mxu1 %v7365_v19 }
 0x133   :  { %6375 = vmatpush3.msra.mxu0 %v7415_v27  ;;  %6409 = vmatprep.subr.mxu1 %v7085_v1 }
 0x134   :  { %6376 = vmatprep.subr.mxu0 %v7085_v1  ;;  %6410 = vmatpush3.msra.mxu1 %v7371_v22 }
 0x135   :  { %6377 = vmatpush3.msra.mxu0 %v7425_v31  ;;  %6411 = vmatprep.subr.mxu1 %v7085_v1 }
 0x136   :  { %6378 = vmatprep.subr.mxu0 %v7085_v1  ;;  %6380 = vmatprep.mubr.msk.f32.mxu0 %vm7086_vm1, %v7085_v1 }
 0x137   :  { %6379 = vmatpush3.msra.mxu0 %v7436_v40  ;;  %6412 = vmatpush3.msra.mxu1 %v7427_v32 }
 0x138   :  { %6413 = vmatprep.mubr.msk.f32.mxu1 %vm7086_vm1, %v7085_v1  ;;  %6381 = vmatmul.mubr.f32.vlgmr.msra.gmra.mxu0 %v944_v9 }
 0x139   :  { %6394 = vmatprep.subr.mxu0 %v7085_v1  ;;  %6414 = vmatmul.mubr.f32.vlgmr.msra.gmra.mxu1 %v7493_v23 }
 0x13a   :  { %6395 = vmatpush3.msra.mxu0 %v7408_v20  ;;  %6402 = vmatprep.mubr.msk.f32.mxu0 %vm7086_vm1, %v7085_v1 }
 0x13b   :  { %6396 = vmatprep.subr.mxu0 %v7085_v1  ;;  %6427 = vmatprep.subr.mxu1 %v7085_v1 }
 0x13c   :  { %6397 = vmatpush3.msra.mxu0 %v7422_v30  ;;  %6428 = vmatpush3.msra.mxu1 %v7412_v26 }
 0x13d   :  { %6398 = vmatprep.subr.mxu0 %v7085_v1  ;;  %6429 = vmatprep.subr.mxu1 %v7085_v1 }
 0x13e   :  { %6399 = vmatpush3.msra.mxu0 %v7433_v36  ;;  %6430 = vmatpush3.msra.mxu1 %v7440_v41 }
 0x13f   :  { %6400 = vmatprep.subr.mxu0 %v7085_v1  ;;  %6431 = vmatprep.subr.mxu1 %v7085_v1 }
 0x140   :  { %6401 = vmatpush3.msra.mxu0 %v7445_v44  ;;  %6432 = vmatpush3.msra.mxu1 %v7448_v45 }
 0x141   :  { %6403 = vmatmul.mubr.f32.vlgmr.msra.gmra.mxu0 %v7493_v23  ;;  %6433 = vmatprep.subr.mxu1 %v7085_v1  ;;  %v7574_v23 = vsel %vm867_vm5, 0.0, %v7087_v13 }
 0x142   :  { %6434 = vmatpush3.msra.mxu1 %v7454_v47  ;;  %6416 = vmatprep.subr.mxu0 %v7085_v1 }
 0x143   :  { %6435 = vmatprep.mubr.msk.f32.mxu1 %vm7086_vm1, %v7085_v1  ;;  %6449 = vmatprep.subr.mxu1 %v7085_v1 }
 0x144   :  { %6417 = vmatpush3.msra.mxu0 %v7358_v11  ;;  %6424 = vmatprep.mubr.msk.f32.mxu0 %vm7086_vm1, %v7085_v1 }
 0x145   :  { %6418 = vmatprep.subr.mxu0 %v7085_v1 }
 0x146   :  { %6419 = vmatpush3.msra.mxu0 %v7365_v19 }
 0x147   :  { %6420 = vmatprep.subr.mxu0 %v7085_v1 }
 0x148   :  { %6421 = vmatpush3.msra.mxu0 %v7371_v22 }
 0x149   :  { %6422 = vmatprep.subr.mxu0 %v7085_v1 }
 0x14a   :  { %6423 = vmatpush3.msra.mxu0 %v7427_v32 }
 0x14b   :  { %6438 = vmatprep.subr.mxu0 %v7085_v1 }
 0x1e7   :  { %v1040_v42 = vpop.f32.mrf.mxu1 }
 0x1e9   :  { %v6371_v18 = vpop.f32.mrf.mxu1 }
 0x1ef   :  { %v1197_v25 = vpop.f32.mrf.mxu1 }
 0x1f0   :  { %v949_v28 = vpop.f32.mrf.mxu0 }
 0x1f1   :  { %v6393_v3 = vpop.f32.mrf.mxu1  ;;  %v950_v46 = vadd.f32 %v949_v28, %v7479_v33 }
 0x1f2   :  { %v6360_v4 = vpop.f32.mrf.mxu0 }
 0x1f3   :  { %v1041_v14 = vadd.f32 %v1040_v42, %v950_v46 }
 0x1f8   :  { %v1120_v48 = vpop.f32.mrf.mxu0 }
 0x1f9   :  { %v1355_v51 = vpop.f32.mrf.mxu1  ;;  %v1121_v60 = vadd.f32 %v1120_v48, %v1041_v14 }
 0x1fa   :  { %v6382_v56 = vpop.f32.mrf.mxu0 }
 0x1fb   :  { %v6415_v57 = vpop.f32.mrf.mxu1  ;;  %v1198_v62 = vadd.f32 %v1197_v25, %v1121_v60 }
 0x201   :  { %v1280_v37 = vpop.f32.mrf.mxu0 }
 0x202   :  { %v1281_v8 = vadd.f32 %v1280_v37, %v1198_v62 }
 0x203   :  { %v6404_v33 = vpop.f32.mrf.mxu0 }
 0x204   :  { %v1356_v61 = vadd.f32 %v1355_v51, %v1281_v8 }
 0x206   :  { %v1359_v10 = vmul.f32 %v1356_v61, %v7571_v39 }
 0x208   :  { %7005 = vtanh.f32 %v1359_v10 }
 0x215   :  { %v7006_v15 = vpop.eup %7005 }
 0x216   :  { %v1361_v43 = vmul.f32 %v7006_v15, %v7571_v39 }
 0x218   :  { %v1362_v29 = vadd.f32 %v1361_v43, %v7574_v23 }
 0x21a   :  { %1365 = vrot.lane.b32.xlu0 %v1362_v29, %s7088_s14  ;;  %v1363_v55 = vmul.f32 %v7489_v34, %v1362_v29 }
 0x28c   :  { %v1366_v9 = vpop.permute.xlu0 %1365 }
 0x28d   :  { %v1368_v35 = vmul.f32 %v1366_v9, %v1362_v29 }
 0x28f   :  { %1370 = vrot.lane.b32.xlu0 %v1368_v35, %s7089_s15 }
 0x301   :  { %v1371_v50 = vpop.permute.xlu0 %1370 }
 0x302   :  { %v7581_v2 = vadd.f32 %v1371_v50, %v1363_v55 }
 0x304   :  { %7007 = vtanh.f32 %v7581_v2 }
 0x311   :  { %v7008_v21 = vpop.eup %7007 }
 0x312   :  { %1376 = vrot.lane.b32.xlu1 %v7008_v21, %s7088_s14 }
 0x384   :  { %v1377_v52 = vpop.permute.xlu1 %1376 }
 0x385   :  { %v1379_v38 = vmul.f32 %v1377_v52, %v1362_v29 }
 0x387   :  { %1381 = vrot.lane.b32.xlu1 %v1379_v38, %s7089_s15 }
 0x3f9   :  { %v1382_v7 = vpop.permute.xlu1 %1381 }
 0x3fa   :  { %1384 = vst.msk [vmem:[#allocation2] sm:$0xff] %vm870_vm2, %v1382_v7  ;;  %v1385_v54 = vsel %vm870_vm2, %v1382_v7, 0 }
 0x3fb   :  { %v1456_v5 = vand.u32 4294901760, %v1385_v54 }
 0x3fd   :  { %v1457_v6 = vsub.f32 %v1385_v54, %v1456_v5  ;;  %6436 = vmatmul.mubr.f32.vlgmr.msra.gmra.mxu1 %v1456_v5 }
 0x3fe   :  { %6450 = vmatpush3.msra.mxu1 %v7358_v11  ;;  %6457 = vmatprep.mubr.msk.f32.mxu1 %vm7086_vm1, %v7085_v1 }
 0x3ff   :  { %v1458_v34 = vand.u32 4294901760, %v1457_v6  ;;  %6451 = vmatprep.subr.mxu1 %v7085_v1 }
 0x400   :  { %6452 = vmatpush3.msra.mxu1 %v7365_v19 }
 0x401   :  { %v1459_v59 = vsub.f32 %v1457_v6, %v1458_v34  ;;  %6453 = vmatprep.subr.mxu1 %v7085_v1 }
 0x402   :  { %6454 = vmatpush3.msra.mxu1 %v7371_v22 }
 0x403   :  { %6455 = vmatprep.subr.mxu1 %v7085_v1  ;;  %v1460_v42 = vand.u32 4294901760, %v1459_v59 }
 0x404   :  { %6456 = vmatpush3.msra.mxu1 %v7427_v32 }
 0x405   :  { %6458 = vmatmul.mubr.f32.vlgmr.msra.gmra.mxu1 %v1458_v34  ;;  %6471 = vmatprep.subr.mxu1 %v7085_v1 }
 0x406   :  { %6425 = vmatmul.mubr.f32.vlgmr.msra.gmra.mxu0 %v1460_v42  ;;  %6472 = vmatpush3.msra.mxu1 %v7358_v11 }
 0x407   :  { %6439 = vmatpush3.msra.mxu0 %v7405_v17  ;;  %6473 = vmatprep.subr.mxu1 %v7085_v1 }
 0x408   :  { %6440 = vmatprep.subr.mxu0 %v7085_v1  ;;  %6474 = vmatpush3.msra.mxu1 %v7365_v19 }
 0x409   :  { %6441 = vmatpush3.msra.mxu0 %v7415_v27  ;;  %6475 = vmatprep.subr.mxu1 %v7085_v1 }
 0x40a   :  { %6442 = vmatprep.subr.mxu0 %v7085_v1  ;;  %6476 = vmatpush3.msra.mxu1 %v7371_v22 }
 0x40b   :  { %6443 = vmatpush3.msra.mxu0 %v7425_v31  ;;  %6477 = vmatprep.subr.mxu1 %v7085_v1 }
 0x40c   :  { %6444 = vmatprep.subr.mxu0 %v7085_v1  ;;  %6446 = vmatprep.mubr.msk.f32.mxu0 %vm7086_vm1, %v7085_v1 }
 0x40d   :  { %6445 = vmatpush3.msra.mxu0 %v7436_v40  ;;  %6478 = vmatpush3.msra.mxu1 %v7427_v32 }
 0x40e   :  { %6479 = vmatprep.mubr.msk.f32.mxu1 %vm7086_vm1, %v7085_v1  ;;  %6447 = vmatmul.mubr.f32.vlgmr.msra.gmra.mxu0 %v1457_v6 }
 0x40f   :  { %6460 = vmatprep.subr.mxu0 %v7085_v1  ;;  %6480 = vmatmul.mubr.f32.vlgmr.msra.gmra.mxu1 %v1456_v5 }
 0x410   :  { %6461 = vmatpush3.msra.mxu0 %v7408_v20  ;;  %6468 = vmatprep.mubr.msk.f32.mxu0 %vm7086_vm1, %v7085_v1 }
 0x411   :  { %6462 = vmatprep.subr.mxu0 %v7085_v1  ;;  %6493 = vmatprep.subr.mxu1 %v7085_v1 }
 0x412   :  { %6463 = vmatpush3.msra.mxu0 %v7422_v30  ;;  %6494 = vmatpush3.msra.mxu1 %v7412_v26 }
 0x413   :  { %6464 = vmatprep.subr.mxu0 %v7085_v1  ;;  %6495 = vmatprep.subr.mxu1 %v7085_v1 }
 0x414   :  { %6465 = vmatpush3.msra.mxu0 %v7433_v36  ;;  %6496 = vmatpush3.msra.mxu1 %v7440_v41 }
 0x415   :  { %6466 = vmatprep.subr.mxu0 %v7085_v1  ;;  %6497 = vmatprep.subr.mxu1 %v7085_v1 }
 0x416   :  { %6467 = vmatpush3.msra.mxu0 %v7445_v44  ;;  %6498 = vmatpush3.msra.mxu1 %v7448_v45 }
 0x417   :  { %6469 = vmatmul.mubr.f32.vlgmr.msra.gmra.mxu0 %v1456_v5  ;;  %6499 = vmatprep.subr.mxu1 %v7085_v1 }
 0x418   :  { %6500 = vmatpush3.msra.mxu1 %v7454_v47  ;;  %6482 = vmatprep.subr.mxu0 %v7085_v1 }
 0x419   :  { %6501 = vmatprep.mubr.msk.f32.mxu1 %vm7086_vm1, %v7085_v1  ;;  %6515 = vmatprep.subr.mxu1 %v7085_v1 }
 0x41a   :  { %6483 = vmatpush3.msra.mxu0 %v7358_v11  ;;  %6490 = vmatprep.mubr.msk.f32.mxu0 %vm7086_vm1, %v7085_v1 }
 0x41b   :  { %6484 = vmatprep.subr.mxu0 %v7085_v1 }
 0x41c   :  { %6485 = vmatpush3.msra.mxu0 %v7365_v19 }
 0x41d   :  { %6486 = vmatprep.subr.mxu0 %v7085_v1 }
 0x41e   :  { %6487 = vmatpush3.msra.mxu0 %v7371_v22 }
 0x41f   :  { %6488 = vmatprep.subr.mxu0 %v7085_v1 }
 0x420   :  { %6489 = vmatpush3.msra.mxu0 %v7427_v32 }
 0x421   :  { %6504 = vmatprep.subr.mxu0 %v7085_v1 }
 0x4bd   :  { %v1553_v18 = vpop.f32.mrf.mxu1 }
 0x4bf   :  { %v6437_v25 = vpop.f32.mrf.mxu1 }
 0x4c5   :  { %v1710_v28 = vpop.f32.mrf.mxu1 }
 0x4c6   :  { %v1462_v3 = vpop.f32.mrf.mxu0 }
 0x4c7   :  { %v6459_v4 = vpop.f32.mrf.mxu1  ;;  %v1463_v48 = vadd.f32 %v1462_v3, %v7481_v53 }
 0x4c8   :  { %v6426_v46 = vpop.f32.mrf.mxu0 }
 0x4c9   :  { %v1554_v56 = vadd.f32 %v1553_v18, %v1463_v48 }
 0x4ce   :  { %v1633_v51 = vpop.f32.mrf.mxu0 }
 0x4cf   :  { %v1868_v14 = vpop.f32.mrf.mxu1  ;;  %v1634_v62 = vadd.f32 %v1633_v51, %v1554_v56 }
 0x4d0   :  { %v6448_v57 = vpop.f32.mrf.mxu0 }
 0x4d1   :  { %v6481_v60 = vpop.f32.mrf.mxu1  ;;  %v1711_v37 = vadd.f32 %v1710_v28, %v1634_v62 }
 0x4d7   :  { %v1793_v8 = vpop.f32.mrf.mxu0 }
 0x4d8   :  { %v1794_v13 = vadd.f32 %v1793_v8, %v1711_v37 }
 0x4d9   :  { %v6470_v33 = vpop.f32.mrf.mxu0 }
 0x4da   :  { %v1869_v61 = vadd.f32 %v1868_v14, %v1794_v13 }
 0x4dc   :  { %v1872_v10 = vmul.f32 %v1869_v61, %v7571_v39 }
 0x4de   :  { %7009 = vtanh.f32 %v1872_v10 }
 0x4eb   :  { %v7010_v15 = vpop.eup %7009 }
 0x4ec   :  { %v1874_v43 = vmul.f32 %v7010_v15, %v7571_v39 }
 0x4ee   :  { %v1875_v29 = vadd.f32 %v1874_v43, %v7574_v23 }
 0x4f0   :  { %1878 = vrot.lane.b32.xlu0 %v1875_v29, %s7088_s14  ;;  %v1876_v35 = vmul.f32 %v1875_v29, %v7581_v2 }
 0x562   :  { %v1879_v53 = vpop.permute.xlu0 %1878 }
 0x563   :  { %v1881_v9 = vmul.f32 %v1879_v53, %v1875_v29 }
 0x565   :  { %1883 = vrot.lane.b32.xlu1 %v1881_v9, %s7089_s15 }
 0x5d7   :  { %v1884_v55 = vpop.permute.xlu1 %1883 }
 0x5d8   :  { %v7655_v50 = vadd.f32 %v1884_v55, %v1876_v35 }
 0x5da   :  { %7011 = vtanh.f32 %v7655_v50 }
 0x5e7   :  { %v7012_v21 = vpop.eup %7011 }
 0x5e8   :  { %1889 = vrot.lane.b32.xlu0 %v7012_v21, %s7088_s14 }
 0x65a   :  { %v1890_v52 = vpop.permute.xlu0 %1889 }
 0x65b   :  { %v1892_v38 = vmul.f32 %v1890_v52, %v1875_v29 }
 0x65d   :  { %1894 = vrot.lane.b32.xlu1 %v1892_v38, %s7089_s15 }
 0x6cf   :  { %v1895_v7 = vpop.permute.xlu1 %1894 }
 0x6d0   :  { %1897 = vst.msk [vmem:[#allocation2 + $0x8] sm:$0xff] %vm870_vm2, %v1895_v7  ;;  %v1898_v54 = vsel %vm870_vm2, %v1895_v7, 0 }
 0x6d1   :  { %v1969_v5 = vand.u32 4294901760, %v1898_v54 }
 0x6d3   :  { %v1970_v6 = vsub.f32 %v1898_v54, %v1969_v5  ;;  %6502 = vmatmul.mubr.f32.vlgmr.msra.gmra.mxu1 %v1969_v5 }
 0x6d4   :  { %6516 = vmatpush3.msra.mxu1 %v7358_v11  ;;  %6523 = vmatprep.mubr.msk.f32.mxu1 %vm7086_vm1, %v7085_v1 }
 0x6d5   :  { %v1971_v2 = vand.u32 4294901760, %v1970_v6  ;;  %6517 = vmatprep.subr.mxu1 %v7085_v1 }
 0x6d6   :  { %6518 = vmatpush3.msra.mxu1 %v7365_v19 }
 0x6d7   :  { %v1972_v34 = vsub.f32 %v1970_v6, %v1971_v2  ;;  %6519 = vmatprep.subr.mxu1 %v7085_v1 }
 0x6d8   :  { %6520 = vmatpush3.msra.mxu1 %v7371_v22 }
 0x6d9   :  { %6521 = vmatprep.subr.mxu1 %v7085_v1  ;;  %v1973_v59 = vand.u32 4294901760, %v1972_v34 }
 0x6da   :  { %6522 = vmatpush3.msra.mxu1 %v7427_v32 }
 0x6db   :  { %6524 = vmatmul.mubr.f32.vlgmr.msra.gmra.mxu1 %v1971_v2  ;;  %6537 = vmatprep.subr.mxu1 %v7085_v1 }
 0x6dc   :  { %6491 = vmatmul.mubr.f32.vlgmr.msra.gmra.mxu0 %v1973_v59  ;;  %6538 = vmatpush3.msra.mxu1 %v7358_v11 }
 0x6dd   :  { %6505 = vmatpush3.msra.mxu0 %v7405_v17  ;;  %6539 = vmatprep.subr.mxu1 %v7085_v1 }
 0x6de   :  { %6506 = vmatprep.subr.mxu0 %v7085_v1  ;;  %6540 = vmatpush3.msra.mxu1 %v7365_v19 }
 0x6df   :  { %6507 = vmatpush3.msra.mxu0 %v7415_v27  ;;  %6541 = vmatprep.subr.mxu1 %v7085_v1 }
 0x6e0   :  { %6508 = vmatprep.subr.mxu0 %v7085_v1  ;;  %6542 = vmatpush3.msra.mxu1 %v7371_v22 }
 0x6e1   :  { %6509 = vmatpush3.msra.mxu0 %v7425_v31  ;;  %6543 = vmatprep.subr.mxu1 %v7085_v1 }
 0x6e2   :  { %6510 = vmatprep.subr.mxu0 %v7085_v1  ;;  %6512 = vmatprep.mubr.msk.f32.mxu0 %vm7086_vm1, %v7085_v1 }
 0x6e3   :  { %6511 = vmatpush3.msra.mxu0 %v7436_v40  ;;  %6544 = vmatpush3.msra.mxu1 %v7427_v32 }
 0x6e4   :  { %6545 = vmatprep.mubr.msk.f32.mxu1 %vm7086_vm1, %v7085_v1  ;;  %6513 = vmatmul.mubr.f32.vlgmr.msra.gmra.mxu0 %v1970_v6 }
 0x6e5   :  { %6526 = vmatprep.subr.mxu0 %v7085_v1  ;;  %6546 = vmatmul.mubr.f32.vlgmr.msra.gmra.mxu1 %v1969_v5 }
 0x6e6   :  { %6527 = vmatpush3.msra.mxu0 %v7408_v20  ;;  %6534 = vmatprep.mubr.msk.f32.mxu0 %vm7086_vm1, %v7085_v1 }
 0x6e7   :  { %6528 = vmatprep.subr.mxu0 %v7085_v1  ;;  %6559 = vmatprep.subr.mxu1 %v7085_v1 }
 0x6e8   :  { %6529 = vmatpush3.msra.mxu0 %v7422_v30  ;;  %6560 = vmatpush3.msra.mxu1 %v7412_v26 }
 0x6e9   :  { %6530 = vmatprep.subr.mxu0 %v7085_v1  ;;  %6561 = vmatprep.subr.mxu1 %v7085_v1 }
 0x6ea   :  { %6531 = vmatpush3.msra.mxu0 %v7433_v36  ;;  %6562 = vmatpush3.msra.mxu1 %v7440_v41 }
 0x6eb   :  { %6532 = vmatprep.subr.mxu0 %v7085_v1  ;;  %6563 = vmatprep.subr.mxu1 %v7085_v1 }
 0x6ec   :  { %6533 = vmatpush3.msra.mxu0 %v7445_v44  ;;  %6564 = vmatpush3.msra.mxu1 %v7448_v45 }
 0x6ed   :  { %6535 = vmatmul.mubr.f32.vlgmr.msra.gmra.mxu0 %v1969_v5  ;;  %6565 = vmatprep.subr.mxu1 %v7085_v1 }
 0x6ee   :  { %6566 = vmatpush3.msra.mxu1 %v7454_v47  ;;  %6548 = vmatprep.subr.mxu0 %v7085_v1 }
 0x6ef   :  { %6567 = vmatprep.mubr.msk.f32.mxu1 %vm7086_vm1, %v7085_v1  ;;  %6581 = vmatprep.subr.mxu1 %v7085_v1 }
 0x6f0   :  { %6549 = vmatpush3.msra.mxu0 %v7358_v11  ;;  %6556 = vmatprep.mubr.msk.f32.mxu0 %vm7086_vm1, %v7085_v1 }
 0x6f1   :  { %6550 = vmatprep.subr.mxu0 %v7085_v1 }
 0x6f2   :  { %6551 = vmatpush3.msra.mxu0 %v7365_v19 }
 0x6f3   :  { %6552 = vmatprep.subr.mxu0 %v7085_v1 }
 0x6f4   :  { %6553 = vmatpush3.msra.mxu0 %v7371_v22 }
 0x6f5   :  { %6554 = vmatprep.subr.mxu0 %v7085_v1 }
 0x6f6   :  { %6555 = vmatpush3.msra.mxu0 %v7427_v32 }
 0x6f7   :  { %6570 = vmatprep.subr.mxu0 %v7085_v1 }
 0x793   :  { %v2066_v42 = vpop.f32.mrf.mxu1 }
 0x795   :  { %v6503_v18 = vpop.f32.mrf.mxu1 }
 0x79b   :  { %v2223_v25 = vpop.f32.mrf.mxu1 }
 0x79c   :  { %v1975_v28 = vpop.f32.mrf.mxu0 }
 0x79d   :  { %v6525_v3 = vpop.f32.mrf.mxu1  ;;  %v1976_v46 = vadd.f32 %v1975_v28, %v7483_v63 }
 0x79e   :  { %v6492_v4 = vpop.f32.mrf.mxu0 }
 0x79f   :  { %v2067_v14 = vadd.f32 %v2066_v42, %v1976_v46 }
 0x7a4   :  { %v2146_v48 = vpop.f32.mrf.mxu0 }
 0x7a5   :  { %v2381_v51 = vpop.f32.mrf.mxu1  ;;  %v2147_v60 = vadd.f32 %v2146_v48, %v2067_v14 }
 0x7a6   :  { %v6514_v56 = vpop.f32.mrf.mxu0 }
 0x7a7   :  { %v6547_v57 = vpop.f32.mrf.mxu1  ;;  %v2224_v62 = vadd.f32 %v2223_v25, %v2147_v60 }
 0x7ad   :  { %v2306_v37 = vpop.f32.mrf.mxu0 }
 0x7ae   :  { %v2307_v8 = vadd.f32 %v2306_v37, %v2224_v62 }
 0x7af   :  { %v6536_v13 = vpop.f32.mrf.mxu0 }
 0x7b0   :  { %v2382_v33 = vadd.f32 %v2381_v51, %v2307_v8 }
 0x7b2   :  { %v2385_v61 = vmul.f32 %v2382_v33, %v7571_v39 }
 0x7b4   :  { %7013 = vtanh.f32 %v2385_v61 }
 0x7c1   :  { %v7014_v10 = vpop.eup %7013 }
 0x7c2   :  { %v2387_v15 = vmul.f32 %v7014_v10, %v7571_v39 }
 0x7c4   :  { %v2388_v43 = vadd.f32 %v2387_v15, %v7574_v23 }
 0x7c6   :  { %2391 = vrot.lane.b32.xlu0 %v2388_v43, %s7088_s14  ;;  %v2389_v53 = vmul.f32 %v2388_v43, %v7655_v50 }
 0x838   :  { %v2392_v63 = vpop.permute.xlu0 %2391 }
 0x839   :  { %v2394_v29 = vmul.f32 %v2392_v63, %v2388_v43 }
 0x83b   :  { %2396 = vrot.lane.b32.xlu1 %v2394_v29, %s7089_s15 }
 0x8ad   :  { %v2397_v9 = vpop.permute.xlu1 %2396 }
 0x8ae   :  { %v7729_v35 = vadd.f32 %v2397_v9, %v2389_v53 }
 0x8b0   :  { %7015 = vtanh.f32 %v7729_v35 }
 0x8bd   :  { %v7016_v55 = vpop.eup %7015 }
 0x8be   :  { %2402 = vrot.lane.b32.xlu0 %v7016_v55, %s7088_s14 }
 0x930   :  { %v2403_v21 = vpop.permute.xlu0 %2402 }
 0x931   :  { %v2405_v52 = vmul.f32 %v2403_v21, %v2388_v43 }
 0x933   :  { %2407 = vrot.lane.b32.xlu1 %v2405_v52, %s7089_s15 }
 0x9a5   :  { %v2408_v38 = vpop.permute.xlu1 %2407 }
 0x9a6   :  { %2410 = vst.msk [vmem:[#allocation2 + $0x10] sm:$0xff] %vm870_vm2, %v2408_v38  ;;  %v2411_v7 = vsel %vm870_vm2, %v2408_v38, 0 }
 0x9a7   :  { %v2482_v54 = vand.u32 4294901760, %v2411_v7 }
 0x9a9   :  { %v2483_v5 = vsub.f32 %v2411_v7, %v2482_v54  ;;  %6568 = vmatmul.mubr.f32.vlgmr.msra.gmra.mxu1 %v2482_v54 }
 0x9aa   :  { %6582 = vmatpush3.msra.mxu1 %v7358_v11  ;;  %6589 = vmatprep.mubr.msk.f32.mxu1 %vm7086_vm1, %v7085_v1 }
 0x9ab   :  { %v2484_v50 = vand.u32 4294901760, %v2483_v5  ;;  %6583 = vmatprep.subr.mxu1 %v7085_v1 }
 0x9ac   :  { %6584 = vmatpush3.msra.mxu1 %v7365_v19 }
 0x9ad   :  { %v2485_v6 = vsub.f32 %v2483_v5, %v2484_v50  ;;  %6585 = vmatprep.subr.mxu1 %v7085_v1 }
 0x9ae   :  { %6586 = vmatpush3.msra.mxu1 %v7371_v22 }
 0x9af   :  { %6587 = vmatprep.subr.mxu1 %v7085_v1  ;;  %v2486_v2 = vand.u32 4294901760, %v2485_v6 }
 0x9b0   :  { %6588 = vmatpush3.msra.mxu1 %v7427_v32 }
 0x9b1   :  { %6590 = vmatmul.mubr.f32.vlgmr.msra.gmra.mxu1 %v2484_v50  ;;  %6603 = vmatprep.subr.mxu1 %v7085_v1 }
 0x9b2   :  { %6557 = vmatmul.mubr.f32.vlgmr.msra.gmra.mxu0 %v2486_v2  ;;  %6604 = vmatpush3.msra.mxu1 %v7358_v11 }
 0x9b3   :  { %6571 = vmatpush3.msra.mxu0 %v7405_v17  ;;  %6605 = vmatprep.subr.mxu1 %v7085_v1 }
 0x9b4   :  { %6572 = vmatprep.subr.mxu0 %v7085_v1  ;;  %6606 = vmatpush3.msra.mxu1 %v7365_v19 }
 0x9b5   :  { %6573 = vmatpush3.msra.mxu0 %v7415_v27  ;;  %6607 = vmatprep.subr.mxu1 %v7085_v1 }
 0x9b6   :  { %6574 = vmatprep.subr.mxu0 %v7085_v1  ;;  %6608 = vmatpush3.msra.mxu1 %v7371_v22 }
 0x9b7   :  { %6575 = vmatpush3.msra.mxu0 %v7425_v31  ;;  %6609 = vmatprep.subr.mxu1 %v7085_v1 }
 0x9b8   :  { %6576 = vmatprep.subr.mxu0 %v7085_v1  ;;  %6578 = vmatprep.mubr.msk.f32.mxu0 %vm7086_vm1, %v7085_v1 }
 0x9b9   :  { %6577 = vmatpush3.msra.mxu0 %v7436_v40  ;;  %6610 = vmatpush3.msra.mxu1 %v7427_v32 }
 0x9ba   :  { %6611 = vmatprep.mubr.msk.f32.mxu1 %vm7086_vm1, %v7085_v1  ;;  %6579 = vmatmul.mubr.f32.vlgmr.msra.gmra.mxu0 %v2483_v5 }
 0x9bb   :  { %6592 = vmatprep.subr.mxu0 %v7085_v1  ;;  %6612 = vmatmul.mubr.f32.vlgmr.msra.gmra.mxu1 %v2482_v54 }
 0x9bc   :  { %6593 = vmatpush3.msra.mxu0 %v7408_v20  ;;  %6600 = vmatprep.mubr.msk.f32.mxu0 %vm7086_vm1, %v7085_v1 }
 0x9bd   :  { %6594 = vmatprep.subr.mxu0 %v7085_v1  ;;  %6625 = vmatprep.subr.mxu1 %v7085_v1 }
 0x9be   :  { %6595 = vmatpush3.msra.mxu0 %v7422_v30  ;;  %6626 = vmatpush3.msra.mxu1 %v7412_v26 }
 0x9bf   :  { %6596 = vmatprep.subr.mxu0 %v7085_v1  ;;  %6627 = vmatprep.subr.mxu1 %v7085_v1 }
 0x9c0   :  { %6597 = vmatpush3.msra.mxu0 %v7433_v36  ;;  %6628 = vmatpush3.msra.mxu1 %v7440_v41 }
 0x9c1   :  { %6598 = vmatprep.subr.mxu0 %v7085_v1  ;;  %6629 = vmatprep.subr.mxu1 %v7085_v1 }
 0x9c2   :  { %6599 = vmatpush3.msra.mxu0 %v7445_v44  ;;  %6630 = vmatpush3.msra.mxu1 %v7448_v45 }
 0x9c3   :  { %6601 = vmatmul.mubr.f32.vlgmr.msra.gmra.mxu0 %v2482_v54  ;;  %6631 = vmatprep.subr.mxu1 %v7085_v1 }
 0x9c4   :  { %6632 = vmatpush3.msra.mxu1 %v7454_v47  ;;  %6614 = vmatprep.subr.mxu0 %v7085_v1 }
 0x9c5   :  { %6633 = vmatprep.mubr.msk.f32.mxu1 %vm7086_vm1, %v7085_v1  ;;  %6647 = vmatprep.subr.mxu1 %v7085_v1 }
 0x9c6   :  { %6615 = vmatpush3.msra.mxu0 %v7358_v11  ;;  %6622 = vmatprep.mubr.msk.f32.mxu0 %vm7086_vm1, %v7085_v1 }
 0x9c7   :  { %6616 = vmatprep.subr.mxu0 %v7085_v1 }
 0x9c8   :  { %6617 = vmatpush3.msra.mxu0 %v7365_v19 }
 0x9c9   :  { %6618 = vmatprep.subr.mxu0 %v7085_v1 }
 0x9ca   :  { %6619 = vmatpush3.msra.mxu0 %v7371_v22 }
 0x9cb   :  { %6620 = vmatprep.subr.mxu0 %v7085_v1 }
 0x9cc   :  { %6621 = vmatpush3.msra.mxu0 %v7427_v32 }
 0x9cd   :  { %6636 = vmatprep.subr.mxu0 %v7085_v1 }
 0xa69   :  { %v2579_v34 = vpop.f32.mrf.mxu1 }
 0xa6b   :  { %v6569_v59 = vpop.f32.mrf.mxu1 }
 0xa71   :  { %v2736_v42 = vpop.f32.mrf.mxu1 }
 0xa72   :  { %v2488_v18 = vpop.f32.mrf.mxu0 }
 0xa73   :  { %v6591_v25 = vpop.f32.mrf.mxu1  ;;  %v2489_v3 = vadd.f32 %v2488_v18, %v7485_v16 }
 0xa74   :  { %v6558_v28 = vpop.f32.mrf.mxu0 }
 0xa75   :  { %v2580_v48 = vadd.f32 %v2579_v34, %v2489_v3 }
 0xa7a   :  { %v2659_v4 = vpop.f32.mrf.mxu0 }
 0xa7b   :  { %v2894_v46 = vpop.f32.mrf.mxu1  ;;  %v2660_v56 = vadd.f32 %v2659_v4, %v2580_v48 }
 0xa7c   :  { %v6580_v51 = vpop.f32.mrf.mxu0 }
 0xa7d   :  { %v6613_v14 = vpop.f32.mrf.mxu1  ;;  %v2737_v57 = vadd.f32 %v2736_v42, %v2660_v56 }
 0xa83   :  { %v2819_v60 = vpop.f32.mrf.mxu0 }
 0xa84   :  { %v2820_v62 = vadd.f32 %v2819_v60, %v2737_v57 }
 0xa85   :  { %v6602_v37 = vpop.f32.mrf.mxu0 }
 0xa86   :  { %v2895_v8 = vadd.f32 %v2894_v46, %v2820_v62 }
 0xa88   :  { %v2898_v13 = vmul.f32 %v2895_v8, %v7571_v39 }
 0xa8a   :  { %7017 = vtanh.f32 %v2898_v13 }
 0xa97   :  { %v7018_v33 = vpop.eup %7017 }
 0xa98   :  { %v2900_v61 = vmul.f32 %v7018_v33, %v7571_v39 }
 0xa9a   :  { %v2901_v10 = vadd.f32 %v2900_v61, %v7574_v23 }
 0xa9c   :  { %2904 = vrot.lane.b32.xlu0 %v2901_v10, %s7088_s14  ;;  %v2902_v43 = vmul.f32 %v2901_v10, %v7729_v35 }
 0xb0e   :  { %v2905_v16 = vpop.permute.xlu0 %2904 }
 0xb0f   :  { %v2907_v15 = vmul.f32 %v2905_v16, %v2901_v10 }
 0xb11   :  { %2909 = vrot.lane.b32.xlu1 %v2907_v15, %s7089_s15 }
 0xb83   :  { %v2910_v63 = vpop.permute.xlu1 %2909 }
 0xb84   :  { %v7803_v29 = vadd.f32 %v2910_v63, %v2902_v43 }
 0xb86   :  { %7019 = vtanh.f32 %v7803_v29 }
 0xb93   :  { %v7020_v53 = vpop.eup %7019 }
 0xb94   :  { %2915 = vrot.lane.b32.xlu0 %v7020_v53, %s7088_s14 }
 0xc06   :  { %v2916_v9 = vpop.permute.xlu0 %2915 }
 0xc07   :  { %v2918_v55 = vmul.f32 %v2916_v9, %v2901_v10 }
 0xc09   :  { %2920 = vrot.lane.b32.xlu1 %v2918_v55, %s7089_s15 }
 0xc7b   :  { %v2921_v21 = vpop.permute.xlu1 %2920 }
 0xc7c   :  { %2923 = vst.msk [vmem:[#allocation2 + $0x18] sm:$0xff] %vm870_vm2, %v2921_v21  ;;  %v2924_v52 = vsel %vm870_vm2, %v2921_v21, 0 }
 0xc7d   :  { %v2995_v38 = vand.u32 4294901760, %v2924_v52 }
 0xc7f   :  { %v2996_v7 = vsub.f32 %v2924_v52, %v2995_v38  ;;  %6634 = vmatmul.mubr.f32.vlgmr.msra.gmra.mxu1 %v2995_v38 }
 0xc80   :  { %6648 = vmatpush3.msra.mxu1 %v7358_v11  ;;  %6655 = vmatprep.mubr.msk.f32.mxu1 %vm7086_vm1, %v7085_v1 }
 0xc81   :  { %v2997_v35 = vand.u32 4294901760, %v2996_v7  ;;  %6649 = vmatprep.subr.mxu1 %v7085_v1 }
 0xc82   :  { %6650 = vmatpush3.msra.mxu1 %v7365_v19 }
 0xc83   :  { %v2998_v54 = vsub.f32 %v2996_v7, %v2997_v35  ;;  %6651 = vmatprep.subr.mxu1 %v7085_v1 }
 0xc84   :  { %6652 = vmatpush3.msra.mxu1 %v7371_v22 }
 0xc85   :  { %6653 = vmatprep.subr.mxu1 %v7085_v1  ;;  %v2999_v5 = vand.u32 4294901760, %v2998_v54 }
 0xc86   :  { %6654 = vmatpush3.msra.mxu1 %v7427_v32 }
 0xc87   :  { %6656 = vmatmul.mubr.f32.vlgmr.msra.gmra.mxu1 %v2997_v35  ;;  %6669 = vmatprep.subr.mxu1 %v7085_v1 }
 0xc88   :  { %6623 = vmatmul.mubr.f32.vlgmr.msra.gmra.mxu0 %v2999_v5  ;;  %6670 = vmatpush3.msra.mxu1 %v7358_v11 }
 0xc89   :  { %6637 = vmatpush3.msra.mxu0 %v7405_v17  ;;  %6671 = vmatprep.subr.mxu1 %v7085_v1 }
 0xc8a   :  { %6638 = vmatprep.subr.mxu0 %v7085_v1  ;;  %6672 = vmatpush3.msra.mxu1 %v7365_v19 }
 0xc8b   :  { %6639 = vmatpush3.msra.mxu0 %v7415_v27  ;;  %6673 = vmatprep.subr.mxu1 %v7085_v1 }
 0xc8c   :  { %6640 = vmatprep.subr.mxu0 %v7085_v1  ;;  %6674 = vmatpush3.msra.mxu1 %v7371_v22 }
 0xc8d   :  { %6641 = vmatpush3.msra.mxu0 %v7425_v31  ;;  %6675 = vmatprep.subr.mxu1 %v7085_v1 }
 0xc8e   :  { %6642 = vmatprep.subr.mxu0 %v7085_v1  ;;  %6644 = vmatprep.mubr.msk.f32.mxu0 %vm7086_vm1, %v7085_v1 }
 0xc8f   :  { %6643 = vmatpush3.msra.mxu0 %v7436_v40  ;;  %6676 = vmatpush3.msra.mxu1 %v7427_v32 }
 0xc90   :  { %6677 = vmatprep.mubr.msk.f32.mxu1 %vm7086_vm1, %v7085_v1  ;;  %6645 = vmatmul.mubr.f32.vlgmr.msra.gmra.mxu0 %v2996_v7 }
 0xc91   :  { %6658 = vmatprep.subr.mxu0 %v7085_v1  ;;  %6678 = vmatmul.mubr.f32.vlgmr.msra.gmra.mxu1 %v2995_v38 }
 0xc92   :  { %6659 = vmatpush3.msra.mxu0 %v7408_v20  ;;  %6666 = vmatprep.mubr.msk.f32.mxu0 %vm7086_vm1, %v7085_v1 }
 0xc93   :  { %6660 = vmatprep.subr.mxu0 %v7085_v1  ;;  %6691 = vmatprep.subr.mxu1 %v7085_v1 }
 0xc94   :  { %6661 = vmatpush3.msra.mxu0 %v7422_v30  ;;  %6692 = vmatpush3.msra.mxu1 %v7412_v26 }
 0xc95   :  { %6662 = vmatprep.subr.mxu0 %v7085_v1  ;;  %6693 = vmatprep.subr.mxu1 %v7085_v1 }
 0xc96   :  { %6663 = vmatpush3.msra.mxu0 %v7433_v36  ;;  %6694 = vmatpush3.msra.mxu1 %v7440_v41 }
 0xc97   :  { %6664 = vmatprep.subr.mxu0 %v7085_v1  ;;  %6695 = vmatprep.subr.mxu1 %v7085_v1 }
 0xc98   :  { %6665 = vmatpush3.msra.mxu0 %v7445_v44  ;;  %6696 = vmatpush3.msra.mxu1 %v7448_v45 }
 0xc99   :  { %6667 = vmatmul.mubr.f32.vlgmr.msra.gmra.mxu0 %v2995_v38  ;;  %6697 = vmatprep.subr.mxu1 %v7085_v1 }
 0xc9a   :  { %6698 = vmatpush3.msra.mxu1 %v7454_v47  ;;  %6680 = vmatprep.subr.mxu0 %v7085_v1 }
 0xc9b   :  { %6699 = vmatprep.mubr.msk.f32.mxu1 %vm7086_vm1, %v7085_v1  ;;  %6713 = vmatprep.subr.mxu1 %v7085_v1 }
 0xc9c   :  { %6681 = vmatpush3.msra.mxu0 %v7358_v11  ;;  %6688 = vmatprep.mubr.msk.f32.mxu0 %vm7086_vm1, %v7085_v1 }
 0xc9d   :  { %6682 = vmatprep.subr.mxu0 %v7085_v1 }
 0xc9e   :  { %6683 = vmatpush3.msra.mxu0 %v7365_v19 }
 0xc9f   :  { %6684 = vmatprep.subr.mxu0 %v7085_v1 }
 0xca0   :  { %6685 = vmatpush3.msra.mxu0 %v7371_v22 }
 0xca1   :  { %6686 = vmatprep.subr.mxu0 %v7085_v1 }
 0xca2   :  { %6687 = vmatpush3.msra.mxu0 %v7427_v32 }
 0xca3   :  { %6702 = vmatprep.subr.mxu0 %v7085_v1 }
 0xd3f   :  { %v3092_v50 = vpop.f32.mrf.mxu1 }
 0xd41   :  { %v6635_v6 = vpop.f32.mrf.mxu1 }
 0xd47   :  { %v3249_v2 = vpop.f32.mrf.mxu1 }
 0xd48   :  { %v3001_v34 = vpop.f32.mrf.mxu0 }
 0xd49   :  { %v6657_v59 = vpop.f32.mrf.mxu1  ;;  %v3002_v18 = vadd.f32 %v3001_v34, %v7487_v0 }
 0xd4a   :  { %v6624_v42 = vpop.f32.mrf.mxu0 }
 0xd4b   :  { %v3093_v3 = vadd.f32 %v3092_v50, %v3002_v18 }
 0xd50   :  { %v3172_v25 = vpop.f32.mrf.mxu0 }
 0xd51   :  { %v3407_v28 = vpop.f32.mrf.mxu1  ;;  %v3173_v48 = vadd.f32 %v3172_v25, %v3093_v3 }
 0xd52   :  { %v6646_v4 = vpop.f32.mrf.mxu0 }
 0xd53   :  { %v6679_v46 = vpop.f32.mrf.mxu1  ;;  %v3250_v51 = vadd.f32 %v3249_v2, %v3173_v48 }
 0xd59   :  { %v3332_v14 = vpop.f32.mrf.mxu0 }
 0xd5a   :  { %v3333_v56 = vadd.f32 %v3332_v14, %v3250_v51 }
 0xd5b   :  { %v6668_v57 = vpop.f32.mrf.mxu0 }
 0xd5c   :  { %v3408_v60 = vadd.f32 %v3407_v28, %v3333_v56 }
 0xd5e   :  { %v3411_v62 = vmul.f32 %v3408_v60, %v7571_v39 }
 0xd60   :  { %7021 = vtanh.f32 %v3411_v62 }
 0xd6d   :  { %v7022_v37 = vpop.eup %7021 }
 0xd6e   :  { %v3413_v8 = vmul.f32 %v7022_v37, %v7571_v39 }
 0xd70   :  { %v3414_v13 = vadd.f32 %v3413_v8, %v7574_v23 }
 0xd72   :  { %3417 = vrot.lane.b32.xlu0 %v3414_v13, %s7088_s14  ;;  %v3415_v61 = vmul.f32 %v3414_v13, %v7803_v29 }
 0xde4   :  { %v3418_v0 = vpop.permute.xlu0 %3417 }
 0xde5   :  { %v3420_v33 = vmul.f32 %v3418_v0, %v3414_v13 }
 0xde7   :  { %3422 = vrot.lane.b32.xlu1 %v3420_v33, %s7089_s15 }
 0xe59   :  { %v3423_v10 = vpop.permute.xlu1 %3422 }
 0xe5a   :  { %v7877_v16 = vadd.f32 %v3423_v10, %v3415_v61 }
 0xe5c   :  { %7023 = vtanh.f32 %v7877_v16 }
 0xe69   :  { %v7024_v15 = vpop.eup %7023 }
 0xe6a   :  { %3428 = vrot.lane.b32.xlu0 %v7024_v15, %s7088_s14 }
 0xedc   :  { %v3429_v43 = vpop.permute.xlu0 %3428 }
 0xedd   :  { %v3431_v63 = vmul.f32 %v3429_v43, %v3414_v13 }
 0xedf   :  { %3433 = vrot.lane.b32.xlu1 %v3431_v63, %s7089_s15 }
 0xf51   :  { %v3434_v53 = vpop.permute.xlu1 %3433 }
 0xf52   :  { %3436 = vst.msk [vmem:[#allocation2 + $0x20] sm:$0xff] %vm870_vm2, %v3434_v53  ;;  %v3437_v9 = vsel %vm870_vm2, %v3434_v53, 0 }
 0xf53   :  { %v3508_v55 = vand.u32 4294901760, %v3437_v9 }
 0xf55   :  { %v3509_v21 = vsub.f32 %v3437_v9, %v3508_v55  ;;  %6700 = vmatmul.mubr.f32.vlgmr.msra.gmra.mxu1 %v3508_v55 }
 0xf56   :  { %6714 = vmatpush3.msra.mxu1 %v7358_v11  ;;  %6721 = vmatprep.mubr.msk.f32.mxu1 %vm7086_vm1, %v7085_v1 }
 0xf57   :  { %v3510_v29 = vand.u32 4294901760, %v3509_v21  ;;  %6715 = vmatprep.subr.mxu1 %v7085_v1 }
 0xf58   :  { %6716 = vmatpush3.msra.mxu1 %v7365_v19 }
 0xf59   :  { %v3511_v52 = vsub.f32 %v3509_v21, %v3510_v29  ;;  %6717 = vmatprep.subr.mxu1 %v7085_v1 }
 0xf5a   :  { %6718 = vmatpush3.msra.mxu1 %v7371_v22 }
 0xf5b   :  { %6719 = vmatprep.subr.mxu1 %v7085_v1  ;;  %v3512_v38 = vand.u32 4294901760, %v3511_v52 }
 0xf5c   :  { %6720 = vmatpush3.msra.mxu1 %v7427_v32 }
 0xf5d   :  { %6722 = vmatmul.mubr.f32.vlgmr.msra.gmra.mxu1 %v3510_v29  ;;  %6735 = vmatprep.subr.mxu1 %v7085_v1 }
 0xf5e   :  { %6689 = vmatmul.mubr.f32.vlgmr.msra.gmra.mxu0 %v3512_v38  ;;  %6736 = vmatpush3.msra.mxu1 %v7358_v11 }
 0xf5f   :  { %6703 = vmatpush3.msra.mxu0 %v7405_v17  ;;  %6737 = vmatprep.subr.mxu1 %v7085_v1 }
 0xf60   :  { %6704 = vmatprep.subr.mxu0 %v7085_v1  ;;  %6738 = vmatpush3.msra.mxu1 %v7365_v19 }
 0xf61   :  { %6705 = vmatpush3.msra.mxu0 %v7415_v27  ;;  %6739 = vmatprep.subr.mxu1 %v7085_v1 }
 0xf62   :  { %6706 = vmatprep.subr.mxu0 %v7085_v1  ;;  %6740 = vmatpush3.msra.mxu1 %v7371_v22 }
 0xf63   :  { %6707 = vmatpush3.msra.mxu0 %v7425_v31  ;;  %6741 = vmatprep.subr.mxu1 %v7085_v1 }
 0xf64   :  { %6708 = vmatprep.subr.mxu0 %v7085_v1  ;;  %6710 = vmatprep.mubr.msk.f32.mxu0 %vm7086_vm1, %v7085_v1 }
 0xf65   :  { %6709 = vmatpush3.msra.mxu0 %v7436_v40  ;;  %6742 = vmatpush3.msra.mxu1 %v7427_v32 }
 0xf66   :  { %6743 = vmatprep.mubr.msk.f32.mxu1 %vm7086_vm1, %v7085_v1  ;;  %6711 = vmatmul.mubr.f32.vlgmr.msra.gmra.mxu0 %v3509_v21 }
 0xf67   :  { %6724 = vmatprep.subr.mxu0 %v7085_v1  ;;  %6744 = vmatmul.mubr.f32.vlgmr.msra.gmra.mxu1 %v3508_v55 }
 0xf68   :  { %6725 = vmatpush3.msra.mxu0 %v7408_v20  ;;  %6732 = vmatprep.mubr.msk.f32.mxu0 %vm7086_vm1, %v7085_v1 }
 0xf69   :  { %6726 = vmatprep.subr.mxu0 %v7085_v1  ;;  %6757 = vmatprep.subr.mxu1 %v7085_v1 }
 0xf6a   :  { %6727 = vmatpush3.msra.mxu0 %v7422_v30  ;;  %6758 = vmatpush3.msra.mxu1 %v7412_v26 }
 0xf6b   :  { %6728 = vmatprep.subr.mxu0 %v7085_v1  ;;  %6759 = vmatprep.subr.mxu1 %v7085_v1 }
 0xf6c   :  { %6729 = vmatpush3.msra.mxu0 %v7433_v36  ;;  %6760 = vmatpush3.msra.mxu1 %v7440_v41 }
 0xf6d   :  { %6730 = vmatprep.subr.mxu0 %v7085_v1  ;;  %6761 = vmatprep.subr.mxu1 %v7085_v1 }
 0xf6e   :  { %6731 = vmatpush3.msra.mxu0 %v7445_v44  ;;  %6762 = vmatpush3.msra.mxu1 %v7448_v45 }
 0xf6f   :  { %6733 = vmatmul.mubr.f32.vlgmr.msra.gmra.mxu0 %v3508_v55  ;;  %6763 = vmatprep.subr.mxu1 %v7085_v1 }
 0xf70   :  { %6764 = vmatpush3.msra.mxu1 %v7454_v47  ;;  %6746 = vmatprep.subr.mxu0 %v7085_v1 }
 0xf71   :  { %6765 = vmatprep.mubr.msk.f32.mxu1 %vm7086_vm1, %v7085_v1  ;;  %6779 = vmatprep.subr.mxu1 %v7085_v1 }
 0xf72   :  { %6747 = vmatpush3.msra.mxu0 %v7358_v11  ;;  %6754 = vmatprep.mubr.msk.f32.mxu0 %vm7086_vm1, %v7085_v1 }
 0xf73   :  { %6748 = vmatprep.subr.mxu0 %v7085_v1 }
 0xf74   :  { %6749 = vmatpush3.msra.mxu0 %v7365_v19 }
 0xf75   :  { %6750 = vmatprep.subr.mxu0 %v7085_v1 }
 0xf76   :  { %6751 = vmatpush3.msra.mxu0 %v7371_v22 }
 0xf77   :  { %6752 = vmatprep.subr.mxu0 %v7085_v1 }
 0xf78   :  { %6753 = vmatpush3.msra.mxu0 %v7427_v32 }
 0xf79   :  { %6768 = vmatprep.subr.mxu0 %v7085_v1 }
0x1015   :  { %v3605_v7 = vpop.f32.mrf.mxu1 }
0x1017   :  { %v6701_v35 = vpop.f32.mrf.mxu1 }
0x101d   :  { %v3762_v54 = vpop.f32.mrf.mxu1 }
0x101e   :  { %v3514_v5 = vpop.f32.mrf.mxu0 }
0x101f   :  { %v6723_v50 = vpop.f32.mrf.mxu1  ;;  %v3515_v2 = vadd.f32 %v3514_v5, %v7495_v24 }
0x1020   :  { %v6690_v6 = vpop.f32.mrf.mxu0 }
0x1021   :  { %v3606_v42 = vadd.f32 %v3605_v7, %v3515_v2 }
0x1026   :  { %v3685_v34 = vpop.f32.mrf.mxu0 }
0x1027   :  { %v3920_v59 = vpop.f32.mrf.mxu1  ;;  %v3686_v28 = vadd.f32 %v3685_v34, %v3606_v42 }
0x1028   :  { %v6712_v18 = vpop.f32.mrf.mxu0 }
0x1029   :  { %v6745_v25 = vpop.f32.mrf.mxu1  ;;  %v3763_v3 = vadd.f32 %v3762_v54, %v3686_v28 }
0x102f   :  { %v3845_v4 = vpop.f32.mrf.mxu0 }
0x1030   :  { %v3846_v46 = vadd.f32 %v3845_v4, %v3763_v3 }
0x1031   :  { %v6734_v48 = vpop.f32.mrf.mxu0 }
0x1032   :  { %v3921_v51 = vadd.f32 %v3920_v59, %v3846_v46 }
0x1034   :  { %v3924_v14 = vmul.f32 %v3921_v51, %v7571_v39 }
0x1036   :  { %7025 = vtanh.f32 %v3924_v14 }
0x1043   :  { %v7026_v56 = vpop.eup %7025 }
0x1044   :  { %v3926_v57 = vmul.f32 %v7026_v56, %v7571_v39 }
0x1046   :  { %v3927_v60 = vadd.f32 %v3926_v57, %v7574_v23 }
0x1048   :  { %3930 = vrot.lane.b32.xlu0 %v3927_v60, %s7088_s14  ;;  %v3928_v37 = vmul.f32 %v3927_v60, %v7877_v16 }
0x10ba   :  { %v3931_v24 = vpop.permute.xlu0 %3930 }
0x10bb   :  { %v3933_v62 = vmul.f32 %v3931_v24, %v3927_v60 }
0x10bd   :  { %3935 = vrot.lane.b32.xlu1 %v3933_v62, %s7089_s15 }
0x112f   :  { %v3936_v8 = vpop.permute.xlu1 %3935 }
0x1130   :  { %v7951_v13 = vadd.f32 %v3936_v8, %v3928_v37  ;;  %v21_v37 = vld [vmem:[%s8703_s1 + $0x80] sm:$0xff] }
0x1132   :  { %7027 = vtanh.f32 %v7951_v13 }
0x113f   :  { %v7028_v0 = vpop.eup %7027 }
0x1140   :  { %3941 = vrot.lane.b32.xlu0 %v7028_v0, %s7088_s14  ;;  %v20_v0 = vld [vmem:[%s8703_s1 + $0x70] sm:$0xff] }
0x11b2   :  { %v3942_v33 = vpop.permute.xlu0 %3941 }
0x11b3   :  { %v3944_v61 = vmul.f32 %v3942_v33, %v3927_v60  ;;  %v22_v60 = vld [vmem:[%s8703_s1 + $0x90] sm:$0xff]  ;;  %v8050_v33 = vand.u32 4294901760, %v21_v37 }
0x11b4   :  { %v8040_v8 = vand.u32 4294901760, %v22_v60 }
0x11b5   :  { %3946 = vrot.lane.b32.xlu1 %v3944_v61, %s7089_s15 }
0x1227   :  { %v3947_v10 = vpop.permute.xlu1 %3946 }
0x1228   :  { %3949 = vst.msk [vmem:[#allocation2 + $0x28] sm:$0xff] %vm870_vm2, %v3947_v10  ;;  %v3950_v15 = vsel %vm870_vm2, %v3947_v10, 0  ;;  %v19_v10 = vld [vmem:[%s8703_s1 + $0x60] sm:$0xff] }
0x1229   :  { %v4021_v43 = vand.u32 4294901760, %v3950_v15 }
0x122b   :  { %v4022_v63 = vsub.f32 %v3950_v15, %v4021_v43  ;;  %6766 = vmatmul.mubr.f32.vlgmr.msra.gmra.mxu1 %v4021_v43  ;;  %v8058_v15 = vsub.f32 %v22_v60, %v8040_v8 }
0x122c   :  { %6780 = vmatpush3.msra.mxu1 %v7358_v11  ;;  %6787 = vmatprep.mubr.msk.f32.mxu1 %vm7086_vm1, %v7085_v1 }
0x122d   :  { %v4023_v16 = vand.u32 4294901760, %v4022_v63  ;;  %6781 = vmatprep.subr.mxu1 %v7085_v1 }
0x122e   :  { %6782 = vmatpush3.msra.mxu1 %v7365_v19 }
0x122f   :  { %v4024_v53 = vsub.f32 %v4022_v63, %v4023_v16  ;;  %6783 = vmatprep.subr.mxu1 %v7085_v1 }
0x1230   :  { %6784 = vmatpush3.msra.mxu1 %v7371_v22 }
0x1231   :  { %6785 = vmatprep.subr.mxu1 %v7085_v1  ;;  %v4025_v9 = vand.u32 4294901760, %v4024_v53  ;;  %v8065_v53 = vsub.f32 %v21_v37, %v8050_v33 }
0x1232   :  { %6786 = vmatpush3.msra.mxu1 %v7427_v32 }
0x1233   :  { %6788 = vmatmul.mubr.f32.vlgmr.msra.gmra.mxu1 %v4023_v16  ;;  %6801 = vmatprep.subr.mxu1 %v7085_v1  ;;  %v4976_v16 = vld [vmem:[#allocation2] sm:$0xff] }
0x1234   :  { %6755 = vmatmul.mubr.f32.vlgmr.msra.gmra.mxu0 %v4025_v9  ;;  %6802 = vmatpush3.msra.mxu1 %v7358_v11  ;;  %v8067_v9 = vand.u32 4294901760, %v19_v10 }
0x1235   :  { %6769 = vmatpush3.msra.mxu0 %v7405_v17  ;;  %6803 = vmatprep.subr.mxu1 %v7085_v1 }
0x1236   :  { %6770 = vmatprep.subr.mxu0 %v7085_v1  ;;  %6804 = vmatpush3.msra.mxu1 %v7365_v19 }
0x1237   :  { %6771 = vmatpush3.msra.mxu0 %v7415_v27  ;;  %6805 = vmatprep.subr.mxu1 %v7085_v1 }
0x1238   :  { %6772 = vmatprep.subr.mxu0 %v7085_v1  ;;  %6806 = vmatpush3.msra.mxu1 %v7371_v22 }
0x1239   :  { %6773 = vmatpush3.msra.mxu0 %v7425_v31  ;;  %6807 = vmatprep.subr.mxu1 %v7085_v1 }
0x123a   :  { %6774 = vmatprep.subr.mxu0 %v7085_v1  ;;  %6776 = vmatprep.mubr.msk.f32.mxu0 %vm7086_vm1, %v7085_v1 }
0x123b   :  { %6775 = vmatpush3.msra.mxu0 %v7436_v40  ;;  %6808 = vmatpush3.msra.mxu1 %v7427_v32 }
0x123c   :  { %6809 = vmatprep.mubr.msk.f32.mxu1 %vm7086_vm1, %v7085_v1  ;;  %6777 = vmatmul.mubr.f32.vlgmr.msra.gmra.mxu0 %v4022_v63 }
0x123d   :  { %6790 = vmatprep.subr.mxu0 %v7085_v1  ;;  %6810 = vmatmul.mubr.f32.vlgmr.msra.gmra.mxu1 %v4021_v43 }
0x123e   :  { %6791 = vmatpush3.msra.mxu0 %v7408_v20  ;;  %6798 = vmatprep.mubr.msk.f32.mxu0 %vm7086_vm1, %v7085_v1 }
0x123f   :  { %6792 = vmatprep.subr.mxu0 %v7085_v1  ;;  %6823 = vmatprep.subr.mxu1 %v7085_v1 }
0x1240   :  { %6793 = vmatpush3.msra.mxu0 %v7422_v30  ;;  %6824 = vmatpush3.msra.mxu1 %v7412_v26 }
0x1241   :  { %6794 = vmatprep.subr.mxu0 %v7085_v1  ;;  %6825 = vmatprep.subr.mxu1 %v7085_v1 }
0x1242   :  { %6795 = vmatpush3.msra.mxu0 %v7433_v36  ;;  %6826 = vmatpush3.msra.mxu1 %v7440_v41 }
0x1243   :  { %6796 = vmatprep.subr.mxu0 %v7085_v1  ;;  %6827 = vmatprep.subr.mxu1 %v7085_v1 }
0x1244   :  { %6797 = vmatpush3.msra.mxu0 %v7445_v44  ;;  %6828 = vmatpush3.msra.mxu1 %v7448_v45 }
0x1245   :  { %6799 = vmatmul.mubr.f32.vlgmr.msra.gmra.mxu0 %v4021_v43  ;;  %6829 = vmatprep.subr.mxu1 %v7085_v1  ;;  %v8060_v43 = vand.u32 4294901760, %v20_v0 }
0x1246   :  { %6830 = vmatpush3.msra.mxu1 %v7454_v47  ;;  %6812 = vmatprep.subr.mxu0 %v7085_v1 }
0x1247   :  { %6831 = vmatprep.mubr.msk.f32.mxu1 %vm7086_vm1, %v7085_v1  ;;  %6845 = vmatprep.subr.mxu1 %v7085_v1 }
0x1248   :  { %6813 = vmatpush3.msra.mxu0 %v7358_v11  ;;  %6820 = vmatprep.mubr.msk.f32.mxu0 %vm7086_vm1, %v7085_v1 }
0x1249   :  { %6814 = vmatprep.subr.mxu0 %v7085_v1 }
0x124a   :  { %6815 = vmatpush3.msra.mxu0 %v7365_v19 }
0x124b   :  { %6816 = vmatprep.subr.mxu0 %v7085_v1 }
0x124c   :  { %6817 = vmatpush3.msra.mxu0 %v7371_v22 }
0x124d   :  { %6818 = vmatprep.subr.mxu0 %v7085_v1 }
0x124e   :  { %6819 = vmatpush3.msra.mxu0 %v7427_v32 }
0x124f   :  { %6834 = vmatprep.subr.mxu0 %v7085_v1 }
0x12eb   :  { %v4118_v26 = vpop.f32.mrf.mxu1 }
0x12ed   :  { %v6767_v41 = vpop.f32.mrf.mxu1 }
0x12ee   :  { %v8072_v41 = vand.u32 4294901760, %v8058_v15 }
0x12f3   :  { %v4275_v45 = vpop.f32.mrf.mxu1 }
0x12f4   :  { %v4027_v47 = vpop.f32.mrf.mxu0 }
0x12f5   :  { %v6789_v55 = vpop.f32.mrf.mxu1  ;;  %v4028_v29 = vadd.f32 %v4027_v47, %v7503_v12  ;;  %v4985_v47 = vsel %vm870_vm2, %v4976_v16, 0 }
0x12f6   :  { %v6756_v21 = vpop.f32.mrf.mxu0  ;;  %v8081_v55 = vand.u32 4294901760, %v8065_v53 }
0x12f7   :  { %v4119_v7 = vadd.f32 %v4118_v26, %v4028_v29  ;;  %v8084_v21 = vsub.f32 %v19_v10, %v8067_v9  ;;  %v5185_v29 = vsub.f32 %v8058_v15, %v8072_v41 }
0x12fc   :  { %v4198_v52 = vpop.f32.mrf.mxu0 }
0x12fd   :  { %v4433_v38 = vpop.f32.mrf.mxu1  ;;  %v4199_v5 = vadd.f32 %v4198_v52, %v4119_v7  ;;  %v8092_v52 = vand.u32 4294901760, %v4985_v47  ;;  %v4978_v7 = vld [vmem:[#allocation2 + $0x10] sm:$0xff] }
0x12fe   :  { %v6778_v35 = vpop.f32.mrf.mxu0 }
0x12ff   :  { %v6811_v54 = vpop.f32.mrf.mxu1  ;;  %v4276_v50 = vadd.f32 %v4275_v45, %v4199_v5  ;;  %v8075_v45 = vsub.f32 %v20_v0, %v8060_v43  ;;  %v4979_v5 = vld [vmem:[#allocation2 + $0x18] sm:$0xff] }
0x1300   :  { %v8115_v54 = vsub.f32 %v4985_v47, %v8092_v52 }
0x1305   :  { %v4358_v6 = vpop.f32.mrf.mxu0 }
0x1306   :  { %v4359_v2 = vadd.f32 %v4358_v6, %v4276_v50 }
0x1307   :  { %v6800_v34 = vpop.f32.mrf.mxu0 }
0x1308   :  { %v4434_v59 = vadd.f32 %v4433_v38, %v4359_v2  ;;  %v4977_v38 = vld [vmem:[#allocation2 + $0x8] sm:$0xff]  ;;  %v4980_v2 = vld [vmem:[#allocation2 + $0x20] sm:$0xff] }
0x1309   :  { %v4988_v35 = vsel %vm870_vm2, %v4977_v38, 0 }
0x130a   :  { %v4437_v42 = vmul.f32 %v4434_v59, %v7571_v39  ;;  %v8126_v34 = vand.u32 4294901760, %v4988_v35 }
0x130c   :  { %7029 = vtanh.f32 %v4437_v42  ;;  %v4994_v42 = vsel %vm870_vm2, %v4979_v5, 0 }
0x1319   :  { %v7030_v18 = vpop.eup %7029 }
0x131a   :  { %v4439_v25 = vmul.f32 %v7030_v18, %v7571_v39  ;;  %v4997_v18 = vsel %vm870_vm2, %v4980_v2, 0 }
0x131c   :  { %v4440_v28 = vadd.f32 %v4439_v25, %v7574_v23  ;;  %v4981_v25 = vld [vmem:[#allocation2 + $0x28] sm:$0xff] }
0x131e   :  { %4443 = vrot.lane.b32.xlu0 %v4440_v28, %s7088_s14  ;;  %v4441_v4 = vmul.f32 %v4440_v28, %v7951_v13 }
0x1390   :  { %v4444_v12 = vpop.permute.xlu0 %4443 }
0x1391   :  { %v4446_v3 = vmul.f32 %v4444_v12, %v4440_v28 }
0x1393   :  { %4448 = vrot.lane.b32.xlu1 %v4446_v3, %s7089_s15  ;;  %v8140_v3 = vand.u32 4294901760, %v4994_v42 }
0x1395   :  { %v8162_v60 = vsub.f32 %v4994_v42, %v8140_v3 }
0x1405   :  { %v4449_v46 = vpop.permute.xlu1 %4448 }
0x1406   :  { %v8025_v48 = vadd.f32 %v4449_v46, %v4441_v4  ;;  %v8146_v46 = vand.u32 4294901760, %v4997_v18 }
0x1408   :  { %7031 = vtanh.f32 %v8025_v48 }
0x1415   :  { %v7032_v51 = vpop.eup %7031 }
0x1416   :  { %4454 = vrot.lane.b32.xlu0 %v7032_v51, %s7088_s14  ;;  %v5000_v51 = vsel %vm870_vm2, %v4981_v25, 0 }
0x1488   :  { %v4455_v14 = vpop.permute.xlu0 %4454 }
0x1489   :  { %v4457_v56 = vmul.f32 %v4455_v14, %v4440_v28 }
0x148b   :  { %4459 = vrot.lane.b32.xlu1 %v4457_v56, %s7089_s15 }
0x14fd   :  { %v4460_v57 = vpop.permute.xlu1 %4459 }
0x14fe   :  { %4462 = vst.msk [vmem:[#allocation2 + $0x30] sm:$0xff] %vm870_vm2, %v4460_v57  ;;  %v4463_v24 = vsel %vm870_vm2, %v4460_v57, 0  ;;  %v8159_v57 = vand.u32 4294901760, %v5000_v51 }
0x14ff   :  { %v8035_v62 = vand.u32 4294901760, %v4463_v24 }
0x1501   :  { %v4535_v13 = vsub.f32 %v4463_v24, %v8035_v62  ;;  %6832 = vmatmul.mubr.f32.vlgmr.msra.gmra.mxu1 %v8035_v62 }
0x1502   :  { %6846 = vmatpush3.msra.mxu1 %v7358_v11  ;;  %6853 = vmatprep.mubr.msk.f32.mxu1 %vm7086_vm1, %v7085_v1 }
0x1503   :  { %v4536_v61 = vand.u32 4294901760, %v4535_v13  ;;  %6847 = vmatprep.subr.mxu1 %v7085_v1 }
0x1504   :  { %6848 = vmatpush3.msra.mxu1 %v7365_v19 }
0x1505   :  { %v4537_v63 = vsub.f32 %v4535_v13, %v4536_v61  ;;  %6849 = vmatprep.subr.mxu1 %v7085_v1  ;;  %v4982_v12 = vld [vmem:[#allocation2 + $0x30] sm:$0xff] }
0x1506   :  { %6850 = vmatpush3.msra.mxu1 %v7371_v22 }
0x1507   :  { %6851 = vmatprep.subr.mxu1 %v7085_v1  ;;  %v4538_v26 = vand.u32 4294901760, %v4537_v63 }
0x1508   :  { %6852 = vmatpush3.msra.mxu1 %v7427_v32 }
0x1509   :  { %6854 = vmatmul.mubr.f32.vlgmr.msra.gmra.mxu1 %v4536_v61  ;;  %6867 = vmatprep.subr.mxu1 %v7085_v1 }
0x150a   :  { %6821 = vmatmul.mubr.f32.vlgmr.msra.gmra.mxu0 %v4538_v26  ;;  %6868 = vmatpush3.msra.mxu1 %v7358_v11  ;;  %v8095_v11 = vand.u32 4294901760, %v8075_v45 }
0x150b   :  { %6835 = vmatpush3.msra.mxu0 %v7405_v17  ;;  %6869 = vmatprep.subr.mxu1 %v7085_v1  ;;  %v8104_v17 = vand.u32 4294901760, %v8084_v21 }
0x150c   :  { %6836 = vmatprep.subr.mxu0 %v7085_v1  ;;  %6870 = vmatpush3.msra.mxu1 %v7365_v19  ;;  %v5192_v19 = vsub.f32 %v8065_v53, %v8081_v55 }
0x150d   :  { %6837 = vmatpush3.msra.mxu0 %v7415_v27  ;;  %6871 = vmatprep.subr.mxu1 %v7085_v1  ;;  %v5186_v27 = vand.u32 4294901760, %v5185_v29  ;;  %v5206_v6 = vsub.f32 %v8084_v21, %v8104_v17 }
0x150e   :  { %6838 = vmatprep.subr.mxu0 %v7085_v1  ;;  %6872 = vmatpush3.msra.mxu1 %v7371_v22  ;;  %v5199_v22 = vsub.f32 %v8075_v45, %v8095_v11  ;;  %v5193_v50 = vand.u32 4294901760, %v5192_v19 }
0x150f   :  { %6839 = vmatpush3.msra.mxu0 %v7425_v31  ;;  %6873 = vmatprep.subr.mxu1 %v7085_v1  ;;  %v4991_v31 = vsel %vm870_vm2, %v4978_v7, 0  ;;  %v5207_v28 = vand.u32 4294901760, %v5206_v6 }
0x1510   :  { %6840 = vmatprep.subr.mxu0 %v7085_v1  ;;  %6842 = vmatprep.mubr.msk.f32.mxu0 %vm7086_vm1, %v7085_v1  ;;  %v8130_v59 = vand.u32 4294901760, %v4991_v31 }
0x1511   :  { %6841 = vmatpush3.msra.mxu0 %v7436_v40  ;;  %6874 = vmatpush3.msra.mxu1 %v7427_v32  ;;  %v5200_v32 = vand.u32 4294901760, %v5199_v22  ;;  %v5079_v40 = vand.u32 4294901760, %v8115_v54 }
0x1512   :  { %6875 = vmatprep.mubr.msk.f32.mxu1 %vm7086_vm1, %v7085_v1  ;;  %6843 = vmatmul.mubr.f32.vlgmr.msra.gmra.mxu0 %v4535_v13  ;;  %v8150_v14 = vsub.f32 %v4991_v31, %v8130_v59  ;;  %v8181_v13 = vsub.f32 %v5000_v51, %v8159_v57 }
0x1513   :  { %6856 = vmatprep.subr.mxu0 %v7085_v1  ;;  %6876 = vmatmul.mubr.f32.vlgmr.msra.gmra.mxu1 %v8035_v62  ;;  %v5080_v4 = vsub.f32 %v8115_v54, %v5079_v40 }
0x1514   :  { %6898 = vmatprep.subr.mxu1 %v5186_v27  ;;  %6857 = vmatpush3.msra.mxu0 %v7408_v20  ;;  %v8138_v20 = vsub.f32 %v4988_v35, %v8126_v34  ;;  %v5099_v24 = vand.u32 4294901760, %v8150_v14  ;;  %v5129_v26 = vand.u32 4294901760, %v8181_v13 }
0x1515   :  { %6899 = vmatpush3.msra.mxu1 %v5186_v27  ;;  %6906 = vmatprep.mubr.f32.mxu1 %v8092_v52 }
0x1516   :  { %6858 = vmatprep.subr.mxu0 %v7085_v1  ;;  %6900 = vmatprep.subr.mxu1 %v5193_v50  ;;  %v5089_v56 = vand.u32 4294901760, %v8138_v20  ;;  %v5100_v0 = vsub.f32 %v8150_v14, %v5099_v24  ;;  %v5130_v7 = vsub.f32 %v8181_v13, %v5129_v26 }
0x1517   :  { %6859 = vmatpush3.msra.mxu0 %v7422_v30  ;;  %6901 = vmatpush3.msra.mxu1 %v5193_v50  ;;  %v5003_v30 = vsel %vm870_vm2, %v4982_v12, 0 }
0x1518   :  { %6860 = vmatprep.subr.mxu0 %v7085_v1  ;;  %6902 = vmatprep.subr.mxu1 %v5200_v32  ;;  %v8166_v37 = vand.u32 4294901760, %v5003_v30  ;;  %v5101_v47 = vand.u32 4294901760, %v5100_v0  ;;  %v5131_v35 = vand.u32 4294901760, %v5130_v7 }
0x1519   :  { %6861 = vmatpush3.msra.mxu0 %v7433_v36  ;;  %6903 = vmatpush3.msra.mxu1 %v5200_v32  ;;  %v5081_v36 = vand.u32 4294901760, %v5080_v4 }
0x151a   :  { %6862 = vmatprep.subr.mxu0 %v7085_v1  ;;  %6904 = vmatprep.subr.mxu1 %v5207_v28  ;;  %v8189_v10 = vsub.f32 %v5003_v30, %v8166_v37 }
0x151b   :  { %6863 = vmatpush3.msra.mxu0 %v7445_v44  ;;  %6864 = vmatprep.mubr.msk.f32.mxu0 %vm7086_vm1, %v7085_v1  ;;  %v8169_v44 = vsub.f32 %v4997_v18, %v8146_v46  ;;  %v5090_v1 = vsub.f32 %v8138_v20, %v5089_v56  ;;  %vm8576_vm1 = vmand %vm5802_vm15, %vm5803_vm0 }
0x151c   :  { %6905 = vmatpush3.msra.mxu1 %v5207_v28  ;;  %6865 = vmatmul.mubr.f32.vlgmr.msra.gmra.mxu0 %v8035_v62  ;;  %v5109_v62 = vand.u32 4294901760, %v8162_v60  ;;  %v5139_v38 = vand.u32 4294901760, %v8189_v10 }
0x151d   :  { %6878 = vmatprep.subr.mxu0 %v8040_v8  ;;  %6907 = vmatmul.mubr.f32.vlgmr.msra.gmra.mxu1 %v8126_v34  ;;  %v5119_v61 = vand.u32 4294901760, %v8169_v44  ;;  %v5091_v63 = vand.u32 4294901760, %v5090_v1 }
0x151e   :  { %6879 = vmatpush3.msra.mxu0 %v8040_v8  ;;  %6886 = vmatprep.mubr.f32.mxu0 %v5081_v36  ;;  %v5110_v16 = vsub.f32 %v8162_v60, %v5109_v62  ;;  %v5140_v22 = vsub.f32 %v8189_v10, %v5139_v38 }
0x151f   :  { %6909 = vmatprep.mubr.f32.mxu1 %v8130_v59  ;;  %6880 = vmatprep.subr.mxu0 %v8050_v33  ;;  %v5120_v29 = vsub.f32 %v8169_v44, %v5119_v61 }
0x1520   :  { %6881 = vmatpush3.msra.mxu0 %v8050_v33  ;;  %6938 = vmatprep.subr.mxu1 %v8040_v8  ;;  %v5111_v19 = vand.u32 4294901760, %v5110_v16  ;;  %v5141_v31 = vand.u32 4294901760, %v5140_v22 }
0x1521   :  { %6882 = vmatprep.subr.mxu0 %v8060_v43  ;;  %6910 = vmatmul.mubr.f32.gmra.mxu1 %v8140_v3  ;;  %v5121_v27 = vand.u32 4294901760, %v5120_v29 }
0x1522   :  { %6883 = vmatpush3.msra.mxu0 %v8060_v43  ;;  %6912 = vmatprep.mubr.f32.mxu1 %v8146_v46 }
0x1523   :  { %6884 = vmatprep.subr.mxu0 %v8067_v9  ;;  %6939 = vmatpush3.msra.mxu1 %v8040_v8 }
0x1524   :  { %6885 = vmatpush3.msra.mxu0 %v8067_v9  ;;  %6940 = vmatprep.subr.mxu1 %v8050_v33 }
0x1525   :  { %6887 = vmatmul.mubr.f32.vlgmr.msra.gmra.mxu0 %v5091_v63  ;;  %6913 = vmatmul.mubr.f32.gmra.mxu1 %v8159_v57 }
0x1526   :  { %6889 = vmatprep.mubr.f32.mxu0 %v5101_v47  ;;  %6915 = vmatprep.mubr.f32.mxu1 %v8166_v37 }
0x1527   :  { %6918 = vmatprep.subr.mxu0 %v8058_v15  ;;  %6941 = vmatpush3.msra.mxu1 %v8050_v33 }
0x1528   :  { %6919 = vmatpush3.msra.mxu0 %v8058_v15  ;;  %6942 = vmatprep.subr.mxu1 %v8060_v43 }
0x1529   :  { %6890 = vmatmul.mubr.f32.gmra.mxu0 %v5111_v19  ;;  %6920 = vmatprep.subr.mxu0 %v8065_v53 }
0x152a   :  { %6892 = vmatprep.mubr.f32.mxu0 %v5121_v27  ;;  %6921 = vmatpush3.msra.mxu0 %v8065_v53 }
0x152b   :  { %6943 = vmatpush3.msra.mxu1 %v8060_v43  ;;  %6922 = vmatprep.subr.mxu0 %v8075_v45 }
0x152c   :  { %6944 = vmatprep.subr.mxu1 %v8067_v9  ;;  %6923 = vmatpush3.msra.mxu0 %v8075_v45 }
0x152d   :  { %6893 = vmatmul.mubr.f32.gmra.mxu0 %v5131_v35  ;;  %6945 = vmatpush3.msra.mxu1 %v8067_v9 }
0x152e   :  { %6895 = vmatprep.mubr.f32.mxu0 %v5141_v31  ;;  %6924 = vmatprep.subr.mxu0 %v8084_v21 }
0x152f   :  { %6925 = vmatpush3.msra.mxu0 %v8084_v21  ;;  %6978 = vmatprep.subr.mxu1 %v8040_v8 }
0x1530   :  { %6958 = vmatprep.subr.mxu0 %v8072_v41 }
0x15c1   :  { %v4631_v15 = vpop.f32.mrf.mxu1 }
0x15c3   :  { %v6833_v53 = vpop.f32.mrf.mxu1 }
0x15c9   :  { %v4788_v5 = vpop.f32.mrf.mxu1 }
0x15ca   :  { %v4540_v50 = vpop.f32.mrf.mxu0 }
0x15cb   :  { %v6855_v6 = vpop.f32.mrf.mxu1  ;;  %v4541_v45 = vadd.f32 %v4540_v50, %v7509_v58 }
0x15cc   :  { %v6822_v2 = vpop.f32.mrf.mxu0 }
0x15cd   :  { %v4632_v25 = vadd.f32 %v4631_v15, %v4541_v45 }
0x15d2   :  { %v4711_v32 = vpop.f32.mrf.mxu0 }
0x15d3   :  { %v4946_v42 = vpop.f32.mrf.mxu1  ;;  %v4712_v12 = vadd.f32 %v4711_v32, %v4632_v25 }
0x15d4   :  { %v6844_v18 = vpop.f32.mrf.mxu0 }
0x15d5   :  { %v6877_v28 = vpop.f32.mrf.mxu1  ;;  %v4789_v4 = vadd.f32 %v4788_v5, %v4712_v12 }
0x15dc   :  { %v4871_v21 = vpop.f32.mrf.mxu0 }
0x15dd   :  { %v4872_v51 = vadd.f32 %v4871_v21, %v4789_v4 }
0x15de   :  { %v6866_v30 = vpop.f32.mrf.mxu0 }
0x15df   :  { %v4947_v36 = vadd.f32 %v4946_v42, %v4872_v51 }
0x15e1   :  { %v4950_v1 = vmul.f32 %v4947_v36, %v7571_v39 }
0x15e3   :  { %7033 = vtanh.f32 %v4950_v1 }
0x15f0   :  { %v7034_v0 = vpop.eup %7033 }
0x15f1   :  { %v4952_v63 = vmul.f32 %v7034_v0, %v7571_v39 }
0x15f3   :  { %v4953_v16 = vadd.f32 %v4952_v63, %v7574_v23 }
0x15f5   :  { %4956 = vrot.lane.b32.xlu0 %v4953_v16, %s7088_s14  ;;  %v4954_v29 = vmul.f32 %v4953_v16, %v8025_v48 }
0x1667   :  { %v4957_v58 = vpop.permute.xlu0 %4956 }
0x1668   :  { %v4959_v47 = vmul.f32 %v4957_v58, %v4953_v16 }
0x166a   :  { %4961 = vrot.lane.b32.xlu1 %v4959_v47, %s7089_s15 }
0x16dc   :  { %v4962_v19 = vpop.permute.xlu1 %4961 }
0x16dd   :  { %v4964_v7 = vadd.f32 %v4962_v19, %v4954_v29 }
0x16df   :  { %7035 = vtanh.f32 %v4964_v7 }
0x16ec   :  { %v7036_v27 = vpop.eup %7035 }
0x16ed   :  { %4967 = vrot.lane.b32.xlu0 %v7036_v27, %s7088_s14 }
0x175f   :  { %v4968_v22 = vpop.permute.xlu0 %4967 }
0x1760   :  { %v4970_v35 = vmul.f32 %v4968_v22, %v4953_v16 }
0x1762   :  { %4972 = vrot.lane.b32.xlu1 %v4970_v35, %s7089_s15 }
0x17d4   :  { %v4973_v39 = vpop.permute.xlu1 %4972 }
0x17d5   :  { %4975 = vst.msk [vmem:[#allocation2 + $0x38] sm:$0xff] %vm870_vm2, %v4973_v39  ;;  %v6029_v23 = vsel %vm870_vm2, %v4973_v39, %v4964_v7 }
0x17d6   :  { %v6031_v31 = vsel %vm6030_vm6, %v6029_v23, 0.0 }
0x17d7   :  { %6032 = vst [vmem:[%s8705_s2 + $0x40] sm:$0xff] %v6031_v31 }
0x17dc   :  { %v4983_v48 = vld [vmem:[#allocation2 + $0x38] sm:$0xff] }
0x17dd   :  { %v5006_v15 = vsel %vm870_vm2, %v4983_v48, 0 }
0x17de   :  { %v5147_v53 = vand.u32 4294901760, %v5006_v15 }
0x17e0   :  { %6916 = vmatmul.mubr.f32.gmra.mxu1 %v5147_v53  ;;  %v5148_v5 = vsub.f32 %v5006_v15, %v5147_v53 }
0x17e1   :  { %6946 = vmatprep.mubr.f32.mxu1 %v5079_v40 }
0x17e2   :  { %v5149_v50 = vand.u32 4294901760, %v5148_v5 }
0x17e4   :  { %6947 = vmatmul.mubr.f32.vlgmr.msra.gmra.mxu1 %v5089_v56  ;;  %v5150_v6 = vsub.f32 %v5148_v5, %v5149_v50 }
0x17e5   :  { %6949 = vmatprep.mubr.f32.mxu1 %v5099_v24  ;;  %6979 = vmatpush3.msra.mxu1 %v8040_v8  ;;  %v6908_v8 = vpop.f32.mrf.mxu1 }
0x17e6   :  { %v5151_v2 = vand.u32 4294901760, %v5150_v6  ;;  %6980 = vmatprep.subr.mxu1 %v8050_v33 }
0x17e7   :  { %6981 = vmatpush3.msra.mxu1 %v8050_v33  ;;  %v5244_v33 = vpop.f32.mrf.mxu1 }
0x17e8   :  { %6896 = vmatmul.mubr.f32.gmra.mxu0 %v5151_v2  ;;  %6950 = vmatmul.mubr.f32.gmra.mxu1 %v5109_v62 }
0x17e9   :  { %6926 = vmatprep.mubr.f32.mxu0 %v8115_v54  ;;  %6952 = vmatprep.mubr.f32.mxu1 %v5119_v61 }
0x17ea   :  { %6982 = vmatprep.subr.mxu1 %v8060_v43 }
0x17eb   :  { %6983 = vmatpush3.msra.mxu1 %v8060_v43  ;;  %v6911_v43 = vpop.f32.mrf.mxu1 }
0x17ec   :  { %6927 = vmatmul.mubr.f32.vlgmr.msra.gmra.mxu0 %v8138_v20  ;;  %6953 = vmatmul.mubr.f32.gmra.mxu1 %v5129_v26 }
0x17ed   :  { %6929 = vmatprep.mubr.f32.mxu0 %v8150_v14  ;;  %6955 = vmatprep.mubr.f32.mxu1 %v5139_v38 }
0x17ee   :  { %6959 = vmatpush3.msra.mxu0 %v8072_v41  ;;  %6984 = vmatprep.subr.mxu1 %v8067_v9  ;;  %v5256_v41 = vpop.f32.mrf.mxu1 }
0x17ef   :  { %6960 = vmatprep.subr.mxu0 %v8081_v55  ;;  %6985 = vmatpush3.msra.mxu1 %v8067_v9  ;;  %v6888_v9 = vpop.f32.mrf.mxu0 }
0x17f0   :  { %6930 = vmatmul.mubr.f32.gmra.mxu0 %v8162_v60  ;;  %6956 = vmatmul.mubr.f32.gmra.mxu1 %v5149_v50 }
0x17f1   :  { %6932 = vmatprep.mubr.f32.mxu0 %v8169_v44  ;;  %6961 = vmatpush3.msra.mxu0 %v8081_v55  ;;  %v5083_v55 = vpop.f32.mrf.mxu0  ;;  %v8308_v44 = vld [vmem:[%s8703_s1 + $0xa1] ss:$0 sm:$0xff] }
0x17f2   :  { %6986 = vmatprep.mubr.f32.mxu1 %v8092_v52  ;;  %6962 = vmatprep.subr.mxu0 %v8095_v11  ;;  %v5094_v26 = vadd.f32 %v6888_v9, %v8308_v44  ;;  %v5084_v32 = vadd.f32 %v5083_v55, %v8308_v44 }
0x17f3   :  { %6963 = vmatpush3.msra.mxu0 %v8095_v11  ;;  %v6891_v11 = vpop.f32.mrf.mxu0 }
0x17f4   :  { %6933 = vmatmul.mubr.f32.gmra.mxu0 %v8181_v13  ;;  %6987 = vmatmul.mubr.f32.vlgmr.msra.gmra.mxu1 %v8126_v34  ;;  %v5251_v25 = vadd.f32 %v6908_v8, %v5094_v26  ;;  %v5114_v28 = vadd.f32 %v6891_v11, %v8308_v44  ;;  %v5245_v51 = vadd.f32 %v5244_v33, %v5084_v32 }
0x17f5   :  { %6935 = vmatprep.mubr.f32.mxu0 %v8189_v10  ;;  %6989 = vmatprep.mubr.f32.mxu1 %v8130_v59  ;;  %v5103_v54 = vpop.f32.mrf.mxu0 }
0x17f6   :  { %6964 = vmatprep.subr.mxu0 %v8104_v17  ;;  %v5104_v4 = vadd.f32 %v5103_v54, %v8308_v44  ;;  %v5263_v0 = vadd.f32 %v6911_v43, %v5114_v28 }
0x17f7   :  { %6965 = vmatpush3.msra.mxu0 %v8104_v17  ;;  %v6894_v40 = vpop.f32.mrf.mxu0 }
0x17f8   :  { %6936 = vmatmul.mubr.f32.gmra.mxu0 %v5148_v5  ;;  %6990 = vmatmul.mubr.f32.gmra.mxu1 %v8140_v3  ;;  %v5257_v58 = vadd.f32 %v5256_v41, %v5104_v4  ;;  %v5134_v9 = vadd.f32 %v6894_v40, %v8308_v44 }
0x17f9   :  { %6966 = vmatprep.mubr.f32.mxu0 %v8092_v52  ;;  %6992 = vmatprep.mubr.f32.mxu1 %v8146_v46  ;;  %v8295_v52 = vpop.f32.mrf.mxu1 }
0x17fb   :  { %v5268_v17 = vpop.f32.mrf.mxu1 }
0x17fc   :  { %6967 = vmatmul.mubr.f32.vlgmr.msra.gmra.mxu0 %v8126_v34  ;;  %6993 = vmatmul.mubr.f32.gmra.mxu1 %v8159_v57 }
0x17fd   :  { %6969 = vmatprep.mubr.f32.mxu0 %v8130_v59  ;;  %6995 = vmatprep.mubr.f32.mxu1 %v8166_v37 }
0x1800   :  { %6970 = vmatmul.mubr.f32.gmra.mxu0 %v8140_v3  ;;  %6996 = vmatmul.mubr.f32.gmra.mxu1 %v5147_v53  ;;  %v5123_v3 = vpop.f32.mrf.mxu0 }
0x1801   :  { %6972 = vmatprep.mubr.f32.mxu0 %v8146_v46  ;;  %v5124_v16 = vadd.f32 %v5123_v3, %v8308_v44 }
0x1803   :  { %v5269_v31 = vadd.f32 %v5268_v17, %v5124_v16 }
0x1804   :  { %6973 = vmatmul.mubr.f32.gmra.mxu0 %v8159_v57 }
0x1805   :  { %6975 = vmatprep.mubr.f32.mxu0 %v8166_v37 }
0x1808   :  { %6976 = vmatmul.mubr.f32.gmra.mxu0 %v5147_v53 }
0x18a0   :  { %v8297_v34 = vpop.f32.mrf.mxu1 }
0x18a2   :  { %v8299_v59 = vpop.f32.mrf.mxu1 }
0x18a4   :  { %v6948_v20 = vpop.f32.mrf.mxu1 }
0x18a6   :  { %v5492_v46 = vpop.f32.mrf.mxu1 }
0x18a8   :  { %v8301_v14 = vpop.f32.mrf.mxu0  ;;  %v6951_v56 = vpop.f32.mrf.mxu1 }
0x18aa   :  { %v5143_v57 = vpop.f32.mrf.mxu0  ;;  %v5508_v60 = vpop.f32.mrf.mxu1 }
0x18ab   :  { %v5144_v53 = vadd.f32 %v5143_v57, %v8308_v44  ;;  %v5275_v57 = vadd.f32 %v8295_v52, %v5134_v9 }
0x18ac   :  { %v6928_v24 = vpop.f32.mrf.mxu0  ;;  %v8303_v37 = vpop.f32.mrf.mxu1 }
0x18ad   :  { %v5374_v21 = vadd.f32 %v6928_v24, %v5251_v25  ;;  %v5281_v3 = vadd.f32 %v8299_v59, %v5144_v53 }
0x18ae   :  { %v5366_v62 = vpop.f32.mrf.mxu0  ;;  %v5524_v13 = vpop.f32.mrf.mxu1 }
0x18af   :  { %v5367_v1 = vadd.f32 %v5366_v62, %v5245_v51  ;;  %v5501_v47 = vadd.f32 %v6948_v20, %v5374_v21 }
0x18b0   :  { %v6931_v61 = vpop.f32.mrf.mxu0  ;;  %v8310_v10 = vpop.f32.mrf.mxu1 }
0x18b1   :  { %v5388_v29 = vadd.f32 %v6931_v61, %v5263_v0  ;;  %v5493_v35 = vadd.f32 %v5492_v46, %v5367_v1 }
0x18b2   :  { %v5380_v38 = vpop.f32.mrf.mxu0  ;;  %v8313_v45 = vpop.f32.mrf.mxu1 }
0x18b3   :  { %v5381_v27 = vadd.f32 %v5380_v38, %v5257_v58  ;;  %v5517_v50 = vadd.f32 %v6951_v56, %v5388_v29 }
0x18b4   :  { %v6934_v42 = vpop.f32.mrf.mxu0  ;;  %v6988_v18 = vpop.f32.mrf.mxu1 }
0x18b5   :  { %v5509_v43 = vadd.f32 %v5508_v60, %v5381_v27  ;;  %v5402_v59 = vadd.f32 %v6934_v42, %v5275_v57 }
0x18b6   :  { %v5394_v12 = vpop.f32.mrf.mxu0  ;;  %v5748_v30 = vpop.f32.mrf.mxu1 }
0x18b7   :  { %v5395_v2 = vadd.f32 %v5394_v12, %v5269_v31  ;;  %v5533_v4 = vadd.f32 %v8303_v37, %v5402_v59 }
0x18b8   :  { %v8318_v36 = vpop.f32.mrf.mxu0  ;;  %v6991_v19 = vpop.f32.mrf.mxu1 }
0x18b9   :  { %v5525_v56 = vadd.f32 %v5524_v13, %v5395_v2 }
0x18ba   :  { %v5408_v63 = vpop.f32.mrf.mxu0  ;;  %v5760_v5 = vpop.f32.mrf.mxu1 }
0x18bb   :  { %v5409_v61 = vadd.f32 %v5408_v63, %v5281_v3 }
0x18bc   :  { %v6968_v7 = vpop.f32.mrf.mxu0  ;;  %v6994_v54 = vpop.f32.mrf.mxu1 }
0x18bd   :  { %v5638_v22 = vadd.f32 %v6968_v7, %v5501_v47  ;;  %v5541_v12 = vadd.f32 %v8313_v45, %v5409_v61 }
0x18be   :  { %v5631_v23 = vpop.f32.mrf.mxu0  ;;  %v5772_v38 = vpop.f32.mrf.mxu1 }
0x18bf   :  { %v8328_v48 = vadd.f32 %v6988_v18, %v5638_v22  ;;  %v5632_v15 = vadd.f32 %v5631_v23, %v5493_v35  ;;  %v5154_v18 = vadd.f32 %v8301_v14, %v8308_v44 }
0x18c0   :  { %v6971_v6 = vpop.f32.mrf.mxu0  ;;  %v6997_v42 = vpop.f32.mrf.mxu1 }
0x18c1   :  { %v8331_v8 = vadd.f32 %v5748_v30, %v5632_v15  ;;  %v5830_v33 = vsel %vm8323_vm9, %v8328_v48, -1e+30  ;;  %v5650_v41 = vadd.f32 %v6971_v6, %v5517_v50  ;;  %v5806_v55 = vsel %vm5794_vm10, %v8328_v48, -1e+30 }
0x18c2   :  { %5839 = vmax.xlane.f32.xlu1 %v5830_v33  ;;  %v5643_v11 = vpop.f32.mrf.mxu0  ;;  %5815 = vmax.xlane.f32.xlu0 %v5806_v55  ;;  %v5287_v30 = vadd.f32 %v8297_v34, %v5154_v18  ;;  %v5784_v1 = vpop.f32.mrf.mxu1  ;;  %v5878_v50 = vsel %vm8405_vm13, %v8328_v48, 0.0 }
0x18c3   :  { %v5644_v17 = vadd.f32 %v5643_v11, %v5509_v43  ;;  %v5805_v40 = vsel %vm5794_vm10, %v8331_v8, -1e+30  ;;  %v8347_v60 = vadd.f32 %v6991_v19, %v5650_v41  ;;  %v5829_v62 = vsel %vm8323_vm9, %v8331_v8, -1e+30 }
0x18c4   :  { %v6974_v20 = vpop.f32.mrf.mxu0  ;;  %v5416_v45 = vadd.f32 %v8318_v36, %v5287_v30 }
0x18c5   :  { %v8341_v46 = vadd.f32 %v5760_v5, %v5644_v17  ;;  %v5832_v28 = vsel %vm8323_vm9, %v8347_v60, -1e+30  ;;  %v5662_v14 = vadd.f32 %v6974_v20, %v5533_v4  ;;  %v5808_v44 = vsel %vm5794_vm10, %v8347_v60, -1e+30 }
0x18c6   :  { %v5655_v24 = vpop.f32.mrf.mxu0  ;;  %5813 = vmax.xlane.f32.xlu1 %v5805_v40  ;;  %5837 = vmax.xlane.f32.xlu0 %v5829_v62  ;;  %v5549_v16 = vadd.f32 %v8310_v10, %v5416_v45  ;;  %v5877_v17 = vsel %vm8405_vm13, %v8331_v8, 0.0  ;;  %v5880_v61 = vsel %vm8405_vm13, %v8347_v60, 0.0 }
0x18c7   :  { %v5656_v26 = vadd.f32 %v5655_v24, %v5525_v56  ;;  %v5807_v52 = vsel %vm5794_vm10, %v8341_v46, -1e+30  ;;  %v8377_v63 = vadd.f32 %v6994_v54, %v5662_v14  ;;  %v5831_v34 = vsel %vm8323_vm9, %v8341_v46, -1e+30 }
0x18c8   :  { %v6977_v13 = vpop.f32.mrf.mxu0 }
0x18c9   :  { %v8352_v32 = vadd.f32 %v5772_v38, %v5656_v26  ;;  %v5674_v58 = vadd.f32 %v6977_v13, %v5549_v16  ;;  %v5834_v47 = vsel %vm8323_vm9, %v8377_v63, -1e+30  ;;  %v5810_v10 = vsel %vm5794_vm10, %v8377_v63, -1e+30 }
0x18ca   :  { %v5667_v25 = vpop.f32.mrf.mxu0  ;;  %5817 = vmax.xlane.f32.xlu1 %v5807_v52  ;;  %5843 = vmax.xlane.f32.xlu0 %v5832_v28 }
0x18cb   :  { %v5668_v21 = vadd.f32 %v5667_v25, %v5541_v12  ;;  %v5833_v51 = vsel %vm8323_vm9, %v8352_v32, -1e+30  ;;  %v5809_v37 = vsel %vm5794_vm10, %v8352_v32, -1e+30  ;;  %v8392_v19 = vadd.f32 %v6997_v42, %v5674_v58 }
0x18cd   :  { %v8372_v0 = vadd.f32 %v5784_v1, %v5668_v21  ;;  %v5836_v7 = vsel %vm8323_vm9, %v8392_v19, -1e+30  ;;  %v5812_v27 = vsel %vm5794_vm10, %v8392_v19, -1e+30  ;;  %v5881_v1 = vsel %vm8405_vm13, %v8352_v32, 0.0 }
0x18ce   :  { %5845 = vmax.xlane.f32.xlu1 %v5833_v51  ;;  %5819 = vmax.xlane.f32.xlu0 %v5808_v44  ;;  %v5879_v51 = vsel %vm8405_vm13, %v8341_v46, 0.0 }
0x18cf   :  { %v5835_v36 = vsel %vm8323_vm9, %v8372_v0, -1e+30  ;;  %v5811_v29 = vsel %vm5794_vm10, %v8372_v0, -1e+30 }
0x18d2   :  { %5821 = vmax.xlane.f32.xlu1 %v5809_v37  ;;  %5841 = vmax.xlane.f32.xlu0 %v5831_v34 }
0x18d6   :  { %5849 = vmax.xlane.f32.xlu1 %v5835_v36  ;;  %5847 = vmax.xlane.f32.xlu0 %v5834_v47 }
0x18da   :  { %5825 = vmax.xlane.f32.xlu1 %v5811_v29  ;;  %5823 = vmax.xlane.f32.xlu0 %v5810_v10 }
0x18de   :  { %5851 = vmax.xlane.f32.xlu0 %v5836_v7 }
0x18e2   :  { %5827 = vmax.xlane.f32.xlu0 %v5812_v27 }
0x194b   :  { %v5840_v22 = vpop.xlane.xlu1 %5839  ;;  %v5816_v31 = vpop.xlane.xlu0 %5815 }
0x194c   :  { %v5854_v23 = vsel %vm8323_vm9, %v5840_v22, 0.0 }
0x194d   :  { %v5862_v53 = vsel %vm5794_vm10, %v5816_v31, %v5854_v23  ;;  %v5882_v31 = vsel %vm8405_vm13, %v8377_v63, 0.0 }
0x194e   :  { %v5870_v5 = vsub.f32 %v8328_v48, %v5862_v53 }
0x194f   :  { %v5814_v6 = vpop.xlane.xlu1 %5813  ;;  %v5838_v33 = vpop.xlane.xlu0 %5837 }
0x1950   :  { %v5886_v2 = vsel %vm8415_vm14, %v5870_v5, %v5878_v50  ;;  %v5853_v9 = vsel %vm8323_vm9, %v5838_v33, 0.0 }
0x1951   :  { %v5895_v43 = vmul.f32 1.442695, %v5886_v2  ;;  %v5861_v41 = vsel %vm5794_vm10, %v5814_v6, %v5853_v9  ;;  %v5883_v2 = vsel %vm8405_vm13, %v8372_v0, 0.0 }
0x1952   :  { %v5869_v55 = vsub.f32 %v8331_v8, %v5861_v41 }
0x1953   :  { %7037 = vpow2.f32 %v5895_v43  ;;  %v5818_v11 = vpop.xlane.xlu1 %5817  ;;  %v5844_v54 = vpop.xlane.xlu0 %5843 }
0x1954   :  { %v5885_v20 = vsel %vm8415_vm14, %v5869_v55, %v5877_v17  ;;  %v5856_v40 = vsel %vm8323_vm9, %v5844_v54, 0.0 }
0x1955   :  { %v5893_v3 = vmul.f32 1.442695, %v5885_v20 }
0x1957   :  { %v5846_v56 = vpop.xlane.xlu1 %5845  ;;  %7039 = vpow2.f32 %v5893_v3  ;;  %v5820_v57 = vpop.xlane.xlu0 %5819  ;;  %v5884_v3 = vsel %vm8405_vm13, %v8392_v19, 0.0 }
0x1958   :  { %v5864_v24 = vsel %vm5794_vm10, %v5820_v57, %v5856_v40  ;;  %v5857_v26 = vsel %vm8323_vm9, %v5846_v56, 0.0 }
0x1959   :  { %v5872_v62 = vsub.f32 %v8347_v60, %v5864_v24 }
0x195b   :  { %v5822_v59 = vpop.xlane.xlu1 %5821  ;;  %v5888_v38 = vsel %vm8415_vm14, %v5872_v62, %v5880_v61  ;;  %v5842_v13 = vpop.xlane.xlu0 %5841 }
0x195c   :  { %v5865_v52 = vsel %vm5794_vm10, %v5822_v59, %v5857_v26  ;;  %v5899_v18 = vmul.f32 1.442695, %v5888_v38  ;;  %v5855_v25 = vsel %vm8323_vm9, %v5842_v13, 0.0 }
0x195d   :  { %v5863_v28 = vsel %vm5794_vm10, %v5818_v11, %v5855_v25  ;;  %v5873_v42 = vsub.f32 %v8352_v32, %v5865_v52 }
0x195e   :  { %7041 = vpow2.f32 %v5899_v18  ;;  %v5871_v12 = vsub.f32 %v8341_v46, %v5863_v28 }
0x195f   :  { %v5850_v4 = vpop.xlane.xlu1 %5849  ;;  %v5848_v30 = vpop.xlane.xlu0 %5847  ;;  %v5889_v37 = vsel %vm8415_vm14, %v5873_v42, %v5881_v1 }
0x1960   :  { %v8457_v21 = vpop.eup %7037  ;;  %v5887_v14 = vsel %vm8415_vm14, %v5871_v12, %v5879_v51  ;;  %v5859_v34 = vsel %vm8323_vm9, %v5850_v4, 0.0  ;;  %v5858_v36 = vsel %vm8323_vm9, %v5848_v30, 0.0  ;;  %v5901_v27 = vmul.f32 1.442695, %v5889_v37 }
0x1961   :  { %v5934_v44 = vsel %vm8323_vm9, %v8457_v21, 0.0  ;;  %v5897_v45 = vmul.f32 1.442695, %v5887_v14  ;;  %v5910_v7 = vsel %vm5794_vm10, %v8457_v21, 0.0 }
0x1962   :  { %5943 = vadd.xlane.f32.xlu0 %v5934_v44 }
0x1963   :  { %v5826_v16 = vpop.xlane.xlu1 %5825  ;;  %7043 = vpow2.f32 %v5897_v45  ;;  %v5824_v58 = vpop.xlane.xlu0 %5823 }
0x1964   :  { %v5867_v47 = vsel %vm5794_vm10, %v5826_v16, %v5859_v34  ;;  %v8478_v29 = vpop.eup %7039  ;;  %v5866_v10 = vsel %vm5794_vm10, %v5824_v58, %v5858_v36  ;;  %7045 = vpow2.f32 %v5901_v27 }
0x1965   :  { %v5874_v22 = vsub.f32 %v8377_v63, %v5866_v10  ;;  %v5933_v23 = vsel %vm8323_vm9, %v8478_v29, 0.0  ;;  %v5875_v53 = vsub.f32 %v8372_v0, %v5867_v47  ;;  %v5909_v33 = vsel %vm5794_vm10, %v8478_v29, 0.0 }
0x1966   :  { %5919 = vadd.xlane.f32.xlu0 %v5910_v7  ;;  %5941 = vadd.xlane.f32.xlu1 %v5933_v23 }
0x1967   :  { %v5890_v5 = vsel %vm8415_vm14, %v5874_v22, %v5882_v31  ;;  %v5852_v50 = vpop.xlane.xlu0 %5851  ;;  %v5891_v43 = vsel %vm8415_vm14, %v5875_v53, %v5883_v2 }
0x1968   :  { %v5903_v6 = vmul.f32 1.442695, %v5890_v5  ;;  %v5860_v41 = vsel %vm8323_vm9, %v5852_v50, 0.0  ;;  %v5905_v54 = vmul.f32 1.442695, %v5891_v43 }
0x196a   :  { %7047 = vpow2.f32 %v5903_v6  ;;  %5917 = vadd.xlane.f32.xlu1 %v5909_v33 }
0x196b   :  { %v8503_v9 = vpop.eup %7041  ;;  %v5828_v55 = vpop.xlane.xlu0 %5827  ;;  %7049 = vpow2.f32 %v5905_v54 }
0x196c   :  { %v5868_v11 = vsel %vm5794_vm10, %v5828_v55, %v5860_v41  ;;  %v5936_v17 = vsel %vm8323_vm9, %v8503_v9, 0.0  ;;  %v5912_v24 = vsel %vm5794_vm10, %v8503_v9, 0.0 }
0x196d   :  { %v5876_v20 = vsub.f32 %v8392_v19, %v5868_v11  ;;  %5947 = vadd.xlane.f32.xlu0 %v5936_v17 }
0x196f   :  { %v5892_v56 = vsel %vm8415_vm14, %v5876_v20, %v5884_v3 }
0x1970   :  { %v8518_v40 = vpop.eup %7043  ;;  %v5907_v57 = vmul.f32 1.442695, %v5892_v56 }
0x1971   :  { %5923 = vadd.xlane.f32.xlu0 %v5912_v24  ;;  %v5935_v62 = vsel %vm8323_vm9, %v8518_v40, 0.0  ;;  %v5911_v61 = vsel %vm5794_vm10, %v8518_v40, 0.0  ;;  %v8529_v26 = vpop.eup %7045 }
0x1972   :  { %7051 = vpow2.f32 %v5907_v57  ;;  %5945 = vadd.xlane.f32.xlu1 %v5935_v62  ;;  %v5937_v13 = vsel %vm8323_vm9, %v8529_v26, 0.0  ;;  %v5913_v18 = vsel %vm5794_vm10, %v8529_v26, 0.0 }
0x1973   :  { %7053 = vtanh.f32 %v8328_v48 }
0x1976   :  { %5921 = vadd.xlane.f32.xlu1 %v5911_v61 }
0x1977   :  { %v8531_v59 = vpop.eup %7047 }
0x1978   :  { %v5938_v38 = vsel %vm8323_vm9, %v8531_v59, 0.0  ;;  %v5914_v52 = vsel %vm5794_vm10, %v8531_v59, 0.0  ;;  %v8545_v25 = vpop.eup %7049 }
0x1979   :  { %5951 = vadd.xlane.f32.xlu0 %v5938_v38  ;;  %v5939_v42 = vsel %vm8323_vm9, %v8545_v25, 0.0  ;;  %v5915_v51 = vsel %vm5794_vm10, %v8545_v25, 0.0 }
0x197a   :  { %5949 = vadd.xlane.f32.xlu1 %v5937_v13 }
0x197d   :  { %5927 = vadd.xlane.f32.xlu0 %v5914_v52 }
0x197e   :  { %5925 = vadd.xlane.f32.xlu1 %v5913_v18 }
0x197f   :  { %v8547_v28 = vpop.eup %7051 }
0x1980   :  { %v5940_v12 = vsel %vm8323_vm9, %v8547_v28, 0.0  ;;  %v5916_v4 = vsel %vm5794_vm10, %v8547_v28, 0.0  ;;  %v7054_v10 = vpop.eup %7053 }
0x1981   :  { %5955 = vadd.xlane.f32.xlu0 %v5940_v12  ;;  %v5998_v31 = vsel %vm8576_vm1, %v7054_v10, %v8328_v48 }
0x1982   :  { %5953 = vadd.xlane.f32.xlu1 %v5939_v42  ;;  %v6006_v5 = vsel %vm8405_vm13, %v8457_v21, %v5998_v31 }
0x1985   :  { %5931 = vadd.xlane.f32.xlu0 %v5916_v4 }
0x1986   :  { %5929 = vadd.xlane.f32.xlu1 %v5915_v51 }
0x19eb   :  { %v5944_v30 = vpop.xlane.xlu0 %5943 }
0x19ec   :  { %v5958_v14 = vsel %vm8323_vm9, %v5944_v30, 1.0 }
0x19ef   :  { %v5920_v44 = vpop.xlane.xlu0 %5919  ;;  %v5942_v1 = vpop.xlane.xlu1 %5941 }
0x19f0   :  { %v5966_v45 = vsel %vm5794_vm10, %v5920_v44, %v5958_v14  ;;  %v5957_v37 = vsel %vm8323_vm9, %v5942_v1, 1.0 }
0x19f1   :  { %7055 = vrcp.f32 %v5966_v45 }
0x19f2   :  { %7057 = vtanh.f32 %v8331_v8 }
0x19f3   :  { %v5918_v34 = vpop.xlane.xlu1 %5917 }
0x19f4   :  { %v5965_v16 = vsel %vm5794_vm10, %v5918_v34, %v5957_v37 }
0x19f5   :  { %7059 = vrcp.f32 %v5965_v16 }
0x19f6   :  { %v5948_v36 = vpop.xlane.xlu0 %5947  ;;  %7061 = vtanh.f32 %v8347_v60 }
0x19f7   :  { %v5960_v58 = vsel %vm8323_vm9, %v5948_v36, 1.0 }
0x19fa   :  { %v5924_v47 = vpop.xlane.xlu0 %5923 }
0x19fb   :  { %v5968_v27 = vsel %vm5794_vm10, %v5924_v47, %v5960_v58  ;;  %v5946_v22 = vpop.xlane.xlu1 %5945 }
0x19fc   :  { %7063 = vrcp.f32 %v5968_v27  ;;  %v5959_v50 = vsel %vm8323_vm9, %v5946_v22, 1.0 }
0x19fd   :  { %7065 = vtanh.f32 %v8341_v46 }
0x19fe   :  { %v7056_v23 = vpop.eup %7055 }
0x19ff   :  { %v5976_v53 = vmul.f32 %v7056_v23, %v8457_v21  ;;  %v5922_v6 = vpop.xlane.xlu1 %5921  ;;  %v7058_v2 = vpop.eup %7057 }
0x1a00   :  { %v5967_v43 = vsel %vm5794_vm10, %v5922_v6, %v5959_v50  ;;  %v5997_v21 = vsel %vm8576_vm1, %v7058_v2, %v8331_v8 }
0x1a01   :  { %v6014_v33 = vsel %vm8415_vm14, %v5976_v53, %v6006_v5  ;;  %7067 = vrcp.f32 %v5967_v43  ;;  %v6005_v17 = vsel %vm8405_vm13, %v8478_v29, %v5997_v21 }
0x1a02   :  { %6022 = vst [vmem:[%s8705_s2 + $0x8] sm:$0xff] %v6014_v33  ;;  %v7060_v48 = vpop.eup %7059  ;;  %v5952_v41 = vpop.xlane.xlu0 %5951  ;;  %7069 = vtanh.f32 %v8377_v63 }
0x1a03   :  { %v5974_v55 = vmul.f32 %v7060_v48, %v8478_v29  ;;  %v5950_v11 = vpop.xlane.xlu1 %5949  ;;  %v5962_v20 = vsel %vm8323_vm9, %v5952_v41, 1.0  ;;  %v7062_v3 = vpop.eup %7061  ;;  %7071 = vtanh.f32 %v8352_v32 }
0x1a04   :  { %v5961_v56 = vsel %vm8323_vm9, %v5950_v11, 1.0  ;;  %v6000_v61 = vsel %vm8576_vm1, %v7062_v3, %v8347_v60 }
0x1a05   :  { %v6013_v54 = vsel %vm8415_vm14, %v5974_v55, %v6005_v17  ;;  %v6008_v52 = vsel %vm8405_vm13, %v8503_v9, %v6000_v61 }
0x1a06   :  { %6021 = vst [vmem:[%s8705_s2] sm:$0xff] %v6013_v54  ;;  %v5928_v8 = vpop.xlane.xlu0 %5927 }
0x1a07   :  { %v5970_v29 = vsel %vm5794_vm10, %v5928_v8, %v5962_v20  ;;  %v5926_v57 = vpop.xlane.xlu1 %5925 }
0x1a08   :  { %7073 = vrcp.f32 %v5970_v29  ;;  %v5969_v24 = vsel %vm5794_vm10, %v5926_v57, %v5961_v56 }
0x1a09   :  { %v7064_v62 = vpop.eup %7063  ;;  %7075 = vrcp.f32 %v5969_v24 }
0x1a0a   :  { %v5980_v38 = vmul.f32 %v7064_v62, %v8503_v9  ;;  %v5956_v13 = vpop.xlane.xlu0 %5955  ;;  %v7066_v12 = vpop.eup %7065  ;;  %7077 = vtanh.f32 %v8392_v19 }
0x1a0b   :  { %v5954_v18 = vpop.xlane.xlu1 %5953  ;;  %7079 = vtanh.f32 %v8372_v0  ;;  %v5964_v60 = vsel %vm8323_vm9, %v5956_v13, 1.0  ;;  %v5999_v9 = vsel %vm8576_vm1, %v7066_v12, %v8341_v46 }
0x1a0c   :  { %v6016_v42 = vsel %vm8415_vm14, %v5980_v38, %v6008_v52  ;;  %v5963_v14 = vsel %vm8323_vm9, %v5954_v18, 1.0  ;;  %v6007_v1 = vsel %vm8405_vm13, %v8518_v40, %v5999_v9 }
0x1a0d   :  { %6024 = vst [vmem:[%s8705_s2 + $0x18] sm:$0xff] %v6016_v42 }
0x1a0e   :  { %v7068_v4 = vpop.eup %7067  ;;  %v5932_v51 = vpop.xlane.xlu0 %5931 }
0x1a0f   :  { %v5978_v30 = vmul.f32 %v7068_v4, %v8518_v40  ;;  %v5972_v44 = vsel %vm5794_vm10, %v5932_v51, %v5964_v60  ;;  %v5930_v45 = vpop.xlane.xlu1 %5929  ;;  %v7070_v39 = vpop.eup %7069 }
0x1a10   :  { %7081 = vrcp.f32 %v5972_v44  ;;  %v5971_v37 = vsel %vm5794_vm10, %v5930_v45, %v5963_v14  ;;  %v7072_v34 = vpop.eup %7071  ;;  %v6002_v40 = vsel %vm8576_vm1, %v7070_v39, %v8377_v63 }
0x1a11   :  { %v6015_v46 = vsel %vm8415_vm14, %v5978_v30, %v6007_v1  ;;  %7083 = vrcp.f32 %v5971_v37  ;;  %v6001_v49 = vsel %vm8576_vm1, %v7072_v34, %v8352_v32  ;;  %v6010_v47 = vsel %vm8405_vm13, %v8531_v59, %v6002_v40 }
0x1a12   :  { %6023 = vst [vmem:[%s8705_s2 + $0x10] sm:$0xff] %v6015_v46  ;;  %v6009_v22 = vsel %vm8405_vm13, %v8529_v26, %v6001_v49 }
0x1a15   :  { %v7074_v16 = vpop.eup %7073 }
0x1a16   :  { %v7076_v36 = vpop.eup %7075  ;;  %v5984_v58 = vmul.f32 %v7074_v16, %v8531_v59 }
0x1a17   :  { %v5982_v10 = vmul.f32 %v7076_v36, %v8529_v26  ;;  %v7078_v63 = vpop.eup %7077 }
0x1a18   :  { %v6018_v27 = vsel %vm8415_vm14, %v5984_v58, %v6010_v47  ;;  %v7080_v59 = vpop.eup %7079  ;;  %v6004_v53 = vsel %vm8576_vm1, %v7078_v63, %v8392_v19 }
0x1a19   :  { %6026 = vst [vmem:[%s8705_s2 + $0x28] sm:$0xff] %v6018_v27  ;;  %v6017_v32 = vsel %vm8415_vm14, %v5982_v10, %v6009_v22  ;;  %v6003_v5 = vsel %vm8576_vm1, %v7080_v59, %v8372_v0  ;;  %v6012_v50 = vsel %vm8405_vm13, %v8547_v28, %v6004_v53 }
0x1a1a   :  { %6025 = vst [vmem:[%s8705_s2 + $0x20] sm:$0xff] %v6017_v32  ;;  %v6011_v33 = vsel %vm8405_vm13, %v8545_v25, %v6003_v5 }
0x1a1d   :  { %v7082_v23 = vpop.eup %7081 }
0x1a1e   :  { %v7084_v31 = vpop.eup %7083  ;;  %v5988_v26 = vmul.f32 %v7082_v23, %v8547_v28 }
0x1a1f   :  { %v5986_v6 = vmul.f32 %v7084_v31, %v8545_v25 }
0x1a20   :  { %v6020_v2 = vsel %vm8415_vm14, %v5988_v26, %v6012_v50 }
0x1a21   :  { %6028 = vst [vmem:[%s8705_s2 + $0x38] sm:$0xff] %v6020_v2  ;;  %v6019_v0 = vsel %vm8415_vm14, %v5986_v6, %v6011_v33 }
0x1a22   :  { %6027 = vst [vmem:[%s8705_s2 + $0x30] sm:$0xff] %v6019_v0 }

</bundles_post_ra>
